<compile_context>
chip_gen: v6e
topology: v6e:2x2x1
jax: 0.10.0
libtpu: 0.0.40
codegen_flags: <defaults>
</compile_context>

<pallas_src>
import jax
import jax.numpy as jnp
from jax.experimental import pallas as pl
from jax.experimental.pallas import tpu as pltpu

EPS = 1e-5


def conv_with_se_kernel(lhs1_ref, w1m_ref, g1_ref, be1_ref,
                        wse1_ref, bse1_ref, wse2_ref, bse2_ref,
                        w2m_ref, g2_ref, be2_ref, fold_ref, expand_ref,
                        out_ref, yh_ref):
    N, H, WC = out_ref.shape
    C = wse2_ref.shape[1]          # out_channels
    W = WC // C
    NH = N * H
    inv_m = 1.0 / (N * H * W)

    fold = fold_ref[...]           # (WC, C)  0/1: sums lane-packed W positions
    expand = expand_ref[...]       # (C, WC)  0/1: broadcasts channel over W

    def bn_relu(acc, g_ref, be_ref):
        # acc: (NH, W*C), lane-packed as w*C + c.  Training-mode BN (batch
        # stats, biased variance) folded into one scale/shift per channel; the
        # conv bias is omitted upstream since mean subtraction cancels it.
        # Channel fold/expand via MXU selection matmuls (no XLU relayouts).
        rs = jnp.sum(acc, axis=0, keepdims=True)              # (1, WC)
        rsq = jnp.sum(acc * acc, axis=0, keepdims=True)       # (1, WC)
        mom = jnp.dot(jnp.concatenate([rs, rsq], axis=0), fold,
                      preferred_element_type=jnp.float32) * inv_m   # (2, C)
        mu = mom[0:1]                                          # (1, C)
        var = jnp.maximum(mom[1:2] - mu * mu, 0.0)             # (1, C)
        scale = g_ref[...] * jax.lax.rsqrt(var + EPS)          # (1, C)
        shift = be_ref[...] - mu * scale                       # (1, C)
        ss = jnp.dot(jnp.concatenate([scale, shift], axis=0), expand,
                     preferred_element_type=jnp.float32)       # (2, WC)
        return jnp.maximum(acc * ss[0:1] + ss[1:2], 0.0)       # (NH, WC)

    # ---------------- conv1: single MXU matmul (K = 3*W*Cin) ----------------
    acc1 = jnp.dot(lhs1_ref[...], w1m_ref[...],
                   preferred_element_type=jnp.float32)          # (NH, WC)
    y = bn_relu(acc1, g1_ref, be1_ref)

    # ------------- SE: GAP -> FC -> ReLU -> FC -> sigmoid -> scale ----------
    y3 = y.reshape(N, H, WC)
    hsum = jnp.sum(y3, axis=1)                                  # (N, WC)
    pooled = jnp.dot(hsum, fold,
                     preferred_element_type=jnp.float32) * (1.0 / (H * W))  # (N, C)
    h1 = jnp.maximum(
        jnp.dot(pooled, wse1_ref[...], preferred_element_type=jnp.float32)
        + bse1_ref[...], 0.0)                                   # (N, C//r)
    gate = jax.nn.sigmoid(
        jnp.dot(h1, wse2_ref[...], preferred_element_type=jnp.float32)
        + bse2_ref[...])                                        # (N, C)
    gate_p = jnp.dot(gate, expand,
                     preferred_element_type=jnp.float32)        # (N, WC)
    yg = y3 * gate_p.reshape(N, 1, WC)                          # (N, H, WC)

    # ------ H zero-padding for conv2: zero ONLY the two halo rows -----------
    yh_ref[:, 0:1, :] = jnp.zeros((N, 1, WC), jnp.float32)
    yh_ref[:, H + 1:H + 2, :] = jnp.zeros((N, 1, WC), jnp.float32)
    yh_ref[:, 1:H + 1, :] = yg

    # ---------------- conv2: 3 banded MXU matmuls (K = W*C) -----------------
    acc2 = jnp.dot(yh_ref[:, 0:H, :].reshape(NH, WC), w2m_ref[0],
                   preferred_element_type=jnp.float32)
    for dy in (1, 2):
        lhs = yh_ref[:, dy:dy + H, :].reshape(NH, WC)
        acc2 = acc2 + jnp.dot(lhs, w2m_ref[dy],
                              preferred_element_type=jnp.float32)

    # ---------------- bn2 + relu, lane-dense output store -------------------
    out_ref[...] = bn_relu(acc2, g2_ref, be2_ref).reshape(N, H, WC)


def _band_weight(k, W):
    """3x3 HWIO kernel -> stacked row-banded weights, shape (3, W*Cin, W*Cout).

    For vertical tap dy, weight[dy, wi*Cin + ci, wo*Cout + co] equals
    k[dy, wi - wo + 1, ci, co] when |wi - wo| <= 1 and 0 otherwise, so that
    (input row h+dy-1, channels packed along W) @ weight[dy], summed over dy,
    is the full 3x3 'SAME' convolution: W-boundary zero padding is implicit in
    the dropped band entries, H padding is handled by zero halo rows.
    """
    _, _, Cin, Cout = k.shape
    wi = jnp.arange(W)[:, None]
    wo = jnp.arange(W)[None, :]
    dx = wi - wo + 1
    valid = (dx >= 0) & (dx <= 2)
    dxc = jnp.clip(dx, 0, 2)
    taps = []
    for dy in range(3):
        b = k[dy][dxc]                                    # (W, W, Cin, Cout)
        b = jnp.where(valid[:, :, None, None], b, 0.0)
        b = jnp.transpose(b, (0, 2, 1, 3))                # (wi, ci, wo, co)
        taps.append(b.reshape(W * Cin, W * Cout))
    return jnp.stack(taps, axis=0)


def conv_with_se(x_nchw, params):
    (w1, b1, g1, be1, wse1, bse1, wse2, bse2, w2, b2, g2, be2) = params
    # Conv biases cancel exactly under training-mode BN mean subtraction,
    # so they are not passed to the kernel at all.
    del b1, b2
    N, Cin, H, W = x_nchw.shape
    Cout = w1.shape[-1]
    WC = W * Cout

    # Layout plumbing (wrapper/XLA side): channel-packed rows, H halo rows and
    # dy concat so the kernel's conv1 LHS is one lane-dense (N*H, 3*W*Cin) slab.
    x = jnp.transpose(x_nchw, (0, 2, 3, 1)).astype(jnp.float32)    # NHWC
    xr = x.reshape(N, H, W * Cin)                                  # lane = w*Cin+ci
    xrp = jnp.pad(xr, ((0, 0), (1, 1), (0, 0)))                    # H zero halo
    lhs1 = jnp.concatenate([xrp[:, dy:dy + H, :] for dy in range(3)], axis=-1)
    lhs1 = lhs1.reshape(N * H, 3 * W * Cin)

    w1m = _band_weight(w1.astype(jnp.float32), W).reshape(3 * W * Cin, WC)
    w2m = _band_weight(w2.astype(jnp.float32), W)                  # (3, WC, WC)

    # 0/1 selection matrices: fold (WC, C) sums the lane-packed W positions per
    # channel; expand (C, WC) broadcasts a per-channel value across W lanes.
    # Transposed once here so the kernel never does an XLU transpose.
    ch = jnp.arange(WC, dtype=jnp.int32) % Cout
    fold = (ch[:, None] == jnp.arange(Cout, dtype=jnp.int32)[None, :]
            ).astype(jnp.float32)                                   # (WC, C)
    expand = jnp.transpose(fold)                                    # (C, WC)
    # TODO(synk): on v6e/v7x, cast matmul operands (lhs1/w1m/w2m + in-kernel
    # conv2 LHS) to bfloat16 for 2-4x MXU throughput; requires loosening the
    # f32 reference tolerance used below.

    vmem = pl.BlockSpec(memory_space=pltpu.MemorySpace.VMEM)
    out_packed = pl.pallas_call(
        conv_with_se_kernel,
        out_shape=jax.ShapeDtypeStruct((N, H, WC), jnp.float32),
        in_specs=[vmem] * 13,
        out_specs=vmem,
        scratch_shapes=[pltpu.VMEM((N, H + 2, WC), jnp.float32)],
        compiler_params=pltpu.CompilerParams(vmem_limit_bytes=32 * 1024 * 1024),
    )(lhs1, w1m, g1, be1, wse1, bse1, wse2, bse2, w2m, g2, be2, fold, expand)
    # TODO(synk): at production shapes, add a spatial grid (parallel over N/H
    # tiles with two-pass BN partial sums) for v7x dual-core + VMEM tiling.

    out = out_packed.reshape(N, H, W, Cout)
    return jnp.transpose(out, (0, 3, 1, 2))                        # back to NCHW


# ------------------------- pure-JAX reference -------------------------------
def ref_forward(x_nchw, params):
    (w1, b1, g1, be1, wse1, bse1, wse2, bse2, w2, b2, g2, be2) = params
    x = jnp.transpose(x_nchw, (0, 2, 3, 1)).astype(jnp.float32)

    def conv(x, w, b):
        y = jax.lax.conv_general_dilated(
            x, w, window_strides=(1, 1), padding="SAME",
            dimension_numbers=("NHWC", "HWIO", "NHWC"))
        return y + b

    def bn_relu(x, g, be):
        mu = jnp.mean(x, axis=(0, 1, 2))
        var = jnp.mean((x - mu) ** 2, axis=(0, 1, 2))
        return jax.nn.relu((x - mu) * jax.lax.rsqrt(var + EPS) * g + be)

    y = bn_relu(conv(x, w1, b1), g1, be1)
    pooled = jnp.mean(y, axis=(1, 2))
    s = jax.nn.sigmoid(
        jnp.maximum(pooled @ wse1 + bse1, 0.0) @ wse2 + bse2)
    y = y * s[:, None, None, :]
    z = bn_relu(conv(y, w2, b2), g2, be2)
    return jnp.transpose(z, (0, 3, 1, 2))


if __name__ == "__main__":
    # Shapes implied by the module: NCHW input, 3x3 convs keep spatial size.
    N, Cin, H, W = 2, 4, 16, 16
    Cout, reduction = 32, 16
    Cr = Cout // reduction

    key = jax.random.PRNGKey(0)
    ks = jax.random.split(key, 9)
    x = jax.random.normal(ks[0], (N, Cin, H, W), jnp.float32)

    # Deterministic synthetic parameters (HWIO conv weights).
    w1   = 0.1 * jax.random.normal(ks[1], (3, 3, Cin, Cout), jnp.float32)
    b1   = 0.1 * jax.random.normal(ks[2], (1, Cout), jnp.float32)
    w2   = 0.1 * jax.random.normal(ks[3], (3, 3, Cout, Cout), jnp.float32)
    b2   = 0.1 * jax.random.normal(ks[4], (1, Cout), jnp.float32)
    wse1 = 0.1 * jax.random.normal(ks[5], (Cout, Cr), jnp.float32)
    bse1 = 0.1 * jax.random.normal(ks[6], (1, Cr), jnp.float32)
    wse2 = 0.1 * jax.random.normal(ks[7], (Cr, Cout), jnp.float32)
    bse2 = 0.1 * jax.random.normal(ks[8], (1, Cout), jnp.float32)
    # BatchNorm affine params: PyTorch default init (gamma=1, beta=0).
    g1  = jnp.ones((1, Cout), jnp.float32)
    be1 = jnp.zeros((1, Cout), jnp.float32)
    g2  = jnp.ones((1, Cout), jnp.float32)
    be2 = jnp.zeros((1, Cout), jnp.float32)

    params = (w1, b1, g1, be1, wse1, bse1, wse2, bse2, w2, b2, g2, be2)

    out = jax.block_until_ready(conv_with_se(x, params))
    ref = jax.block_until_ready(ref_forward(x, params))

    assert out.shape == (N, Cout, H, W)
    assert jnp.allclose(out, ref, atol=3e-4, rtol=3e-4), \
        f"max abs err {jnp.max(jnp.abs(out - ref))}"
    print("KERNEL_OK")
</pallas_src>

<mosaic_0001>
module attributes {stable_mosaic.version = 11 : i64} {
  func.func @conv_with_se_kernel(%arg0: memref<32x192xf32, #tpu.memory_space<vmem>>, %arg1: memref<192x512xf32, #tpu.memory_space<vmem>>, %arg2: memref<1x32xf32, #tpu.memory_space<vmem>>, %arg3: memref<1x32xf32, #tpu.memory_space<vmem>>, %arg4: memref<32x2xf32, #tpu.memory_space<vmem>>, %arg5: memref<1x2xf32, #tpu.memory_space<vmem>>, %arg6: memref<2x32xf32, #tpu.memory_space<vmem>>, %arg7: memref<1x32xf32, #tpu.memory_space<vmem>>, %arg8: memref<3x512x512xf32, #tpu.memory_space<vmem>>, %arg9: memref<1x32xf32, #tpu.memory_space<vmem>>, %arg10: memref<1x32xf32, #tpu.memory_space<vmem>>, %arg11: memref<512x32xf32, #tpu.memory_space<vmem>>, %arg12: memref<32x512xf32, #tpu.memory_space<vmem>>, %arg13: memref<2x16x512xf32, #tpu.memory_space<vmem>>, %arg14: memref<2x18x512xf32, #tpu.memory_space<vmem>>) attributes {dimension_semantics = [], scalar_prefetch = 0 : i64, scratch_operands = 1 : i64, tpu.core_type = #tpu.core_type<tc>} {
    %c0 = arith.constant 0 : index
    %c0_0 = arith.constant 0 : index
    %0 = vector.load %arg11[%c0, %c0_0] : memref<512x32xf32, #tpu.memory_space<vmem>>, vector<512x32xf32>
    %c0_1 = arith.constant 0 : index
    %c0_2 = arith.constant 0 : index
    %1 = vector.load %arg12[%c0_1, %c0_2] : memref<32x512xf32, #tpu.memory_space<vmem>>, vector<32x512xf32>
    %c0_3 = arith.constant 0 : index
    %c0_4 = arith.constant 0 : index
    %2 = vector.load %arg0[%c0_3, %c0_4] : memref<32x192xf32, #tpu.memory_space<vmem>>, vector<32x192xf32>
    %c0_5 = arith.constant 0 : index
    %c0_6 = arith.constant 0 : index
    %3 = vector.load %arg1[%c0_5, %c0_6] : memref<192x512xf32, #tpu.memory_space<vmem>>, vector<192x512xf32>
    %cst = arith.constant dense<0.000000e+00> : vector<32x512xf32>
    %4 = tpu.matmul %2, %3, %cst {dimension_numbers = #tpu.dot_dimension_numbers<[1], [0], [0], [1], [0, 0, 1, 1], [], []>} : vector<32x192xf32>, vector<192x512xf32>, vector<32x512xf32> -> vector<32x512xf32>
    %cst_7 = arith.constant dense<0.000000e+00> : vector<512xf32>
    %5 = vector.multi_reduction <add>, %4, %cst_7 [0] : vector<32x512xf32> to vector<512xf32>
    %6 = vector.shape_cast %5 : vector<512xf32> to vector<1x512xf32>
    %7 = arith.mulf %4, %4 : vector<32x512xf32>
    %cst_8 = arith.constant dense<0.000000e+00> : vector<512xf32>
    %8 = vector.multi_reduction <add>, %7, %cst_8 [0] : vector<32x512xf32> to vector<512xf32>
    %9 = vector.shape_cast %8 : vector<512xf32> to vector<1x512xf32>
    %10 = tpu.concatenate %6, %9 in 0 : vector<1x512xf32>, vector<1x512xf32> -> vector<2x512xf32>
    %cst_9 = arith.constant dense<0.000000e+00> : vector<2x32xf32>
    %11 = tpu.matmul %10, %0, %cst_9 {dimension_numbers = #tpu.dot_dimension_numbers<[1], [0], [0], [1], [0, 0, 1, 1], [], []>} : vector<2x512xf32>, vector<512x32xf32>, vector<2x32xf32> -> vector<2x32xf32>
    %cst_10 = arith.constant 0.001953125 : f32
    %12 = vector.broadcast %cst_10 : f32 to vector<2x32xf32>
    %13 = arith.mulf %11, %12 : vector<2x32xf32>
    %14 = vector.extract_strided_slice %13 {offsets = [0, 0], sizes = [1, 32], strides = [1, 1]} : vector<2x32xf32> to vector<1x32xf32>
    %15 = vector.extract_strided_slice %13 {offsets = [1, 0], sizes = [1, 32], strides = [1, 1]} : vector<2x32xf32> to vector<1x32xf32>
    %16 = arith.mulf %14, %14 : vector<1x32xf32>
    %17 = arith.subf %15, %16 : vector<1x32xf32>
    %cst_11 = arith.constant 0.000000e+00 : f32
    %18 = vector.broadcast %cst_11 : f32 to vector<1x32xf32>
    %19 = arith.maximumf %17, %18 : vector<1x32xf32>
    %c0_12 = arith.constant 0 : index
    %c0_13 = arith.constant 0 : index
    %20 = vector.load %arg2[%c0_12, %c0_13] : memref<1x32xf32, #tpu.memory_space<vmem>>, vector<1x32xf32>
    %cst_14 = arith.constant 9.99999974E-6 : f32
    %21 = vector.broadcast %cst_14 : f32 to vector<1x32xf32>
    %22 = arith.addf %19, %21 : vector<1x32xf32>
    %23 = math.rsqrt %22 : vector<1x32xf32>
    %24 = arith.mulf %20, %23 : vector<1x32xf32>
    %c0_15 = arith.constant 0 : index
    %c0_16 = arith.constant 0 : index
    %25 = vector.load %arg3[%c0_15, %c0_16] : memref<1x32xf32, #tpu.memory_space<vmem>>, vector<1x32xf32>
    %26 = arith.mulf %14, %24 : vector<1x32xf32>
    %27 = arith.subf %25, %26 : vector<1x32xf32>
    %28 = tpu.concatenate %24, %27 in 0 : vector<1x32xf32>, vector<1x32xf32> -> vector<2x32xf32>
    %cst_17 = arith.constant dense<0.000000e+00> : vector<2x512xf32>
    %29 = tpu.matmul %28, %1, %cst_17 {dimension_numbers = #tpu.dot_dimension_numbers<[1], [0], [0], [1], [0, 0, 1, 1], [], []>} : vector<2x32xf32>, vector<32x512xf32>, vector<2x512xf32> -> vector<2x512xf32>
    %30 = vector.extract_strided_slice %29 {offsets = [0, 0], sizes = [1, 512], strides = [1, 1]} : vector<2x512xf32> to vector<1x512xf32>
    %31 = vector.broadcast %30 : vector<1x512xf32> to vector<32x512xf32>
    %32 = arith.mulf %4, %31 : vector<32x512xf32>
    %33 = vector.extract_strided_slice %29 {offsets = [1, 0], sizes = [1, 512], strides = [1, 1]} : vector<2x512xf32> to vector<1x512xf32>
    %34 = vector.broadcast %33 : vector<1x512xf32> to vector<32x512xf32>
    %35 = arith.addf %32, %34 : vector<32x512xf32>
    %cst_18 = arith.constant 0.000000e+00 : f32
    %36 = vector.broadcast %cst_18 : f32 to vector<32x512xf32>
    %37 = arith.maximumf %35, %36 : vector<32x512xf32>
    %38 = vector.shape_cast %37 : vector<32x512xf32> to vector<2x16x512xf32>
    %cst_19 = arith.constant dense<0.000000e+00> : vector<2x512xf32>
    %39 = vector.multi_reduction <add>, %38, %cst_19 [1] : vector<2x16x512xf32> to vector<2x512xf32>
    %cst_20 = arith.constant dense<0.000000e+00> : vector<2x32xf32>
    %40 = tpu.matmul %39, %0, %cst_20 {dimension_numbers = #tpu.dot_dimension_numbers<[1], [0], [0], [1], [0, 0, 1, 1], [], []>} : vector<2x512xf32>, vector<512x32xf32>, vector<2x32xf32> -> vector<2x32xf32>
    %cst_21 = arith.constant 3.906250e-03 : f32
    %41 = vector.broadcast %cst_21 : f32 to vector<2x32xf32>
    %42 = arith.mulf %40, %41 : vector<2x32xf32>
    %c0_22 = arith.constant 0 : index
    %c0_23 = arith.constant 0 : index
    %43 = vector.load %arg4[%c0_22, %c0_23] : memref<32x2xf32, #tpu.memory_space<vmem>>, vector<32x2xf32>
    %cst_24 = arith.constant dense<0.000000e+00> : vector<2x2xf32>
    %44 = tpu.matmul %42, %43, %cst_24 {dimension_numbers = #tpu.dot_dimension_numbers<[1], [0], [0], [1], [0, 0, 1, 1], [], []>} : vector<2x32xf32>, vector<32x2xf32>, vector<2x2xf32> -> vector<2x2xf32>
    %c0_25 = arith.constant 0 : index
    %c0_26 = arith.constant 0 : index
    %45 = vector.load %arg5[%c0_25, %c0_26] : memref<1x2xf32, #tpu.memory_space<vmem>>, vector<1x2xf32>
    %46 = vector.broadcast %45 : vector<1x2xf32> to vector<2x2xf32>
    %47 = arith.addf %44, %46 : vector<2x2xf32>
    %cst_27 = arith.constant 0.000000e+00 : f32
    %48 = vector.broadcast %cst_27 : f32 to vector<2x2xf32>
    %49 = arith.maximumf %47, %48 : vector<2x2xf32>
    %c0_28 = arith.constant 0 : index
    %c0_29 = arith.constant 0 : index
    %50 = vector.load %arg6[%c0_28, %c0_29] : memref<2x32xf32, #tpu.memory_space<vmem>>, vector<2x32xf32>
    %cst_30 = arith.constant dense<0.000000e+00> : vector<2x32xf32>
    %51 = tpu.matmul %49, %50, %cst_30 {dimension_numbers = #tpu.dot_dimension_numbers<[1], [0], [0], [1], [0, 0, 1, 1], [], []>} : vector<2x2xf32>, vector<2x32xf32>, vector<2x32xf32> -> vector<2x32xf32>
    %c0_31 = arith.constant 0 : index
    %c0_32 = arith.constant 0 : index
    %52 = vector.load %arg7[%c0_31, %c0_32] : memref<1x32xf32, #tpu.memory_space<vmem>>, vector<1x32xf32>
    %53 = vector.broadcast %52 : vector<1x32xf32> to vector<2x32xf32>
    %54 = arith.addf %51, %53 : vector<2x32xf32>
    %55 = arith.negf %54 : vector<2x32xf32>
    %56 = math.exp %55 : vector<2x32xf32>
    %cst_33 = arith.constant 1.000000e+00 : f32
    %57 = vector.broadcast %cst_33 : f32 to vector<2x32xf32>
    %58 = arith.addf %57, %56 : vector<2x32xf32>
    %59 = arith.divf %57, %58 : vector<2x32xf32>
    %cst_34 = arith.constant dense<0.000000e+00> : vector<2x512xf32>
    %60 = tpu.matmul %59, %1, %cst_34 {dimension_numbers = #tpu.dot_dimension_numbers<[1], [0], [0], [1], [0, 0, 1, 1], [], []>} : vector<2x32xf32>, vector<32x512xf32>, vector<2x512xf32> -> vector<2x512xf32>
    %61 = vector.shape_cast %60 : vector<2x512xf32> to vector<2x1x512xf32>
    %62 = vector.broadcast %61 : vector<2x1x512xf32> to vector<2x16x512xf32>
    %63 = arith.mulf %38, %62 : vector<2x16x512xf32>
    %cst_35 = arith.constant 0.000000e+00 : f32
    %64 = vector.broadcast %cst_35 : f32 to vector<2x1x512xf32>
    %c0_36 = arith.constant 0 : index
    %c0_37 = arith.constant 0 : index
    %c0_38 = arith.constant 0 : index
    %65 = vector.load %arg14[%c0_36, %c0_37, %c0_38] : memref<2x18x512xf32, #tpu.memory_space<vmem>>, vector<2x1x512xf32>
    tpu.vector_store %arg14[%c0_36, %c0_37, %c0_38], %64 {strides = array<i32>} : memref<2x18x512xf32, #tpu.memory_space<vmem>>, vector<2x1x512xf32>,
    %cst_39 = arith.constant 0.000000e+00 : f32
    %66 = vector.broadcast %cst_39 : f32 to vector<2x1x512xf32>
    %c0_40 = arith.constant 0 : index
    %c17 = arith.constant 17 : index
    %c0_41 = arith.constant 0 : index
    %67 = vector.load %arg14[%c0_40, %c17, %c0_41] : memref<2x18x512xf32, #tpu.memory_space<vmem>>, vector<2x1x512xf32>
    tpu.vector_store %arg14[%c0_40, %c17, %c0_41], %66 {strides = array<i32>} : memref<2x18x512xf32, #tpu.memory_space<vmem>>, vector<2x1x512xf32>,
    %c0_42 = arith.constant 0 : index
    %c1 = arith.constant 1 : index
    %c0_43 = arith.constant 0 : index
    %68 = vector.load %arg14[%c0_42, %c1, %c0_43] : memref<2x18x512xf32, #tpu.memory_space<vmem>>, vector<2x16x512xf32>
    tpu.vector_store %arg14[%c0_42, %c1, %c0_43], %63 {strides = array<i32>} : memref<2x18x512xf32, #tpu.memory_space<vmem>>, vector<2x16x512xf32>,
    %c0_44 = arith.constant 0 : index
    %c0_45 = arith.constant 0 : index
    %c0_46 = arith.constant 0 : index
    %69 = vector.load %arg14[%c0_44, %c0_45, %c0_46] : memref<2x18x512xf32, #tpu.memory_space<vmem>>, vector<2x16x512xf32>
    %70 = vector.shape_cast %69 : vector<2x16x512xf32> to vector<32x512xf32>
    %c0_47 = arith.constant 0 : index
    %c0_48 = arith.constant 0 : index
    %c0_49 = arith.constant 0 : index
    %71 = vector.load %arg8[%c0_47, %c0_48, %c0_49] : memref<3x512x512xf32, #tpu.memory_space<vmem>>, vector<1x512x512xf32>
    %72 = vector.shape_cast %71 : vector<1x512x512xf32> to vector<512x512xf32>
    %cst_50 = arith.constant dense<0.000000e+00> : vector<32x512xf32>
    %73 = tpu.matmul %70, %72, %cst_50 {dimension_numbers = #tpu.dot_dimension_numbers<[1], [0], [0], [1], [0, 0, 1, 1], [], []>} : vector<32x512xf32>, vector<512x512xf32>, vector<32x512xf32> -> vector<32x512xf32>
    %c0_51 = arith.constant 0 : index
    %c1_52 = arith.constant 1 : index
    %c0_53 = arith.constant 0 : index
    %74 = vector.load %arg14[%c0_51, %c1_52, %c0_53] : memref<2x18x512xf32, #tpu.memory_space<vmem>>, vector<2x16x512xf32>
    %75 = vector.shape_cast %74 : vector<2x16x512xf32> to vector<32x512xf32>
    %c1_54 = arith.constant 1 : index
    %c0_55 = arith.constant 0 : index
    %c0_56 = arith.constant 0 : index
    %76 = vector.load %arg8[%c1_54, %c0_55, %c0_56] : memref<3x512x512xf32, #tpu.memory_space<vmem>>, vector<1x512x512xf32>
    %77 = vector.shape_cast %76 : vector<1x512x512xf32> to vector<512x512xf32>
    %cst_57 = arith.constant dense<0.000000e+00> : vector<32x512xf32>
    %78 = tpu.matmul %75, %77, %cst_57 {dimension_numbers = #tpu.dot_dimension_numbers<[1], [0], [0], [1], [0, 0, 1, 1], [], []>} : vector<32x512xf32>, vector<512x512xf32>, vector<32x512xf32> -> vector<32x512xf32>
    %79 = arith.addf %73, %78 : vector<32x512xf32>
    %c0_58 = arith.constant 0 : index
    %c2 = arith.constant 2 : index
    %c0_59 = arith.constant 0 : index
    %80 = vector.load %arg14[%c0_58, %c2, %c0_59] : memref<2x18x512xf32, #tpu.memory_space<vmem>>, vector<2x16x512xf32>
    %81 = vector.shape_cast %80 : vector<2x16x512xf32> to vector<32x512xf32>
    %c2_60 = arith.constant 2 : index
    %c0_61 = arith.constant 0 : index
    %c0_62 = arith.constant 0 : index
    %82 = vector.load %arg8[%c2_60, %c0_61, %c0_62] : memref<3x512x512xf32, #tpu.memory_space<vmem>>, vector<1x512x512xf32>
    %83 = vector.shape_cast %82 : vector<1x512x512xf32> to vector<512x512xf32>
    %cst_63 = arith.constant dense<0.000000e+00> : vector<32x512xf32>
    %84 = tpu.matmul %81, %83, %cst_63 {dimension_numbers = #tpu.dot_dimension_numbers<[1], [0], [0], [1], [0, 0, 1, 1], [], []>} : vector<32x512xf32>, vector<512x512xf32>, vector<32x512xf32> -> vector<32x512xf32>
    %85 = arith.addf %79, %84 : vector<32x512xf32>
    %cst_64 = arith.constant dense<0.000000e+00> : vector<512xf32>
    %86 = vector.multi_reduction <add>, %85, %cst_64 [0] : vector<32x512xf32> to vector<512xf32>
    %87 = vector.shape_cast %86 : vector<512xf32> to vector<1x512xf32>
    %88 = arith.mulf %85, %85 : vector<32x512xf32>
    %cst_65 = arith.constant dense<0.000000e+00> : vector<512xf32>
    %89 = vector.multi_reduction <add>, %88, %cst_65 [0] : vector<32x512xf32> to vector<512xf32>
    %90 = vector.shape_cast %89 : vector<512xf32> to vector<1x512xf32>
    %91 = tpu.concatenate %87, %90 in 0 : vector<1x512xf32>, vector<1x512xf32> -> vector<2x512xf32>
    %cst_66 = arith.constant dense<0.000000e+00> : vector<2x32xf32>
    %92 = tpu.matmul %91, %0, %cst_66 {dimension_numbers = #tpu.dot_dimension_numbers<[1], [0], [0], [1], [0, 0, 1, 1], [], []>} : vector<2x512xf32>, vector<512x32xf32>, vector<2x32xf32> -> vector<2x32xf32>
    %cst_67 = arith.constant 0.001953125 : f32
    %93 = vector.broadcast %cst_67 : f32 to vector<2x32xf32>
    %94 = arith.mulf %92, %93 : vector<2x32xf32>
    %95 = vector.extract_strided_slice %94 {offsets = [0, 0], sizes = [1, 32], strides = [1, 1]} : vector<2x32xf32> to vector<1x32xf32>
    %96 = vector.extract_strided_slice %94 {offsets = [1, 0], sizes = [1, 32], strides = [1, 1]} : vector<2x32xf32> to vector<1x32xf32>
    %97 = arith.mulf %95, %95 : vector<1x32xf32>
    %98 = arith.subf %96, %97 : vector<1x32xf32>
    %cst_68 = arith.constant 0.000000e+00 : f32
    %99 = vector.broadcast %cst_68 : f32 to vector<1x32xf32>
    %100 = arith.maximumf %98, %99 : vector<1x32xf32>
    %c0_69 = arith.constant 0 : index
    %c0_70 = arith.constant 0 : index
    %101 = vector.load %arg9[%c0_69, %c0_70] : memref<1x32xf32, #tpu.memory_space<vmem>>, vector<1x32xf32>
    %cst_71 = arith.constant 9.99999974E-6 : f32
    %102 = vector.broadcast %cst_71 : f32 to vector<1x32xf32>
    %103 = arith.addf %100, %102 : vector<1x32xf32>
    %104 = math.rsqrt %103 : vector<1x32xf32>
    %105 = arith.mulf %101, %104 : vector<1x32xf32>
    %c0_72 = arith.constant 0 : index
    %c0_73 = arith.constant 0 : index
    %106 = vector.load %arg10[%c0_72, %c0_73] : memref<1x32xf32, #tpu.memory_space<vmem>>, vector<1x32xf32>
    %107 = arith.mulf %95, %105 : vector<1x32xf32>
    %108 = arith.subf %106, %107 : vector<1x32xf32>
    %109 = tpu.concatenate %105, %108 in 0 : vector<1x32xf32>, vector<1x32xf32> -> vector<2x32xf32>
    %cst_74 = arith.constant dense<0.000000e+00> : vector<2x512xf32>
    %110 = tpu.matmul %109, %1, %cst_74 {dimension_numbers = #tpu.dot_dimension_numbers<[1], [0], [0], [1], [0, 0, 1, 1], [], []>} : vector<2x32xf32>, vector<32x512xf32>, vector<2x512xf32> -> vector<2x512xf32>
    %111 = vector.extract_strided_slice %110 {offsets = [0, 0], sizes = [1, 512], strides = [1, 1]} : vector<2x512xf32> to vector<1x512xf32>
    %112 = vector.broadcast %111 : vector<1x512xf32> to vector<32x512xf32>
    %113 = arith.mulf %85, %112 : vector<32x512xf32>
    %114 = vector.extract_strided_slice %110 {offsets = [1, 0], sizes = [1, 512], strides = [1, 1]} : vector<2x512xf32> to vector<1x512xf32>
    %115 = vector.broadcast %114 : vector<1x512xf32> to vector<32x512xf32>
    %116 = arith.addf %113, %115 : vector<32x512xf32>
    %cst_75 = arith.constant 0.000000e+00 : f32
    %117 = vector.broadcast %cst_75 : f32 to vector<32x512xf32>
    %118 = arith.maximumf %116, %117 : vector<32x512xf32>
    %119 = vector.shape_cast %118 : vector<32x512xf32> to vector<2x16x512xf32>
    %c0_76 = arith.constant 0 : index
    %c0_77 = arith.constant 0 : index
    %c0_78 = arith.constant 0 : index
    %120 = vector.load %arg13[%c0_76, %c0_77, %c0_78] : memref<2x16x512xf32, #tpu.memory_space<vmem>>, vector<2x16x512xf32>
    tpu.vector_store %arg13[%c0_76, %c0_77, %c0_78], %119 {strides = array<i32>} : memref<2x16x512xf32, #tpu.memory_space<vmem>>, vector<2x16x512xf32>,
    return
  }
}

</mosaic_0001>

<bundles_post_ra>
// kernel: tpu_custom_call.1
= control target key start
LH: loop header
LB: loop body
LE: loop exit
PB: predicated region body
PF: predicated region fallthrough
CT: control target
= control target key end

     0   :  { %18 = vsyncpa [#allocation4], 0  ;;  %s6651_s0 = inlined_call_operand.hbm [shape: f32[32,192], index: 0, kind: input, shape index: {}]   ;;  %s6652_s1 = inlined_call_operand.hbm [shape: f32[192,512], index: 1, kind: input, shape index: {}]   ;;  %s6653_s2 = inlined_call_operand.hbm [shape: f32[1,32], index: 2, kind: input, shape index: {}]   ;;  %s6654_s3 = inlined_call_operand.hbm [shape: f32[1,32], index: 3, kind: input, shape index: {}]   ;;  %s6655_s4 = inlined_call_operand.vmem [shape: f32[32,2], index: 4, kind: input, shape index: {}]   ;;  %s6656_s5 = inlined_call_operand.hbm [shape: f32[1,2], index: 5, kind: input, shape index: {}]   ;;  %s6657_s6 = inlined_call_operand.hbm [shape: f32[2,32], index: 6, kind: input, shape index: {}]   ;;  %s6658_s7 = inlined_call_operand.hbm [shape: f32[1,32], index: 7, kind: input, shape index: {}]   ;;  %s6659_s8 = inlined_call_operand.hbm [shape: f32[3,512,512], index: 8, kind: input, shape index: {}]   ;;  %s6660_s9 = inlined_call_operand.hbm [shape: f32[1,32], index: 9, kind: input, shape index: {}]   ;;  %s6661_s10 = inlined_call_operand.hbm [shape: f32[1,32], index: 10, kind: input, shape index: {}]   ;;  %s6662_s11 = inlined_call_operand.vmem [shape: f32[512,32], index: 11, kind: input, shape index: {}]   ;;  %s6663_s12 = inlined_call_operand.hbm [shape: f32[32,512], index: 12, kind: input, shape index: {}]   ;;  %s6664_s13 = inlined_call_operand.hbm [shape: f32[2,16,512], index: 13, kind: output, shape index: {}]  }
   0x1   :  { %19 = vsyncpa [#allocation7], 0 }
   0x2   :  { %20 = vsyncpa [#allocation10], 0 }
   0x3   :  { %21 = vsyncpa [#allocation13], 0 }
   0x4   :  { %22 = vsyncpa [#allocation16], 0 }
   0x5   :  { %23 = vsyncpa [#allocation19], 0 }
   0x6   :  { %24 = vsyncpa [#allocation5], 0  ;;  %s5000_s25 = smov [#allocation6]  }
   0x7   :  { %s42_s26 = sshll.u32 %s5000_s25, 4  ;;  %s43_s26 = int_to_ptr.vmem [resolvable:$true] %s42_s26 }
   0x8   :  { %s4754_s27 = scalar_lea.vmem %s43_s26, 12288  ;;  %p4759_p1 = scmp.lt.s32.totalorder %s43_s26, %s43_s26 }
   0x9   :  { %p4755_p0 = scmp.ne.s32.totalorder %s43_s26, %s4754_s27  ;;  %p4760_p2 = scmp.lt.s32.totalorder %s4754_s27, %s4754_s27 }
   0xb   :  { %p4761_p3 = por %p4760_p2, %p4759_p1 }
   0xd   :  { %p4762_p4 = pnand %p4761_p3, %p4755_p0 }
   0xf   :  { %4765 = shalt.err (!%p4762_p4)
}
  0x10   :  { %s5001_s28 = smov 512   ;;  %s5002_s29 = smov 32  }
  0x11   :  { %48 = dma.hbm_to_vmem [thread:$0]  %s6652_s1, 12288, %s43_s26, [#allocation7], %s5001_s28, %s5001_s28, %s5002_s29  }
  0x12   :  { %s5003_s15 = smov [#allocation9]   ;;  %s5004_s17 = smov [#allocation12]  }
  0x13   :  { %s65_s16 = sshll.u32 %s5003_s15, 4  ;;  %s87_s18 = sshll.u32 %s5004_s17, 4  ;;  %s66_s16 = int_to_ptr.vmem [resolvable:$true] %s65_s16  ;;  %s88_s18 = int_to_ptr.vmem [resolvable:$true] %s87_s18 }
  0x14   :  { %s4774_s19 = scalar_lea.vmem %s66_s16, 16  ;;  %s4778_s20 = scalar_lea.vmem %s66_s16, 32 }
  0x15   :  { %p4775_p5 = scmp.ne.s32.totalorder %s66_s16, %s4774_s19  ;;  %p4779_p6 = scmp.lt.s32.totalorder %s66_s16, %s66_s16 }
  0x16   :  { %p4780_p7 = scmp.lt.s32.totalorder %s4778_s20, %s4774_s19 }
  0x18   :  { %p4781_p8 = por %p4780_p7, %p4779_p6 }
  0x1a   :  { %p4782_p9 = pnand %p4781_p8, %p4775_p5 }
  0x1c   :  { %4785 = shalt.err (!%p4782_p9)
}
  0x1d   :  { %68 = dma.hbm_to_vmem [thread:$0]  %s6654_s3, 16, %s66_s16, [#allocation10]  }
  0x1e   :  { %s4794_s23 = scalar_lea.vmem %s88_s18, 32  ;;  %p4799_p11 = scmp.lt.s32.totalorder %s88_s18, %s88_s18 }
  0x1f   :  { %p4795_p10 = scmp.ne.s32.totalorder %s88_s18, %s4794_s23  ;;  %p4800_p12 = scmp.lt.s32.totalorder %s4794_s23, %s4794_s23 }
  0x21   :  { %p4801_p13 = por %p4800_p12, %p4799_p11 }
  0x23   :  { %p4802_p0 = pnand %p4801_p13, %p4795_p10 }
  0x25   :  { %4805 = shalt.err (!%p4802_p0)
}
  0x26   :  { %90 = dma.hbm_to_vmem [thread:$0]  %s6657_s6, 32, %s88_s18, [#allocation13]  }
  0x27   :  { %s5005_s25 = smov [#allocation15]   ;;  %s5006_s27 = smov [#allocation18]  }
  0x28   :  { %s106_s26 = sshll.u32 %s5005_s25, 4  ;;  %s129_s30 = sshll.u32 %s5006_s27, 4  ;;  %s107_s26 = int_to_ptr.vmem [resolvable:$true] %s106_s26  ;;  %s130_s30 = int_to_ptr.vmem [resolvable:$true] %s129_s30 }
  0x29   :  { %s4814_s14 = scalar_lea.vmem %s107_s26, 98304  ;;  %p4819_p2 = scmp.lt.s32.totalorder %s107_s26, %s107_s26 }
  0x2a   :  { %p4815_p1 = scmp.ne.s32.totalorder %s107_s26, %s4814_s14  ;;  %p4820_p3 = scmp.lt.s32.totalorder %s4814_s14, %s4814_s14 }
  0x2c   :  { %p4821_p4 = por %p4820_p3, %p4819_p2 }
  0x2e   :  { %p4822_p5 = pnand %p4821_p4, %p4815_p1 }
  0x30   :  { %4825 = shalt.err (!%p4822_p5)
}
  0x31   :  { %112 = dma.hbm_to_vmem [thread:$0]  %s6659_s8, 98304, %s107_s26, [#allocation16], %s5001_s28, %s5001_s28, %s5002_s29  }
  0x32   :  { %s4834_s6 = scalar_lea.vmem %s130_s30, 16  ;;  %s4838_s16 = scalar_lea.vmem %s130_s30, 32 }
  0x33   :  { %p4835_p6 = scmp.ne.s32.totalorder %s130_s30, %s4834_s6  ;;  %p4839_p7 = scmp.lt.s32.totalorder %s130_s30, %s130_s30 }
  0x34   :  { %p4840_p8 = scmp.lt.s32.totalorder %s4838_s16, %s4834_s6 }
  0x36   :  { %p4841_p9 = por %p4840_p8, %p4839_p7 }
  0x38   :  { %p4842_p10 = pnand %p4841_p9, %p4835_p6 }
  0x3a   :  { %4845 = shalt.err (!%p4842_p10)
}
  0x3b   :  { %132 = dma.hbm_to_vmem [thread:$0]  %s6661_s10, 16, %s130_s30, [#allocation19]  }
  0x3c   :  { %s5007_s19 = smov [#allocation3]  }
  0x3d   :  { %s30_s20 = sshll.u32 %s5007_s19, 4  ;;  %s31_s20 = int_to_ptr.vmem [resolvable:$true] %s30_s20 }
  0x3e   :  { %s4854_s21 = scalar_lea.vmem %s31_s20, 1024  ;;  %p4859_p12 = scmp.lt.s32.totalorder %s31_s20, %s31_s20 }
  0x3f   :  { %p4855_p11 = scmp.ne.s32.totalorder %s31_s20, %s4854_s21  ;;  %p4860_p13 = scmp.lt.s32.totalorder %s4854_s21, %s4854_s21 }
  0x41   :  { %p4861_p0 = por %p4860_p13, %p4859_p12 }
  0x43   :  { %p4862_p1 = pnand %p4861_p0, %p4855_p11 }
  0x45   :  { %4865 = shalt.err (!%p4862_p1)
}
  0x46   :  { %s5008_s8 = smov 256   ;;  %s5009_s22 = smov 16  }
  0x47   :  { %36 = dma.hbm_to_vmem [thread:$0]  %s6651_s0, 1024, %s31_s20, [#allocation4], %s5008_s8, %s5008_s8, %s5009_s22  }
  0x48   :  { %s5010_s24 = smov [#allocation8]   ;;  %s5011_s26 = smov [#allocation11]  }
  0x49   :  { %s55_s25 = sshll.u32 %s5010_s24, 4  ;;  %s77_s10 = sshll.u32 %s5011_s26, 4  ;;  %s56_s25 = int_to_ptr.vmem [resolvable:$true] %s55_s25  ;;  %s78_s10 = int_to_ptr.vmem [resolvable:$true] %s77_s10 }
  0x4a   :  { %s4874_s27 = scalar_lea.vmem %s56_s25, 16  ;;  %s4878_s30 = scalar_lea.vmem %s56_s25, 32 }
  0x4b   :  { %p4875_p2 = scmp.ne.s32.totalorder %s56_s25, %s4874_s27  ;;  %p4879_p3 = scmp.lt.s32.totalorder %s56_s25, %s56_s25 }
  0x4c   :  { %p4880_p4 = scmp.lt.s32.totalorder %s4878_s30, %s4874_s27 }
  0x4e   :  { %p4881_p5 = por %p4880_p4, %p4879_p3 }
  0x50   :  { %p4882_p6 = pnand %p4881_p5, %p4875_p2 }
  0x52   :  { %4885 = shalt.err (!%p4882_p6)
}
  0x53   :  { %58 = dma.hbm_to_vmem [thread:$0]  %s6653_s2, 16, %s56_s25, [#allocation7]  }
  0x54   :  { %s4894_s15 = scalar_lea.vmem %s78_s10, 16  ;;  %s4898_s0 = scalar_lea.vmem %s78_s10, 32 }
  0x55   :  { %p4895_p7 = scmp.ne.s32.totalorder %s78_s10, %s4894_s15  ;;  %p4899_p8 = scmp.lt.s32.totalorder %s78_s10, %s78_s10 }
  0x56   :  { %p4900_p9 = scmp.lt.s32.totalorder %s4898_s0, %s4894_s15 }
  0x58   :  { %p4901_p10 = por %p4900_p9, %p4899_p8 }
  0x5a   :  { %p4902_p11 = pnand %p4901_p10, %p4895_p7 }
  0x5c   :  { %4905 = shalt.err (!%p4902_p11)
}
  0x5d   :  { %80 = dma.hbm_to_vmem [thread:$0]  %s6656_s5, 16, %s78_s10, [#allocation10]  }
  0x5e   :  { %s5012_s17 = smov [#allocation14]   ;;  %s5013_s19 = smov [#allocation17]  }
  0x5f   :  { %s97_s18 = sshll.u32 %s5012_s17, 4  ;;  %s119_s20 = sshll.u32 %s5013_s19, 4  ;;  %s98_s18 = int_to_ptr.vmem [resolvable:$true] %s97_s18  ;;  %s120_s20 = int_to_ptr.vmem [resolvable:$true] %s119_s20 }
  0x60   :  { %s4914_s21 = scalar_lea.vmem %s98_s18, 16  ;;  %s4918_s2 = scalar_lea.vmem %s98_s18, 32 }
  0x61   :  { %p4915_p12 = scmp.ne.s32.totalorder %s98_s18, %s4914_s21  ;;  %p4919_p13 = scmp.lt.s32.totalorder %s98_s18, %s98_s18 }
  0x62   :  { %p4920_p0 = scmp.lt.s32.totalorder %s4918_s2, %s4914_s21 }
  0x64   :  { %p4921_p1 = por %p4920_p0, %p4919_p13 }
  0x66   :  { %p4922_p2 = pnand %p4921_p1, %p4915_p12 }
  0x68   :  { %4925 = shalt.err (!%p4922_p2)
}
  0x69   :  { %100 = dma.hbm_to_vmem [thread:$0]  %s6658_s7, 16, %s98_s18, [#allocation13]  }
  0x6a   :  { %s4934_s23 = scalar_lea.vmem %s120_s20, 16  ;;  %s4938_s5 = scalar_lea.vmem %s120_s20, 32 }
  0x6b   :  { %p4935_p3 = scmp.ne.s32.totalorder %s120_s20, %s4934_s23  ;;  %p4939_p4 = scmp.lt.s32.totalorder %s120_s20, %s120_s20 }
  0x6c   :  { %p4940_p5 = scmp.lt.s32.totalorder %s4938_s5, %s4934_s23 }
  0x6e   :  { %p4941_p6 = por %p4940_p5, %p4939_p4 }
  0x70   :  { %p4942_p7 = pnand %p4941_p6, %p4935_p3 }
  0x72   :  { %4945 = shalt.err (!%p4942_p7)
}
  0x73   :  { %122 = dma.hbm_to_vmem [thread:$0]  %s6660_s9, 16, %s120_s20, [#allocation16]  }
  0x74   :  { %s5014_s25 = smov [#allocation20]  }
  0x75   :  { %s140_s26 = sshll.u32 %s5014_s25, 4  ;;  %s141_s26 = int_to_ptr.vmem [resolvable:$true] %s140_s26 }
  0x76   :  { %s4954_s10 = scalar_lea.vmem %s141_s26, 2048  ;;  %p4959_p9 = scmp.lt.s32.totalorder %s141_s26, %s141_s26 }
  0x77   :  { %p4955_p8 = scmp.ne.s32.totalorder %s141_s26, %s4954_s10  ;;  %p4960_p10 = scmp.lt.s32.totalorder %s4954_s10, %s4954_s10 }
  0x79   :  { %p4961_p11 = por %p4960_p10, %p4959_p9 }
  0x7b   :  { %p4962_p12 = pnand %p4961_p11, %p4955_p8 }
  0x7d   :  { %4965 = shalt.err (!%p4962_p12)
}
  0x7e   :  { %146 = dma.hbm_to_vmem [thread:$0]  %s6663_s12, 2048, %s141_s26, [#allocation19], %s5001_s28, %s5001_s28, %s5002_s29  }
  0x7f   :  { %4986 = dma.done.wait [#allocation4], 1024  }
  0x80   :  { %4987 = vsyncadd [#allocation4], 4294966272 }
  0x81   :  { %4988 = dma.done.wait [#allocation7], 12304  }
  0x82   :  { %4989 = vsyncadd [#allocation7], 4294954992 }
  0x83   :  { %4990 = dma.done.wait [#allocation10], 32  }
  0x84   :  { %4991 = vsyncadd [#allocation10], 4294967264 }
  0x85   :  { %4992 = dma.done.wait [#allocation13], 48  }
  0x86   :  { %4993 = vsyncadd [#allocation13], 4294967248 }
  0x87   :  { %4994 = dma.done.wait [#allocation16], 98320  }
  0x88   :  { %4995 = vsyncadd [#allocation16], 4294868976 }
  0x89   :  { %4996 = dma.done.wait [#allocation19], 2064  }
  0x8a   :  { %4997 = vsyncadd [#allocation19], 4294965232  ;;  %v329_v0 = vld [vmem:[#allocation6 + $0x1e8] sm:$0xff]  ;;  %v331_v1 = vld [vmem:[#allocation6 + $0x1f8] sm:$0xff]  ;;  %vm364_vm0 = vcmask 523264   ;;  %vm643_vm1 = vcmask 1040384  }
  0x8b   :  { %v328_v2 = vld [vmem:[#allocation6 + $0x1e0] sm:$0xff]  ;;  %377 = vmatprep.subr.mxu0 %v329_v0  ;;  %466 = vmatprep.subr.mxu1 %v331_v1  ;;  %v330_v3 = vld [vmem:[#allocation6 + $0x1f0] sm:$0xff]  ;;  %v325_v4 = vld [vmem:[#allocation6 + $0x1c8] sm:$0xff]  ;;  %vm826_vm2 = vcmask 261120   ;;  %vm1116_vm3 = vcmask 1041409   ;;  %vm5017_vm4 = vmmov 0  }
  0x8c   :  { %v327_v5 = vld [vmem:[#allocation6 + $0x1d8] sm:$0xff]  ;;  %378 = vmatpush1.msra.mxu0 %v328_v2  ;;  %467 = vmatpush1.msra.mxu1 %v330_v3  ;;  %v324_v6 = vld [vmem:[#allocation6 + $0x1c0] sm:$0xff]  ;;  %v326_v7 = vld [vmem:[#allocation6 + $0x1d0] sm:$0xff]  ;;  %vm1363_vm5 = vcmask 1041408   ;;  %vm1359_vm6 = vcmask 15360   ;;  %vm2095_vm8 = vcmask 1046528  }
  0x8d   :  { %v321_v8 = vld [vmem:[#allocation6 + $0x1a8] sm:$0xff]  ;;  %379 = vmatprep.subr.mxu0 %v325_v4  ;;  %468 = vmatprep.subr.mxu1 %v327_v5  ;;  %v323_v9 = vld [vmem:[#allocation6 + $0x1b8] sm:$0xff]  ;;  %v320_v10 = vld [vmem:[#allocation6 + $0x1a0] sm:$0xff]  ;;  %vm3153_vm9 = vcmask 1045504  }
  0x8e   :  { %v322_v11 = vld [vmem:[#allocation6 + $0x1b0] sm:$0xff]  ;;  %380 = vmatpush1.msra.mxu0 %v324_v6  ;;  %469 = vmatpush1.msra.mxu1 %v326_v7  ;;  %v317_v12 = vld [vmem:[#allocation6 + $0x188] sm:$0xff]  ;;  %v319_v13 = vld [vmem:[#allocation6 + $0x198] sm:$0xff] }
  0x8f   :  { %381 = vmatprep.subr.mxu0 %v321_v8  ;;  %470 = vmatprep.subr.mxu1 %v323_v9  ;;  %v316_v14 = vld [vmem:[#allocation6 + $0x180] sm:$0xff]  ;;  %v318_v15 = vld [vmem:[#allocation6 + $0x190] sm:$0xff]  ;;  %v313_v16 = vld [vmem:[#allocation6 + $0x168] sm:$0xff] }
  0x90   :  { %382 = vmatpush1.msra.mxu0 %v320_v10  ;;  %471 = vmatpush1.msra.mxu1 %v322_v11  ;;  %v315_v17 = vld [vmem:[#allocation6 + $0x178] sm:$0xff]  ;;  %v312_v18 = vld [vmem:[#allocation6 + $0x160] sm:$0xff]  ;;  %v314_v19 = vld [vmem:[#allocation6 + $0x170] sm:$0xff] }
  0x91   :  { %383 = vmatprep.subr.mxu0 %v317_v12  ;;  %472 = vmatprep.subr.mxu1 %v319_v13  ;;  %v309_v20 = vld [vmem:[#allocation6 + $0x148] sm:$0xff]  ;;  %v311_v21 = vld [vmem:[#allocation6 + $0x158] sm:$0xff]  ;;  %v308_v22 = vld [vmem:[#allocation6 + $0x140] sm:$0xff] }
  0x92   :  { %384 = vmatpush1.msra.mxu0 %v316_v14  ;;  %473 = vmatpush1.msra.mxu1 %v318_v15  ;;  %v310_v23 = vld [vmem:[#allocation6 + $0x150] sm:$0xff]  ;;  %v305_v24 = vld [vmem:[#allocation6 + $0x128] sm:$0xff]  ;;  %v307_v25 = vld [vmem:[#allocation6 + $0x138] sm:$0xff] }
  0x93   :  { %385 = vmatprep.subr.mxu0 %v313_v16  ;;  %474 = vmatprep.subr.mxu1 %v315_v17  ;;  %v304_v26 = vld [vmem:[#allocation6 + $0x120] sm:$0xff]  ;;  %v306_v27 = vld [vmem:[#allocation6 + $0x130] sm:$0xff]  ;;  %v301_v28 = vld [vmem:[#allocation6 + $0x108] sm:$0xff] }
  0x94   :  { %386 = vmatpush1.msra.mxu0 %v312_v18  ;;  %475 = vmatpush1.msra.mxu1 %v314_v19  ;;  %v303_v29 = vld [vmem:[#allocation6 + $0x118] sm:$0xff]  ;;  %v300_v30 = vld [vmem:[#allocation6 + $0x100] sm:$0xff]  ;;  %v302_v31 = vld [vmem:[#allocation6 + $0x110] sm:$0xff] }
  0x95   :  { %387 = vmatprep.subr.mxu0 %v309_v20  ;;  %476 = vmatprep.subr.mxu1 %v311_v21  ;;  %v297_v32 = vld [vmem:[#allocation6 + $0xe8] sm:$0xff]  ;;  %v299_v33 = vld [vmem:[#allocation6 + $0xf8] sm:$0xff]  ;;  %v296_v34 = vld [vmem:[#allocation6 + $0xe0] sm:$0xff] }
  0x96   :  { %388 = vmatpush1.msra.mxu0 %v308_v22  ;;  %477 = vmatpush1.msra.mxu1 %v310_v23  ;;  %v298_v35 = vld [vmem:[#allocation6 + $0xf0] sm:$0xff]  ;;  %v293_v36 = vld [vmem:[#allocation6 + $0xc8] sm:$0xff]  ;;  %v295_v37 = vld [vmem:[#allocation6 + $0xd8] sm:$0xff] }
  0x97   :  { %389 = vmatprep.subr.mxu0 %v305_v24  ;;  %478 = vmatprep.subr.mxu1 %v307_v25  ;;  %v292_v38 = vld [vmem:[#allocation6 + $0xc0] sm:$0xff]  ;;  %v294_v39 = vld [vmem:[#allocation6 + $0xd0] sm:$0xff]  ;;  %v289_v40 = vld [vmem:[#allocation6 + $0xa8] sm:$0xff] }
  0x98   :  { %390 = vmatpush1.msra.mxu0 %v304_v26  ;;  %479 = vmatpush1.msra.mxu1 %v306_v27  ;;  %v291_v41 = vld [vmem:[#allocation6 + $0xb8] sm:$0xff]  ;;  %v288_v42 = vld [vmem:[#allocation6 + $0xa0] sm:$0xff]  ;;  %v290_v43 = vld [vmem:[#allocation6 + $0xb0] sm:$0xff] }
  0x99   :  { %391 = vmatprep.subr.mxu0 %v301_v28  ;;  %480 = vmatprep.subr.mxu1 %v303_v29  ;;  %v285_v44 = vld [vmem:[#allocation6 + $0x88] sm:$0xff]  ;;  %v287_v45 = vld [vmem:[#allocation6 + $0x98] sm:$0xff]  ;;  %v284_v46 = vld [vmem:[#allocation6 + $0x80] sm:$0xff] }
  0x9a   :  { %392 = vmatpush1.msra.mxu0 %v300_v30  ;;  %481 = vmatpush1.msra.mxu1 %v302_v31  ;;  %v286_v47 = vld [vmem:[#allocation6 + $0x90] sm:$0xff]  ;;  %v281_v48 = vld [vmem:[#allocation6 + $0x68] sm:$0xff]  ;;  %v283_v49 = vld [vmem:[#allocation6 + $0x78] sm:$0xff] }
  0x9b   :  { %393 = vmatprep.subr.mxu0 %v297_v32  ;;  %482 = vmatprep.subr.mxu1 %v299_v33  ;;  %v280_v50 = vld [vmem:[#allocation6 + $0x60] sm:$0xff]  ;;  %v282_v51 = vld [vmem:[#allocation6 + $0x70] sm:$0xff]  ;;  %v277_v52 = vld [vmem:[#allocation6 + $0x48] sm:$0xff] }
  0x9c   :  { %394 = vmatpush1.msra.mxu0 %v296_v34  ;;  %483 = vmatpush1.msra.mxu1 %v298_v35  ;;  %v279_v53 = vld [vmem:[#allocation6 + $0x58] sm:$0xff]  ;;  %v276_v54 = vld [vmem:[#allocation6 + $0x40] sm:$0xff]  ;;  %v278_v55 = vld [vmem:[#allocation6 + $0x50] sm:$0xff] }
  0x9d   :  { %395 = vmatprep.subr.mxu0 %v293_v36  ;;  %484 = vmatprep.subr.mxu1 %v295_v37  ;;  %v273_v56 = vld [vmem:[#allocation6 + $0x28] sm:$0xff]  ;;  %v275_v57 = vld [vmem:[#allocation6 + $0x38] sm:$0xff]  ;;  %v272_v58 = vld [vmem:[#allocation6 + $0x20] sm:$0xff] }
  0x9e   :  { %396 = vmatpush1.msra.mxu0 %v292_v38  ;;  %485 = vmatpush1.msra.mxu1 %v294_v39  ;;  %v274_v59 = vld [vmem:[#allocation6 + $0x30] sm:$0xff]  ;;  %v269_v60 = vld [vmem:[#allocation6 + $0x8] sm:$0xff]  ;;  %v271_v61 = vld [vmem:[#allocation6 + $0x18] sm:$0xff] }
  0x9f   :  { %397 = vmatprep.subr.mxu0 %v289_v40  ;;  %486 = vmatprep.subr.mxu1 %v291_v41  ;;  %v268_v62 = vld [vmem:[#allocation6] sm:$0xff]  ;;  %v270_v63 = vld [vmem:[#allocation6 + $0x10] sm:$0xff]  ;;  %v361_v0 = vld [vmem:[#allocation6 + $0x2e8] sm:$0xff] }
  0xa0   :  { %398 = vmatpush1.msra.mxu0 %v288_v42  ;;  %487 = vmatpush1.msra.mxu1 %v290_v43  ;;  %v363_v1 = vld [vmem:[#allocation6 + $0x2f8] sm:$0xff]  ;;  %v360_v2 = vld [vmem:[#allocation6 + $0x2e0] sm:$0xff]  ;;  %v362_v3 = vld [vmem:[#allocation6 + $0x2f0] sm:$0xff] }
  0xa1   :  { %399 = vmatprep.subr.mxu0 %v285_v44  ;;  %488 = vmatprep.subr.mxu1 %v287_v45  ;;  %v357_v4 = vld [vmem:[#allocation6 + $0x2c8] sm:$0xff]  ;;  %v359_v5 = vld [vmem:[#allocation6 + $0x2d8] sm:$0xff]  ;;  %v356_v6 = vld [vmem:[#allocation6 + $0x2c0] sm:$0xff] }
  0xa2   :  { %400 = vmatpush1.msra.mxu0 %v284_v46  ;;  %489 = vmatpush1.msra.mxu1 %v286_v47  ;;  %v358_v7 = vld [vmem:[#allocation6 + $0x2d0] sm:$0xff]  ;;  %v353_v8 = vld [vmem:[#allocation6 + $0x2a8] sm:$0xff]  ;;  %v355_v9 = vld [vmem:[#allocation6 + $0x2b8] sm:$0xff] }
  0xa3   :  { %401 = vmatprep.subr.mxu0 %v281_v48  ;;  %490 = vmatprep.subr.mxu1 %v283_v49  ;;  %v352_v10 = vld [vmem:[#allocation6 + $0x2a0] sm:$0xff]  ;;  %v354_v11 = vld [vmem:[#allocation6 + $0x2b0] sm:$0xff]  ;;  %v349_v12 = vld [vmem:[#allocation6 + $0x288] sm:$0xff] }
  0xa4   :  { %402 = vmatpush1.msra.mxu0 %v280_v50  ;;  %491 = vmatpush1.msra.mxu1 %v282_v51  ;;  %v351_v13 = vld [vmem:[#allocation6 + $0x298] sm:$0xff]  ;;  %v348_v14 = vld [vmem:[#allocation6 + $0x280] sm:$0xff]  ;;  %v350_v15 = vld [vmem:[#allocation6 + $0x290] sm:$0xff] }
  0xa5   :  { %403 = vmatprep.subr.mxu0 %v277_v52  ;;  %492 = vmatprep.subr.mxu1 %v279_v53  ;;  %v345_v16 = vld [vmem:[#allocation6 + $0x268] sm:$0xff]  ;;  %v347_v17 = vld [vmem:[#allocation6 + $0x278] sm:$0xff]  ;;  %v344_v18 = vld [vmem:[#allocation6 + $0x260] sm:$0xff] }
  0xa6   :  { %404 = vmatpush1.msra.mxu0 %v276_v54  ;;  %493 = vmatpush1.msra.mxu1 %v278_v55  ;;  %v346_v19 = vld [vmem:[#allocation6 + $0x270] sm:$0xff]  ;;  %v341_v20 = vld [vmem:[#allocation6 + $0x248] sm:$0xff]  ;;  %v343_v21 = vld [vmem:[#allocation6 + $0x258] sm:$0xff] }
  0xa7   :  { %405 = vmatprep.subr.mxu0 %v273_v56  ;;  %494 = vmatprep.subr.mxu1 %v275_v57  ;;  %v340_v22 = vld [vmem:[#allocation6 + $0x240] sm:$0xff]  ;;  %v342_v23 = vld [vmem:[#allocation6 + $0x250] sm:$0xff]  ;;  %v337_v24 = vld [vmem:[#allocation6 + $0x228] sm:$0xff] }
  0xa8   :  { %406 = vmatpush1.msra.mxu0 %v272_v58  ;;  %495 = vmatpush1.msra.mxu1 %v274_v59  ;;  %v339_v25 = vld [vmem:[#allocation6 + $0x238] sm:$0xff]  ;;  %v336_v26 = vld [vmem:[#allocation6 + $0x220] sm:$0xff]  ;;  %v338_v27 = vld [vmem:[#allocation6 + $0x230] sm:$0xff] }
  0xa9   :  { %407 = vmatprep.subr.mxu0 %v269_v60  ;;  %496 = vmatprep.subr.mxu1 %v271_v61  ;;  %v333_v28 = vld [vmem:[#allocation6 + $0x208] sm:$0xff]  ;;  %v335_v29 = vld [vmem:[#allocation6 + $0x218] sm:$0xff]  ;;  %v332_v30 = vld [vmem:[#allocation6 + $0x200] sm:$0xff] }
  0xaa   :  { %408 = vmatpush1.msra.mxu0 %v268_v62  ;;  %497 = vmatpush1.msra.mxu1 %v270_v63  ;;  %v261_v31 = vld [vmem:[#allocation3 + $0x8] sm:$0xff]  ;;  %v334_v32 = vld [vmem:[#allocation6 + $0x210] sm:$0xff]  ;;  %v260_v33 = vld [vmem:[#allocation3] sm:$0xff] }
  0xab   :  { %425 = vmatprep.subr.mxu0 %v361_v0  ;;  %514 = vmatprep.subr.mxu1 %v363_v1  ;;  %v263_v34 = vld [vmem:[#allocation3 + $0x18] sm:$0xff]  ;;  %v262_v35 = vld [vmem:[#allocation3 + $0x10] sm:$0xff]  ;;  %v265_v36 = vld [vmem:[#allocation3 + $0x28] sm:$0xff] }
  0xac   :  { %426 = vmatpush2.msra.mxu0 %v360_v2  ;;  %515 = vmatpush2.msra.mxu1 %v362_v3  ;;  %v264_v37 = vld [vmem:[#allocation3 + $0x20] sm:$0xff]  ;;  %v267_v38 = vld [vmem:[#allocation3 + $0x38] sm:$0xff]  ;;  %v266_v39 = vld [vmem:[#allocation3 + $0x30] sm:$0xff] }
  0xad   :  { %427 = vmatprep.subr.mxu0 %v357_v4  ;;  %516 = vmatprep.subr.mxu1 %v359_v5  ;;  %v5142_v40 = vld [vmem:[%s6662_s11 + $0xf8] sm:$0xff]  ;;  %v5166_v44 = vld [vmem:[%s6662_s11 + $0xf0] sm:$0xff]  ;;  %v5190_v48 = vld [vmem:[%s6662_s11 + $0xe8] sm:$0xff] }
  0xae   :  { %428 = vmatpush2.msra.mxu0 %v356_v6  ;;  %517 = vmatpush2.msra.mxu1 %v358_v7  ;;  %v5147_v41 = vld [vmem:[%s6662_s11 + $0x1f8] sm:$0xff]  ;;  %v5171_v45 = vld [vmem:[%s6662_s11 + $0x1f0] sm:$0xff]  ;;  %v5195_v49 = vld [vmem:[%s6662_s11 + $0x1e8] sm:$0xff] }
  0xaf   :  { %429 = vmatprep.subr.mxu0 %v353_v8  ;;  %518 = vmatprep.subr.mxu1 %v355_v9  ;;  %v5154_v42 = vld [vmem:[%s6662_s11 + $0x78] sm:$0xff]  ;;  %v5178_v46 = vld [vmem:[%s6662_s11 + $0x70] sm:$0xff]  ;;  %v5202_v50 = vld [vmem:[%s6662_s11 + $0x68] sm:$0xff] }
  0xb0   :  { %430 = vmatpush2.msra.mxu0 %v352_v10  ;;  %519 = vmatpush2.msra.mxu1 %v354_v11  ;;  %v5159_v43 = vld [vmem:[%s6662_s11 + $0x178] sm:$0xff]  ;;  %v5183_v47 = vld [vmem:[%s6662_s11 + $0x170] sm:$0xff]  ;;  %v5207_v51 = vld [vmem:[%s6662_s11 + $0x168] sm:$0xff] }
  0xb1   :  { %431 = vmatprep.subr.mxu0 %v349_v12  ;;  %520 = vmatprep.subr.mxu1 %v351_v13  ;;  %v5214_v52 = vld [vmem:[%s6662_s11 + $0xe0] sm:$0xff]  ;;  %v5238_v56 = vld [vmem:[%s6662_s11 + $0xd8] sm:$0xff]  ;;  %v5262_v60 = vld [vmem:[%s6662_s11 + $0xd0] sm:$0xff] }
  0xb2   :  { %432 = vmatpush2.msra.mxu0 %v348_v14  ;;  %521 = vmatpush2.msra.mxu1 %v350_v15  ;;  %v5219_v53 = vld [vmem:[%s6662_s11 + $0x1e0] sm:$0xff]  ;;  %v5243_v57 = vld [vmem:[%s6662_s11 + $0x1d8] sm:$0xff]  ;;  %v5267_v61 = vld [vmem:[%s6662_s11 + $0x1d0] sm:$0xff] }
  0xb3   :  { %433 = vmatprep.subr.mxu0 %v345_v16  ;;  %522 = vmatprep.subr.mxu1 %v347_v17  ;;  %v5226_v54 = vld [vmem:[%s6662_s11 + $0x60] sm:$0xff]  ;;  %v5250_v58 = vld [vmem:[%s6662_s11 + $0x58] sm:$0xff]  ;;  %v5274_v62 = vld [vmem:[%s6662_s11 + $0x50] sm:$0xff] }
  0xb4   :  { %434 = vmatpush2.msra.mxu0 %v344_v18  ;;  %523 = vmatpush2.msra.mxu1 %v346_v19  ;;  %v5231_v55 = vld [vmem:[%s6662_s11 + $0x160] sm:$0xff]  ;;  %v5255_v59 = vld [vmem:[%s6662_s11 + $0x158] sm:$0xff]  ;;  %v5279_v63 = vld [vmem:[%s6662_s11 + $0x150] sm:$0xff] }
  0xb5   :  { %435 = vmatprep.subr.mxu0 %v341_v20  ;;  %524 = vmatprep.subr.mxu1 %v343_v21  ;;  %v5286_v0 = vld [vmem:[%s6662_s11 + $0xc8] sm:$0xff]  ;;  %v5310_v4 = vld [vmem:[%s6662_s11 + $0xc0] sm:$0xff]  ;;  %v5334_v8 = vld [vmem:[%s6662_s11 + $0xb8] sm:$0xff] }
  0xb6   :  { %436 = vmatpush2.msra.mxu0 %v340_v22  ;;  %525 = vmatpush2.msra.mxu1 %v342_v23  ;;  %v5291_v1 = vld [vmem:[%s6662_s11 + $0x1c8] sm:$0xff]  ;;  %v5315_v5 = vld [vmem:[%s6662_s11 + $0x1c0] sm:$0xff]  ;;  %6744 = vst [vmem:[#allocation32_spill] sm:$0xff] %v5334_v8  ;;  %v5339_v9 = vld [vmem:[%s6662_s11 + $0x1b8] sm:$0xff] }
  0xb7   :  { %437 = vmatprep.subr.mxu0 %v337_v24  ;;  %526 = vmatprep.subr.mxu1 %v339_v25  ;;  %v5298_v2 = vld [vmem:[%s6662_s11 + $0x48] sm:$0xff]  ;;  %6741 = vst [vmem:[#allocation29_spill] sm:$0xff] %v5315_v5  ;;  %v5322_v6 = vld [vmem:[%s6662_s11 + $0x40] sm:$0xff]  ;;  %6745 = vst [vmem:[#allocation33_spill] sm:$0xff] %v5339_v9 }
  0xb8   :  { %438 = vmatpush2.msra.mxu0 %v336_v26  ;;  %527 = vmatpush2.msra.mxu1 %v338_v27  ;;  %v5303_v3 = vld [vmem:[%s6662_s11 + $0x148] sm:$0xff]  ;;  %6742 = vst [vmem:[#allocation30_spill] sm:$0xff] %v5322_v6  ;;  %v5327_v7 = vld [vmem:[%s6662_s11 + $0x140] sm:$0xff]  ;;  %v5346_v10 = vld [vmem:[%s6662_s11 + $0x38] sm:$0xff] }
  0xb9   :  { %439 = vmatprep.subr.mxu0 %v333_v28  ;;  %528 = vmatprep.subr.mxu1 %v335_v29  ;;  %6743 = vst [vmem:[#allocation31_spill] sm:$0xff] %v5327_v7  ;;  %6746 = vst [vmem:[#allocation34_spill] sm:$0xff] %v5346_v10  ;;  %v5351_v11 = vld [vmem:[%s6662_s11 + $0x138] sm:$0xff]  ;;  %v5358_v12 = vld [vmem:[%s6662_s11 + $0xb0] sm:$0xff] }
  0xba   :  { %440 = vmatpush2.msra.mxu0 %v332_v30  ;;  %4372 = vmatprep.mubr.msk.f32.mxu0 %vm364_vm0, %v261_v31  ;;  %6747 = vst [vmem:[#allocation35_spill] sm:$0xff] %v5351_v11  ;;  %6748 = vst [vmem:[#allocation36_spill] sm:$0xff] %v5358_v12  ;;  %v5363_v13 = vld [vmem:[%s6662_s11 + $0x1b0] sm:$0xff]  ;;  %v5382_v16 = vld [vmem:[%s6662_s11 + $0xa8] sm:$0xff] }
  0xbb   :  { %529 = vmatpush2.msra.mxu1 %v334_v32  ;;  %4376 = vmatprep.mubr.msk.f32.mxu1 %vm364_vm0, %v261_v31  ;;  %6749 = vst [vmem:[#allocation37_spill] sm:$0xff] %v5363_v13  ;;  %v5370_v14 = vld [vmem:[%s6662_s11 + $0x30] sm:$0xff]  ;;  %6752 = vst [vmem:[#allocation40_spill] sm:$0xff] %v5382_v16  ;;  %v5387_v17 = vld [vmem:[%s6662_s11 + $0x1a8] sm:$0xff] }
  0xbc   :  { %442 = vmatmul.mubr.f32.vlgmr.msra.gmra.mxu0 %v260_v33  ;;  %531 = vmatmul.mubr.f32.vlgmr.msra.gmra.mxu1 %v260_v33  ;;  %6750 = vst [vmem:[#allocation38_spill] sm:$0xff] %v5370_v14  ;;  %v5375_v15 = vld [vmem:[%s6662_s11 + $0x130] sm:$0xff]  ;;  %6753 = vst [vmem:[#allocation41_spill] sm:$0xff] %v5387_v17  ;;  %v5394_v18 = vld [vmem:[%s6662_s11 + $0x28] sm:$0xff] }
  0xbd   :  { %4373 = vmatprep.mubr.msk.f32.mxu0 %vm364_vm0, %v263_v34  ;;  %4377 = vmatprep.mubr.msk.f32.mxu1 %vm364_vm0, %v263_v34  ;;  %6751 = vst [vmem:[#allocation39_spill] sm:$0xff] %v5375_v15  ;;  %6754 = vst [vmem:[#allocation42_spill] sm:$0xff] %v5394_v18  ;;  %v5399_v19 = vld [vmem:[%s6662_s11 + $0x128] sm:$0xff]  ;;  %v5406_v20 = vld [vmem:[%s6662_s11 + $0xa0] sm:$0xff] }
  0xbe   :  { %4392 = vmatprep.subr.mxu0 %v5142_v40  ;;  %4427 = vmatprep.subr.mxu1 %v5147_v41  ;;  %6755 = vst [vmem:[#allocation43_spill] sm:$0xff] %v5399_v19  ;;  %6756 = vst [vmem:[#allocation44_spill] sm:$0xff] %v5406_v20  ;;  %v5411_v21 = vld [vmem:[%s6662_s11 + $0x1a0] sm:$0xff]  ;;  %v5430_v24 = vld [vmem:[%s6662_s11 + $0x98] sm:$0xff] }
  0xbf   :  { %4393 = vmatpush3.msra.mxu0 %v5154_v42  ;;  %4428 = vmatpush3.msra.mxu1 %v5159_v43  ;;  %6757 = vst [vmem:[#allocation45_spill] sm:$0xff] %v5411_v21  ;;  %v5418_v22 = vld [vmem:[%s6662_s11 + $0x20] sm:$0xff]  ;;  %6760 = vst [vmem:[#allocation48_spill] sm:$0xff] %v5430_v24  ;;  %v5435_v25 = vld [vmem:[%s6662_s11 + $0x198] sm:$0xff] }
  0xc0   :  { %448 = vmatmul.mubr.f32.gmra.mxu0 %v262_v35  ;;  %537 = vmatmul.mubr.f32.gmra.mxu1 %v262_v35  ;;  %6758 = vst [vmem:[#allocation46_spill] sm:$0xff] %v5418_v22  ;;  %v5423_v23 = vld [vmem:[%s6662_s11 + $0x120] sm:$0xff]  ;;  %6761 = vst [vmem:[#allocation49_spill] sm:$0xff] %v5435_v25  ;;  %v5442_v26 = vld [vmem:[%s6662_s11 + $0x18] sm:$0xff] }
  0xc1   :  { %4374 = vmatprep.mubr.msk.f32.mxu0 %vm364_vm0, %v265_v36  ;;  %4378 = vmatprep.mubr.msk.f32.mxu1 %vm364_vm0, %v265_v36  ;;  %6759 = vst [vmem:[#allocation47_spill] sm:$0xff] %v5423_v23  ;;  %6762 = vst [vmem:[#allocation50_spill] sm:$0xff] %v5442_v26  ;;  %v5447_v27 = vld [vmem:[%s6662_s11 + $0x118] sm:$0xff]  ;;  %v5452_v28 = vld [vmem:[%s6662_s11 + $0x90] sm:$0xff] }
  0xc2   :  { %4394 = vmatprep.subr.mxu0 %v5166_v44  ;;  %4429 = vmatprep.subr.mxu1 %v5171_v45  ;;  %6763 = vst [vmem:[#allocation51_spill] sm:$0xff] %v5447_v27  ;;  %6764 = vst [vmem:[#allocation52_spill] sm:$0xff] %v5452_v28  ;;  %v5459_v29 = vld [vmem:[%s6662_s11 + $0x190] sm:$0xff]  ;;  %v5476_v32 = vld [vmem:[%s6662_s11 + $0x88] sm:$0xff] }
  0xc3   :  { %4395 = vmatpush3.msra.mxu0 %v5178_v46  ;;  %4430 = vmatpush3.msra.mxu1 %v5183_v47  ;;  %6765 = vst [vmem:[#allocation53_spill] sm:$0xff] %v5459_v29  ;;  %v5464_v30 = vld [vmem:[%s6662_s11 + $0x10] sm:$0xff]  ;;  %6768 = vst [vmem:[#allocation56_spill] sm:$0xff] %v5476_v32  ;;  %v5481_v33 = vld [vmem:[%s6662_s11 + $0x188] sm:$0xff] }
  0xc4   :  { %454 = vmatmul.mubr.f32.gmra.mxu0 %v264_v37  ;;  %543 = vmatmul.mubr.f32.gmra.mxu1 %v264_v37  ;;  %6766 = vst [vmem:[#allocation54_spill] sm:$0xff] %v5464_v30  ;;  %v5469_v31 = vld [vmem:[%s6662_s11 + $0x110] sm:$0xff]  ;;  %6769 = vst [vmem:[#allocation57_spill] sm:$0xff] %v5481_v33  ;;  %v5486_v34 = vld [vmem:[%s6662_s11 + $0x8] sm:$0xff] }
  0xc5   :  { %4375 = vmatprep.mubr.msk.f32.mxu0 %vm364_vm0, %v267_v38  ;;  %4379 = vmatprep.mubr.msk.f32.mxu1 %vm364_vm0, %v267_v38  ;;  %6767 = vst [vmem:[#allocation55_spill] sm:$0xff] %v5469_v31  ;;  %6770 = vst [vmem:[#allocation58_spill] sm:$0xff] %v5486_v34  ;;  %v5493_v35 = vld [vmem:[%s6662_s11 + $0x108] sm:$0xff]  ;;  %v5498_v36 = vld [vmem:[%s6662_s11 + $0x80] sm:$0xff] }
  0xc6   :  { %4396 = vmatprep.subr.mxu0 %v5190_v48  ;;  %4431 = vmatprep.subr.mxu1 %v5195_v49  ;;  %6771 = vst [vmem:[#allocation59_spill] sm:$0xff] %v5493_v35  ;;  %6772 = vst [vmem:[#allocation60_spill] sm:$0xff] %v5498_v36  ;;  %v5503_v37 = vld [vmem:[%s6662_s11 + $0x180] sm:$0xff] }
  0xc7   :  { %4397 = vmatpush3.msra.mxu0 %v5202_v50  ;;  %4432 = vmatpush3.msra.mxu1 %v5207_v51  ;;  %6773 = vst [vmem:[#allocation61_spill] sm:$0xff] %v5503_v37  ;;  %v5510_v38 = vld [vmem:[%s6662_s11] sm:$0xff] }
  0xc8   :  { %460 = vmatmul.mubr.f32.gmra.mxu0 %v266_v39  ;;  %549 = vmatmul.mubr.f32.gmra.mxu1 %v266_v39  ;;  %6774 = vst [vmem:[#allocation62_spill] sm:$0xff] %v5510_v38  ;;  %v5519_v39 = vld [vmem:[%s6662_s11 + $0x100] sm:$0xff] }
  0xc9   :  { %4398 = vmatprep.subr.mxu0 %v5214_v52  ;;  %4433 = vmatprep.subr.mxu1 %v5219_v53  ;;  %6775 = vst [vmem:[#allocation63_spill] sm:$0xff] %v5519_v39 }
  0xca   :  { %4399 = vmatpush3.msra.mxu0 %v5226_v54  ;;  %4434 = vmatpush3.msra.mxu1 %v5231_v55 }
  0xcb   :  { %4400 = vmatprep.subr.mxu0 %v5238_v56  ;;  %4435 = vmatprep.subr.mxu1 %v5243_v57 }
  0xcc   :  { %4401 = vmatpush3.msra.mxu0 %v5250_v58  ;;  %4436 = vmatpush3.msra.mxu1 %v5255_v59 }
  0xcd   :  { %4402 = vmatprep.subr.mxu0 %v5262_v60  ;;  %4437 = vmatprep.subr.mxu1 %v5267_v61 }
  0xce   :  { %4403 = vmatpush3.msra.mxu0 %v5274_v62  ;;  %4438 = vmatpush3.msra.mxu1 %v5279_v63 }
  0xcf   :  { %4404 = vmatprep.subr.mxu0 %v5286_v0  ;;  %4439 = vmatprep.subr.mxu1 %v5291_v1 }
  0xd0   :  { %4405 = vmatpush3.msra.mxu0 %v5298_v2  ;;  %4440 = vmatpush3.msra.mxu1 %v5303_v3 }
  0xd1   :  { %4406 = vmatprep.subr.mxu0 %v5310_v4  ;;  %4441 = vmatprep.subr.mxu1 %v5315_v5 }
  0xd2   :  { %4407 = vmatpush3.msra.mxu0 %v5322_v6  ;;  %4442 = vmatpush3.msra.mxu1 %v5327_v7 }
  0xd3   :  { %4408 = vmatprep.subr.mxu0 %v5334_v8  ;;  %4443 = vmatprep.subr.mxu1 %v5339_v9 }
  0xd4   :  { %4409 = vmatpush3.msra.mxu0 %v5346_v10  ;;  %4444 = vmatpush3.msra.mxu1 %v5351_v11 }
  0xd5   :  { %4410 = vmatprep.subr.mxu0 %v5358_v12  ;;  %4445 = vmatprep.subr.mxu1 %v5363_v13 }
  0xd6   :  { %4411 = vmatpush3.msra.mxu0 %v5370_v14  ;;  %4446 = vmatpush3.msra.mxu1 %v5375_v15 }
  0xd7   :  { %4412 = vmatprep.subr.mxu0 %v5382_v16  ;;  %4447 = vmatprep.subr.mxu1 %v5387_v17 }
  0xd8   :  { %4413 = vmatpush3.msra.mxu0 %v5394_v18  ;;  %4448 = vmatpush3.msra.mxu1 %v5399_v19 }
  0xd9   :  { %4414 = vmatprep.subr.mxu0 %v5406_v20  ;;  %4449 = vmatprep.subr.mxu1 %v5411_v21 }
  0xda   :  { %4415 = vmatpush3.msra.mxu0 %v5418_v22  ;;  %4450 = vmatpush3.msra.mxu1 %v5423_v23 }
  0xdb   :  { %4416 = vmatprep.subr.mxu0 %v5430_v24  ;;  %4451 = vmatprep.subr.mxu1 %v5435_v25 }
  0xdc   :  { %4417 = vmatpush3.msra.mxu0 %v5442_v26  ;;  %4452 = vmatpush3.msra.mxu1 %v5447_v27 }
  0xdd   :  { %4418 = vmatprep.subr.mxu0 %v5452_v28  ;;  %4453 = vmatprep.subr.mxu1 %v5459_v29 }
  0xde   :  { %4419 = vmatpush3.msra.mxu0 %v5464_v30  ;;  %4454 = vmatpush3.msra.mxu1 %v5469_v31 }
  0xdf   :  { %4420 = vmatprep.subr.mxu0 %v5476_v32  ;;  %4455 = vmatprep.subr.mxu1 %v5481_v33 }
  0xe0   :  { %4421 = vmatpush3.msra.mxu0 %v5486_v34  ;;  %4456 = vmatpush3.msra.mxu1 %v5493_v35 }
  0xe1   :  { %4422 = vmatprep.subr.mxu0 %v5498_v36  ;;  %4457 = vmatprep.subr.mxu1 %v5503_v37 }
  0xe2   :  { %4423 = vmatpush3.msra.mxu0 %v5510_v38  ;;  %4458 = vmatpush3.msra.mxu1 %v5519_v39 }
 0x17c   :  { %v5523_v33 = vpop.f32.mrf.mxu0  ;;  %v5525_v32 = vpop.f32.mrf.mxu1 }
 0x17d   :  { %6776 = vst [vmem:[#allocation64_spill] sm:$0xff] %v5523_v33  ;;  %6777 = vst [vmem:[#allocation65_spill] sm:$0xff] %v5525_v32  ;;  %v591_v29 = vmul.f32 %v5523_v33, %v5523_v33  ;;  %v593_v27 = vmul.f32 %v5525_v32, %v5525_v32 }
 0x17e   :  { %v5527_v34 = vpop.f32.mrf.mxu0  ;;  %v5529_v35 = vpop.f32.mrf.mxu1 }
 0x17f   :  { %6778 = vst [vmem:[#allocation66_spill] sm:$0xff] %v5527_v34  ;;  %6779 = vst [vmem:[#allocation67_spill] sm:$0xff] %v5529_v35  ;;  %v592_v26 = vmul.f32 %v5527_v34, %v5527_v34  ;;  %v594_v25 = vmul.f32 %v5529_v35, %v5529_v35 }
 0x180   :  { %v5531_v36 = vpop.f32.mrf.mxu0  ;;  %v5533_v37 = vpop.f32.mrf.mxu1 }
 0x181   :  { %6780 = vst [vmem:[#allocation68_spill] sm:$0xff] %v5531_v36  ;;  %6781 = vst [vmem:[#allocation69_spill] sm:$0xff] %v5533_v37  ;;  %v595_v31 = vmul.f32 %v5531_v36, %v5531_v36  ;;  %v597_v38 = vmul.f32 %v5533_v37, %v5533_v37  ;;  %v555_v21 = vadd.f32 %v5531_v36, %v5523_v33 }
 0x182   :  { %v5539_v30 = vpop.f32.mrf.mxu0  ;;  %v5541_v39 = vpop.f32.mrf.mxu1  ;;  %v573_v19 = vadd.f32 %v5533_v37, %v5525_v32 }
 0x183   :  { %6782 = vst [vmem:[#allocation70_spill] sm:$0xff] %v5539_v30  ;;  %6783 = vst [vmem:[#allocation71_spill] sm:$0xff] %v5541_v39  ;;  %v596_v28 = vmul.f32 %v5539_v30, %v5539_v30  ;;  %v598_v24 = vmul.f32 %v5541_v39, %v5541_v39  ;;  %v607_v20 = vadd.f32 %v595_v31, %v591_v29 }
 0x184   :  { %v5555_v23 = vpop.f32.mrf.mxu0  ;;  %v5557_v22 = vpop.f32.mrf.mxu1  ;;  %v625_v17 = vadd.f32 %v597_v38, %v593_v27  ;;  %v564_v16 = vadd.f32 %v5539_v30, %v5527_v34  ;;  %v582_v15 = vadd.f32 %v5541_v39, %v5529_v35 }
 0x185   :  { %6784 = vst [vmem:[#allocation72_spill] sm:$0xff] %v5555_v23  ;;  %6785 = vst [vmem:[#allocation73_spill] sm:$0xff] %v5557_v22  ;;  %v599_v18 = vmul.f32 %v5555_v23, %v5555_v23  ;;  %v601_v14 = vmul.f32 %v5557_v22, %v5557_v22  ;;  %v616_v29 = vadd.f32 %v596_v28, %v592_v26 }
 0x186   :  { %v5571_v13 = vpop.f32.mrf.mxu0  ;;  %v5573_v36 = vpop.f32.mrf.mxu1  ;;  %v556_v31 = vadd.f32 %v555_v21, %v5555_v23  ;;  %v574_v37 = vadd.f32 %v573_v19, %v5557_v22  ;;  %v634_v38 = vadd.f32 %v598_v24, %v594_v25 }
 0x187   :  { %6786 = vst [vmem:[#allocation74_spill] sm:$0xff] %v5571_v13  ;;  %6787 = vst [vmem:[#allocation75_spill] sm:$0xff] %v5573_v36  ;;  %v600_v27 = vmul.f32 %v5571_v13, %v5571_v13  ;;  %v608_v30 = vadd.f32 %v607_v20, %v599_v18  ;;  %v565_v34 = vadd.f32 %v564_v16, %v5571_v13 }
 0x188   :  { %v602_v39 = vmul.f32 %v5573_v36, %v5573_v36  ;;  %v5582_v35 = vpop.f32.mrf.mxu0  ;;  %v5584_v32 = vpop.f32.mrf.mxu1  ;;  %v583_v26 = vadd.f32 %v582_v15, %v5573_v36  ;;  %v626_v24 = vadd.f32 %v625_v17, %v601_v14 }
 0x189   :  { %6788 = vst [vmem:[#allocation76_spill] sm:$0xff] %v5582_v35  ;;  %6789 = vst [vmem:[#allocation77_spill] sm:$0xff] %v5584_v32  ;;  %v557_v21 = vadd.f32 %v556_v31, %v5582_v35  ;;  %v603_v19 = vmul.f32 %v5582_v35, %v5582_v35  ;;  %v575_v28 = vadd.f32 %v574_v37, %v5584_v32 }
 0x18a   :  { %v617_v18 = vadd.f32 %v616_v29, %v600_v27  ;;  %v635_v20 = vadd.f32 %v634_v38, %v602_v39  ;;  %v605_v16 = vmul.f32 %v5584_v32, %v5584_v32  ;;  %v5593_v25 = vpop.f32.mrf.mxu0  ;;  %v5595_v13 = vpop.f32.mrf.mxu1 }
 0x18b   :  { %6790 = vst [vmem:[#allocation78_spill] sm:$0xff] %v5593_v25  ;;  %6791 = vst [vmem:[#allocation79_spill] sm:$0xff] %v5595_v13  ;;  %v558_v22 = vrot.slane %v557_v21, 4  ;;  %v609_v23 = vadd.f32 %v608_v30, %v603_v19  ;;  %v576_v15 = vrot.slane %v575_v28, 4  ;;  %v566_v31 = vadd.f32 %v565_v34, %v5593_v25 }
 0x18c   :  { %v627_v36 = vadd.f32 %v626_v24, %v605_v16  ;;  %v604_v35 = vmul.f32 %v5593_v25, %v5593_v25  ;;  %v584_v14 = vadd.f32 %v583_v26, %v5595_v13  ;;  %v606_v17 = vmul.f32 %v5595_v13, %v5595_v13 }
 0x18d   :  { %v559_v37 = vadd.f32 %v558_v22, %v557_v21  ;;  %v610_v39 = vrot.slane %v609_v23, 4  ;;  %v577_v29 = vadd.f32 %v576_v15, %v575_v28  ;;  %v567_v27 = vrot.slane %v566_v31, 4 }
 0x18e   :  { %v628_v38 = vrot.slane %v627_v36, 4  ;;  %v618_v32 = vadd.f32 %v617_v18, %v604_v35  ;;  %v585_v33 = vrot.slane %v584_v14, 4  ;;  %v636_v30 = vadd.f32 %v635_v20, %v606_v17 }
 0x18f   :  { %v560_v19 = vrot.slane %v559_v37, 2  ;;  %v611_v12 = vadd.f32 %v610_v39, %v609_v23  ;;  %v578_v34 = vrot.slane %v577_v29, 2  ;;  %v568_v24 = vadd.f32 %v567_v27, %v566_v31 }
 0x190   :  { %v629_v16 = vadd.f32 %v628_v38, %v627_v36  ;;  %v619_v11 = vrot.slane %v618_v32, 4  ;;  %v586_v25 = vadd.f32 %v585_v33, %v584_v14  ;;  %v637_v10 = vrot.slane %v636_v30, 4 }
 0x191   :  { %v612_v26 = vrot.slane %v611_v12, 2  ;;  %v569_v9 = vrot.slane %v568_v24, 2  ;;  %v561_v28 = vadd.f32 %v560_v19, %v559_v37  ;;  %v579_v7 = vadd.f32 %v578_v34, %v577_v29 }
 0x192   :  { %v630_v8 = vrot.slane %v629_v16, 2  ;;  %v620_v13 = vadd.f32 %v619_v11, %v618_v32  ;;  %v587_v22 = vrot.slane %v586_v25, 2  ;;  %v638_v21 = vadd.f32 %v637_v10, %v636_v30 }
 0x193   :  { %v613_v15 = vadd.f32 %v612_v26, %v611_v12  ;;  %v570_v35 = vadd.f32 %v569_v9, %v568_v24  ;;  %v562_v38 = vrot.slane %v561_v28, 1  ;;  %v580_v6 = vrot.slane %v579_v7, 1  ;;  %v5607_v24 = vld [vmem:[#allocation20 + $0x68] sm:$0xff]  ;;  %v5621_v26 = vld [vmem:[#allocation20 + $0x58] sm:$0xff] }
 0x194   :  { %v631_v18 = vadd.f32 %v630_v8, %v629_v16  ;;  %v621_v20 = vrot.slane %v620_v13, 2  ;;  %v588_v17 = vadd.f32 %v587_v22, %v586_v25  ;;  %v639_v23 = vrot.slane %v638_v21, 2  ;;  %v5609_v16 = vld [vmem:[#allocation20 + $0x78] sm:$0xff]  ;;  %854 = vmatprep.subr.mxu0 %v5607_v24  ;;  %v5625_v22 = vld [vmem:[#allocation20 + $0x40] sm:$0xff] }
 0x195   :  { %v614_v39 = vrot.slane %v613_v15, 1  ;;  %v571_v31 = vrot.slane %v570_v35, 1  ;;  %v563_v29 = vadd.f32 %v562_v38, %v561_v28  ;;  %v581_v25 = vadd.f32 %v580_v6, %v579_v7  ;;  %925 = vmatprep.subr.mxu1 %v5609_v16  ;;  %v5615_v6 = vld [vmem:[#allocation20 + $0x70] sm:$0xff]  ;;  %v5619_v7 = vld [vmem:[#allocation20 + $0x48] sm:$0xff] }
 0x196   :  { %v632_v36 = vrot.slane %v631_v18, 1  ;;  %v622_v27 = vadd.f32 %v621_v20, %v620_v13  ;;  %v589_v33 = vrot.slane %v588_v17, 1  ;;  %v640_v14 = vadd.f32 %v639_v23, %v638_v21  ;;  %v5627_v21 = vld [vmem:[#allocation20 + $0x50] sm:$0xff]  ;;  %v5631_v28 = vld [vmem:[#allocation20 + $0x28] sm:$0xff]  ;;  %v5647_v23 = vld [vmem:[#allocation20] sm:$0xff] }
 0x197   :  { %v615_v10 = vadd.f32 %v614_v39, %v613_v15  ;;  %v572_v12 = vadd.f32 %v571_v31, %v570_v35  ;;  %v5633_v15 = vld [vmem:[#allocation20 + $0x38] sm:$0xff]  ;;  %v5635_v35 = vld [vmem:[#allocation20 + $0x20] sm:$0xff]  ;;  %v5641_v20 = vld [vmem:[#allocation20 + $0x8] sm:$0xff]  ;;  %v6729_v31 = vmov 0.0  }
 0x198   :  { %v623_v5 = vrot.slane %v622_v27, 1  ;;  %v641_v11 = vrot.slane %v640_v14, 1  ;;  %v633_v32 = vadd.f32 %v632_v36, %v631_v18  ;;  %v590_v9 = vadd.f32 %v589_v33, %v588_v17  ;;  %v5639_v18 = vld [vmem:[#allocation20 + $0x30] sm:$0xff]  ;;  %v5643_v17 = vld [vmem:[#allocation20 + $0x18] sm:$0xff] }
 0x199   :  { %v644_v13 = vsel %vm643_vm1, %v563_v29, %v615_v10  ;;  %v5649_v39 = vld [vmem:[#allocation20 + $0x10] sm:$0xff] }
 0x19a   :  { %v624_v37 = vadd.f32 %v623_v5, %v622_v27  ;;  %v642_v8 = vadd.f32 %v641_v11, %v640_v14  ;;  %v646_v34 = vsel %vm643_vm1, %v581_v25, %v633_v32  ;;  %v5613_v5 = vld [vmem:[#allocation20 + $0x60] sm:$0xff]  ;;  %v5016_v25 = vmov 1966171168  }
 0x19c   :  { %v645_v30 = vsel %vm643_vm1, %v572_v12, %v624_v37  ;;  %v647_v19 = vsel %vm643_vm1, %v590_v9, %v642_v8 }
 0x19d   :  { %712 = vmatprep.mubr.f32.mxu0 %v645_v30  ;;  %782 = vmatprep.mubr.f32.mxu1 %v647_v19  ;;  %v800_v30 = vunpack.c.l.s4 %v5016_v25  ;;  %v6728_v19 = vlaneseq  ;;  %v6821_v25 = vld [vmem:[#allocation58_spill] sm:$0xff] }
 0x19e   :  { %713 = vmatmul.mubr.f32.vlgmr.msra.gmra.mxu0 %v644_v13  ;;  %783 = vmatmul.mubr.f32.vlgmr.msra.gmra.mxu1 %v646_v34 }
 0x19f   :  { %855 = vmatpush1.msra.mxu0 %v5613_v5  ;;  %926 = vmatpush1.msra.mxu1 %v5615_v6 }
 0x1a0   :  { %856 = vmatprep.subr.mxu0 %v5619_v7  ;;  %927 = vmatprep.subr.mxu1 %v5621_v26 }
 0x1a1   :  { %857 = vmatpush1.msra.mxu0 %v5625_v22  ;;  %928 = vmatpush1.msra.mxu1 %v5627_v21 }
 0x1a2   :  { %858 = vmatprep.subr.mxu0 %v5631_v28  ;;  %929 = vmatprep.subr.mxu1 %v5633_v15 }
 0x1a3   :  { %859 = vmatpush1.msra.mxu0 %v5635_v35  ;;  %930 = vmatpush1.msra.mxu1 %v5639_v18 }
 0x1a4   :  { %860 = vmatprep.subr.mxu0 %v5641_v20  ;;  %931 = vmatprep.subr.mxu1 %v5643_v17 }
 0x1a5   :  { %861 = vmatpush1.msra.mxu0 %v5647_v23  ;;  %894 = vmatprep.mubr.f32.mxu0 %v6729_v31 }
 0x1a6   :  { %932 = vmatpush1.msra.mxu1 %v5649_v39  ;;  %965 = vmatprep.mubr.f32.mxu1 %v6729_v31 }
 0x1a7   :  { %4462 = vmatprep.subr.mxu0 %v5142_v40  ;;  %4497 = vmatprep.subr.mxu1 %v5147_v41  ;;  %v801_v40 = vunpack.c.0.s8 %v800_v30  ;;  %v5660_v41 = vshrl.u32 %v6728_v19, 7  ;;  %v6822_v30 = vld [vmem:[#allocation59_spill] sm:$0xff] }
 0x1a9   :  { %v5663_v13 = vsub.s32 %v801_v40, %v5660_v41  ;;  %v6823_v40 = vld [vmem:[#allocation60_spill] sm:$0xff] }
 0x25e   :  { %v4424_v36 = vpop.f32.mrf.mxu0  ;;  %v4459_v27 = vpop.f32.mrf.mxu1 }
 0x260   :  { %v4425_v33 = vpop.f32.mrf.mxu0  ;;  %v4460_v14 = vpop.f32.mrf.mxu1 }
 0x261   :  { %v4426_v38 = vadd.f32 %v4425_v33, %v4424_v36  ;;  %v4461_v11 = vadd.f32 %v4460_v14, %v4459_v27  ;;  %v795_v33 = vld [vmem:[#allocation8] sm:$0x1] }
 0x263   :  { %v785_v10 = vadd.f32 %v4461_v11, %v4426_v38  ;;  %v816_v11 = vld [vmem:[#allocation9] sm:$0x1] }
 0x265   :  { %v788_v32 = vmul.f32 0.001953125, %v785_v10 }
 0x267   :  { %v789_v12 = vmul.f32 %v788_v32, %v788_v32 }
 0x269   :  { %v791_v37 = vrot.slane %v789_v12, 7  ;;  %v5668_v12 = vsub.s32 0, %v5660_v41 }
 0x26b   :  { %v793_v9 = vsub.f32 %v788_v32, %v791_v37 }
 0x26d   :  { %v794_v8 = vmax.f32 %v793_v9, 0.0 }
 0x26f   :  { %v796_v29 = vadd.f32 1e-05, %v794_v8 }
 0x271   :  { %4644 = vrsqrt.f32 %v796_v29  ;;  %v6820_v29 = vld [vmem:[#allocation57_spill] sm:$0xff] }
 0x27e   :  { %v4645_v34 = vpop.eup %4644 }
 0x27f   :  { %v805_v36 = vrot.slane %v4645_v34, %v5663_v13  ;;  %v6824_v34 = vld [vmem:[#allocation61_spill] sm:$0xff] }
 0x281   :  { %v806_v27 = vcombine.high %v805_v36, %v805_v36  ;;  %v6825_v36 = vld [vmem:[#allocation62_spill] sm:$0xff] }
 0x283   :  { %v813_v14 = vrot.slane %v806_v27, %v5663_v13  ;;  %v6826_v27 = vld [vmem:[#allocation63_spill] sm:$0xff] }
 0x285   :  { %v815_v38 = vmul.f32 %v813_v14, %v795_v33  ;;  %v5739_v33 = vsub.s32 1, %v5660_v41 }
 0x287   :  { %v817_v10 = vmul.f32 %v815_v38, %v788_v32  ;;  %v6819_v32 = vld [vmem:[#allocation56_spill] sm:$0xff] }
 0x289   :  { %v818_v37 = vsub.f32 %v816_v11, %v817_v10 }
 0x28b   :  { %v823_v9 = vrot.slane %v818_v37, %v5668_v12 }
 0x28d   :  { %v825_v8 = vsel %vm643_vm1, %v815_v38, %v823_v9 }
 0x28e   :  { %4380 = vmatmul.mubr.msk.f32.vlgmr.msra.gmra.mxu0 %vm826_vm2, %v825_v8  ;;  %4381 = vmatmul.mubr.msk.f32.vlgmr.msra.gmra.mxu1 %vm826_vm2, %v825_v8  ;;  %v6827_v8 = vld [vmem:[#allocation64_spill] sm:$0xff] }
 0x28f   :  { %4463 = vmatpush3.msra.mxu0 %v5154_v42  ;;  %4498 = vmatpush3.msra.mxu1 %v5159_v43  ;;  %v6792_v42 = vld [vmem:[#allocation29_spill] sm:$0xff]  ;;  %v6793_v43 = vld [vmem:[#allocation30_spill] sm:$0xff] }
 0x290   :  { %4464 = vmatprep.subr.mxu0 %v5166_v44  ;;  %4499 = vmatprep.subr.mxu1 %v5171_v45  ;;  %v6794_v44 = vld [vmem:[#allocation31_spill] sm:$0xff]  ;;  %v6795_v45 = vld [vmem:[#allocation32_spill] sm:$0xff] }
 0x291   :  { %4465 = vmatpush3.msra.mxu0 %v5178_v46  ;;  %4500 = vmatpush3.msra.mxu1 %v5183_v47  ;;  %v6796_v46 = vld [vmem:[#allocation33_spill] sm:$0xff]  ;;  %v6797_v47 = vld [vmem:[#allocation34_spill] sm:$0xff] }
 0x292   :  { %4466 = vmatprep.subr.mxu0 %v5190_v48  ;;  %4501 = vmatprep.subr.mxu1 %v5195_v49  ;;  %v6798_v48 = vld [vmem:[#allocation35_spill] sm:$0xff]  ;;  %v6799_v49 = vld [vmem:[#allocation36_spill] sm:$0xff] }
 0x293   :  { %4467 = vmatpush3.msra.mxu0 %v5202_v50  ;;  %4502 = vmatpush3.msra.mxu1 %v5207_v51  ;;  %v6800_v50 = vld [vmem:[#allocation37_spill] sm:$0xff]  ;;  %v6801_v51 = vld [vmem:[#allocation38_spill] sm:$0xff] }
 0x294   :  { %4468 = vmatprep.subr.mxu0 %v5214_v52  ;;  %4503 = vmatprep.subr.mxu1 %v5219_v53  ;;  %v6802_v52 = vld [vmem:[#allocation39_spill] sm:$0xff]  ;;  %v6803_v53 = vld [vmem:[#allocation40_spill] sm:$0xff] }
 0x295   :  { %4469 = vmatpush3.msra.mxu0 %v5226_v54  ;;  %4504 = vmatpush3.msra.mxu1 %v5231_v55  ;;  %v6804_v54 = vld [vmem:[#allocation41_spill] sm:$0xff]  ;;  %v6805_v55 = vld [vmem:[#allocation42_spill] sm:$0xff] }
 0x296   :  { %4470 = vmatprep.subr.mxu0 %v5238_v56  ;;  %4505 = vmatprep.subr.mxu1 %v5243_v57  ;;  %v6806_v56 = vld [vmem:[#allocation43_spill] sm:$0xff]  ;;  %v6807_v57 = vld [vmem:[#allocation44_spill] sm:$0xff] }
 0x297   :  { %4471 = vmatpush3.msra.mxu0 %v5250_v58  ;;  %4506 = vmatpush3.msra.mxu1 %v5255_v59  ;;  %v6808_v58 = vld [vmem:[#allocation45_spill] sm:$0xff]  ;;  %v6809_v59 = vld [vmem:[#allocation46_spill] sm:$0xff] }
 0x298   :  { %4472 = vmatprep.subr.mxu0 %v5262_v60  ;;  %4507 = vmatprep.subr.mxu1 %v5267_v61  ;;  %v6810_v60 = vld [vmem:[#allocation47_spill] sm:$0xff]  ;;  %v6811_v61 = vld [vmem:[#allocation48_spill] sm:$0xff] }
 0x299   :  { %4473 = vmatpush3.msra.mxu0 %v5274_v62  ;;  %4508 = vmatpush3.msra.mxu1 %v5279_v63  ;;  %v6812_v62 = vld [vmem:[#allocation49_spill] sm:$0xff]  ;;  %v6813_v63 = vld [vmem:[#allocation50_spill] sm:$0xff] }
 0x29a   :  { %4474 = vmatprep.subr.mxu0 %v5286_v0  ;;  %4509 = vmatprep.subr.mxu1 %v5291_v1  ;;  %v6814_v0 = vld [vmem:[#allocation51_spill] sm:$0xff]  ;;  %v6815_v1 = vld [vmem:[#allocation52_spill] sm:$0xff] }
 0x29b   :  { %4475 = vmatpush3.msra.mxu0 %v5298_v2  ;;  %4510 = vmatpush3.msra.mxu1 %v5303_v3  ;;  %v6816_v2 = vld [vmem:[#allocation53_spill] sm:$0xff]  ;;  %v6817_v3 = vld [vmem:[#allocation54_spill] sm:$0xff] }
 0x29c   :  { %4476 = vmatprep.subr.mxu0 %v5310_v4  ;;  %4511 = vmatprep.subr.mxu1 %v6792_v42  ;;  %v6818_v4 = vld [vmem:[#allocation55_spill] sm:$0xff] }
 0x29d   :  { %4477 = vmatpush3.msra.mxu0 %v6793_v43  ;;  %4512 = vmatpush3.msra.mxu1 %v6794_v44  ;;  %v6828_v43 = vld [vmem:[#allocation68_spill] sm:$0xff] }
 0x29e   :  { %4478 = vmatprep.subr.mxu0 %v6795_v45  ;;  %4513 = vmatprep.subr.mxu1 %v6796_v46  ;;  %v6829_v45 = vld [vmem:[#allocation72_spill] sm:$0xff] }
 0x29f   :  { %4479 = vmatpush3.msra.mxu0 %v6797_v47  ;;  %4514 = vmatpush3.msra.mxu1 %v6798_v48  ;;  %v6830_v47 = vld [vmem:[#allocation76_spill] sm:$0xff] }
 0x2a0   :  { %4480 = vmatprep.subr.mxu0 %v6799_v49  ;;  %4515 = vmatprep.subr.mxu1 %v6800_v50  ;;  %v6831_v49 = vld [vmem:[#allocation65_spill] sm:$0xff] }
 0x2a1   :  { %4481 = vmatpush3.msra.mxu0 %v6801_v51  ;;  %4516 = vmatpush3.msra.mxu1 %v6802_v52  ;;  %v6832_v51 = vld [vmem:[#allocation69_spill] sm:$0xff] }
 0x2a2   :  { %4482 = vmatprep.subr.mxu0 %v6803_v53  ;;  %4517 = vmatprep.subr.mxu1 %v6804_v54  ;;  %v6833_v53 = vld [vmem:[#allocation73_spill] sm:$0xff] }
 0x2a3   :  { %4483 = vmatpush3.msra.mxu0 %v6805_v55  ;;  %4518 = vmatpush3.msra.mxu1 %v6806_v56  ;;  %v6834_v55 = vld [vmem:[#allocation77_spill] sm:$0xff] }
 0x2a4   :  { %4484 = vmatprep.subr.mxu0 %v6807_v57  ;;  %4519 = vmatprep.subr.mxu1 %v6808_v58 }
 0x2a5   :  { %4485 = vmatpush3.msra.mxu0 %v6809_v59  ;;  %4520 = vmatpush3.msra.mxu1 %v6810_v60 }
 0x2a6   :  { %4486 = vmatprep.subr.mxu0 %v6811_v61  ;;  %4521 = vmatprep.subr.mxu1 %v6812_v62 }
 0x2a7   :  { %4487 = vmatpush3.msra.mxu0 %v6813_v63  ;;  %4522 = vmatpush3.msra.mxu1 %v6814_v0 }
 0x2a8   :  { %4488 = vmatprep.subr.mxu0 %v6815_v1  ;;  %4523 = vmatprep.subr.mxu1 %v6816_v2 }
 0x2a9   :  { %4489 = vmatpush3.msra.mxu0 %v6817_v3  ;;  %4524 = vmatpush3.msra.mxu1 %v6818_v4 }
 0x2aa   :  { %4490 = vmatprep.subr.mxu0 %v6819_v32  ;;  %4525 = vmatprep.subr.mxu1 %v6820_v29 }
 0x2ab   :  { %4491 = vmatpush3.msra.mxu0 %v6821_v25  ;;  %4526 = vmatpush3.msra.mxu1 %v6822_v30 }
 0x2ac   :  { %4492 = vmatprep.subr.mxu0 %v6823_v40  ;;  %4527 = vmatprep.subr.mxu1 %v6824_v34 }
 0x2ad   :  { %4493 = vmatpush3.msra.mxu0 %v6825_v36  ;;  %4528 = vmatpush3.msra.mxu1 %v6826_v27 }
 0x2ae   :  { %4609 = vmatprep.subr.mxu0 %v6729_v31  ;;  %4620 = vmatprep.subr.mxu1 %v6729_v31 }
 0x34e   :  { %v896_v14 = vpop.f32.mrf.mxu0  ;;  %v967_v38 = vpop.f32.mrf.mxu1 }
 0x34f   :  { %v975_v11 = vrot.slane %v896_v14, %v5668_v12  ;;  %v983_v10 = vrot.slane %v967_v38, %v5668_v12  ;;  %v1007_v37 = vrot.slane %v896_v14, %v5739_v33  ;;  %v1015_v9 = vrot.slane %v967_v38, %v5739_v33 }
 0x350   :  { %v898_v1 = vpop.f32.mrf.mxu0  ;;  %v969_v29 = vpop.f32.mrf.mxu1 }
 0x351   :  { %v988_v42 = vmul.f32 %v975_v11, %v6827_v8  ;;  %v992_v44 = vmul.f32 %v975_v11, %v6828_v43  ;;  %v996_v46 = vmul.f32 %v975_v11, %v6829_v45  ;;  %v1000_v48 = vmul.f32 %v975_v11, %v6830_v47  ;;  %v6838_v8 = vld [vmem:[#allocation66_spill] sm:$0xff] }
 0x352   :  { %v990_v50 = vmul.f32 %v983_v10, %v6831_v49  ;;  %v994_v52 = vmul.f32 %v983_v10, %v6832_v51  ;;  %v998_v54 = vmul.f32 %v983_v10, %v6833_v53  ;;  %v1002_v56 = vmul.f32 %v983_v10, %v6834_v55  ;;  %v6839_v43 = vld [vmem:[#allocation70_spill] sm:$0xff]  ;;  %v6842_v49 = vld [vmem:[#allocation67_spill] sm:$0xff] }
 0x353   :  { %v5753_v57 = vadd.f32 %v1007_v37, %v988_v42  ;;  %v5755_v58 = vadd.f32 %v1007_v37, %v992_v44  ;;  %v5757_v59 = vadd.f32 %v1007_v37, %v996_v46  ;;  %v5759_v60 = vadd.f32 %v1007_v37, %v1000_v48  ;;  %v6840_v45 = vld [vmem:[#allocation74_spill] sm:$0xff]  ;;  %v6843_v51 = vld [vmem:[#allocation71_spill] sm:$0xff] }
 0x354   :  { %v5761_v61 = vadd.f32 %v1015_v9, %v990_v50  ;;  %v5763_v62 = vadd.f32 %v1015_v9, %v994_v52  ;;  %v5765_v63 = vadd.f32 %v1015_v9, %v998_v54  ;;  %v5767_v0 = vadd.f32 %v1015_v9, %v1002_v56  ;;  %v6841_v47 = vld [vmem:[#allocation78_spill] sm:$0xff]  ;;  %v6844_v53 = vld [vmem:[#allocation75_spill] sm:$0xff] }
 0x355   :  { %6835 = vst [vmem:[#allocation29_spill] sm:$0xff] %v5759_v60  ;;  %v6727_v2 = vmax.f32 %v5753_v57, 0.0  ;;  %v6722_v3 = vmax.f32 %v5755_v58, 0.0  ;;  %v6719_v4 = vmax.f32 %v5757_v59, 0.0  ;;  %v6717_v32 = vmax.f32 %v5759_v60, 0.0  ;;  %v6845_v55 = vld [vmem:[#allocation79_spill] sm:$0xff] }
 0x356   :  { %6836 = vst [vmem:[#allocation30_spill] sm:$0xff] %v5765_v63  ;;  %6837 = vst [vmem:[#allocation31_spill] sm:$0xff] %v5767_v0  ;;  %v6725_v25 = vmax.f32 %v5761_v61, 0.0  ;;  %v6720_v30 = vmax.f32 %v5763_v62, 0.0  ;;  %v6718_v40 = vmax.f32 %v5765_v63, 0.0  ;;  %v6716_v34 = vmax.f32 %v5767_v0, 0.0 }
 0x357   :  { %v1052_v36 = vadd.f32 %v6722_v3, %v6727_v2  ;;  %v1080_v27 = vadd.f32 %v6717_v32, %v6719_v4  ;;  %v979_v14 = vrot.slane %v898_v1, %v5668_v12  ;;  %v1011_v38 = vrot.slane %v898_v1, %v5739_v33 }
 0x358   :  { %v1066_v11 = vadd.f32 %v6720_v30, %v6725_v25  ;;  %v1094_v10 = vadd.f32 %v6716_v34, %v6718_v40  ;;  %v987_v37 = vrot.slane %v969_v29, %v5668_v12  ;;  %v1019_v9 = vrot.slane %v969_v29, %v5739_v33 }
 0x359   :  { %v989_v42 = vmul.f32 %v979_v14, %v6838_v8  ;;  %v993_v44 = vmul.f32 %v979_v14, %v6839_v43  ;;  %v997_v46 = vmul.f32 %v979_v14, %v6840_v45  ;;  %v1001_v48 = vmul.f32 %v979_v14, %v6841_v47 }
 0x35a   :  { %v991_v50 = vmul.f32 %v987_v37, %v6842_v49  ;;  %v995_v52 = vmul.f32 %v987_v37, %v6843_v51  ;;  %v999_v54 = vmul.f32 %v987_v37, %v6844_v53  ;;  %v1003_v56 = vmul.f32 %v987_v37, %v6845_v55 }
 0x35b   :  { %v5805_v1 = vadd.f32 %v1011_v38, %v989_v42  ;;  %v5807_v34 = vadd.f32 %v1011_v38, %v993_v44  ;;  %v5809_v29 = vadd.f32 %v1011_v38, %v997_v46  ;;  %v5811_v8 = vadd.f32 %v1011_v38, %v1001_v48 }
 0x35c   :  { %v5813_v43 = vadd.f32 %v1019_v9, %v991_v50  ;;  %v5815_v45 = vadd.f32 %v1019_v9, %v995_v52  ;;  %v5817_v14 = vadd.f32 %v1019_v9, %v999_v54  ;;  %v5819_v47 = vadd.f32 %v1019_v9, %v1003_v56 }
 0x35d   :  { %6846 = vst [vmem:[#allocation32_spill] sm:$0xff] %v5811_v8  ;;  %v6726_v49 = vmax.f32 %v5805_v1, 0.0  ;;  %v6721_v37 = vmax.f32 %v5807_v34, 0.0  ;;  %v6724_v42 = vmax.f32 %v5809_v29, 0.0  ;;  %v6723_v44 = vmax.f32 %v5811_v8, 0.0 }
 0x35e   :  { %6847 = vst [vmem:[#allocation33_spill] sm:$0xff] %v5817_v14  ;;  %6848 = vst [vmem:[#allocation34_spill] sm:$0xff] %v5819_v47  ;;  %v6732_v46 = vmax.f32 %v5813_v43, 0.0  ;;  %v6731_v38 = vmax.f32 %v5815_v45, 0.0  ;;  %v6737_v48 = vmax.f32 %v5817_v14, 0.0  ;;  %v6736_v50 = vmax.f32 %v5819_v47, 0.0 }
 0x35f   :  { %v1059_v9 = vadd.f32 %v6721_v37, %v6726_v49  ;;  %v1087_v51 = vadd.f32 %v6723_v44, %v6724_v42  ;;  %v1053_v52 = vrot.slane %v1052_v36, 4  ;;  %v1081_v53 = vrot.slane %v1080_v27, 4 }
 0x360   :  { %v1073_v54 = vadd.f32 %v6731_v38, %v6732_v46  ;;  %v1101_v55 = vadd.f32 %v6736_v50, %v6737_v48  ;;  %v1067_v56 = vrot.slane %v1066_v11, 4  ;;  %v1095_v32 = vrot.slane %v1094_v10, 4 }
 0x361   :  { %v1060_v40 = vrot.slane %v1059_v9, 4  ;;  %v1088_v4 = vrot.slane %v1087_v51, 4  ;;  %v1054_v30 = vadd.f32 %v1053_v52, %v1052_v36  ;;  %v1082_v37 = vadd.f32 %v1081_v53, %v1080_v27 }
 0x362   :  { %v1074_v3 = vrot.slane %v1073_v54, 4  ;;  %v1102_v44 = vrot.slane %v1101_v55, 4  ;;  %v1068_v42 = vadd.f32 %v1067_v56, %v1066_v11  ;;  %v1096_v25 = vadd.f32 %v1095_v32, %v1094_v10 }
 0x363   :  { %v1061_v49 = vadd.f32 %v1060_v40, %v1059_v9  ;;  %v1089_v2 = vadd.f32 %v1088_v4, %v1087_v51  ;;  %v1055_v19 = vrot.slane %v1054_v30, 2  ;;  %v1083_v31 = vrot.slane %v1082_v37, 2 }
 0x364   :  { %v1075_v38 = vadd.f32 %v1074_v3, %v1073_v54  ;;  %v1103_v46 = vadd.f32 %v1102_v44, %v1101_v55  ;;  %v1069_v0 = vrot.slane %v1068_v42, 2  ;;  %v1097_v8 = vrot.slane %v1096_v25, 2 }
 0x365   :  { %v1062_v47 = vrot.slane %v1061_v49, 2  ;;  %v1090_v50 = vrot.slane %v1089_v2, 2  ;;  %v1056_v48 = vadd.f32 %v1055_v19, %v1054_v30  ;;  %v1084_v60 = vadd.f32 %v1083_v31, %v1082_v37 }
 0x366   :  { %v1076_v14 = vrot.slane %v1075_v38, 2  ;;  %v1104_v63 = vrot.slane %v1103_v46, 2  ;;  %v1070_v36 = vadd.f32 %v1069_v0, %v1068_v42  ;;  %v1098_v27 = vadd.f32 %v1097_v8, %v1096_v25  ;;  %v1268_v42 = vld [vmem:[%s6655_s4 + $0x10] sm:$0xff] }
 0x367   :  { %v1063_v52 = vadd.f32 %v1062_v47, %v1061_v49  ;;  %v1091_v53 = vadd.f32 %v1090_v50, %v1089_v2  ;;  %v1057_v11 = vrot.slane %v1056_v48, 1  ;;  %v1085_v32 = vrot.slane %v1084_v60, 1 }
 0x368   :  { %v1077_v40 = vadd.f32 %v1076_v14, %v1075_v38  ;;  %v1105_v4 = vadd.f32 %v1104_v63, %v1103_v46  ;;  %v1071_v10 = vrot.slane %v1070_v36, 1  ;;  %v1099_v9 = vrot.slane %v1098_v27, 1  ;;  %v1267_v46 = vld [vmem:[%s6655_s4 + $0x8] sm:$0xff]  ;;  %v1266_v38 = vld [vmem:[%s6655_s4] sm:$0xff] }
 0x369   :  { %v1064_v3 = vrot.slane %v1063_v52, 1  ;;  %v1092_v44 = vrot.slane %v1091_v53, 1  ;;  %v1058_v55 = vadd.f32 %v1057_v11, %v1056_v48  ;;  %v1086_v19 = vadd.f32 %v1085_v32, %v1084_v60  ;;  %v1269_v60 = vld [vmem:[%s6655_s4 + $0x18] sm:$0xff] }
 0x36a   :  { %v1078_v51 = vrot.slane %v1077_v40, 1  ;;  %v1106_v54 = vrot.slane %v1105_v4, 1  ;;  %v1072_v37 = vadd.f32 %v1071_v10, %v1070_v36  ;;  %v1100_v0 = vadd.f32 %v1099_v9, %v1098_v27  ;;  %v2341_v10 = vld [vmem:[#allocation15 + $0xde0] sm:$0xff]  ;;  %v2210_v9 = vld [vmem:[#allocation15 + $0x9c8] sm:$0xff] }
 0x36b   :  { %v1065_v31 = vadd.f32 %v1064_v3, %v1063_v52  ;;  %v1093_v30 = vadd.f32 %v1092_v44, %v1091_v53  ;;  %v1117_v14 = vsel %vm1116_vm3, %v1086_v19, %v1058_v55  ;;  %v6849_v49 = vmov 0.0   ;;  %v2337_v3 = vld [vmem:[#allocation15 + $0xdc0] sm:$0xff]  ;;  %v2206_v44 = vld [vmem:[#allocation15 + $0x9a8] sm:$0xff] }
 0x36c   :  { %v1079_v25 = vadd.f32 %v1078_v51, %v1077_v40  ;;  %v1107_v8 = vadd.f32 %v1106_v54, %v1105_v4  ;;  %v1119_v47 = vsel %vm1116_vm3, %v1100_v0, %v1072_v37  ;;  %v2334_v51 = vld [vmem:[#allocation15 + $0xda8] sm:$0xff]  ;;  %v2205_v54 = vld [vmem:[#allocation15 + $0x9a0] sm:$0xff] }
 0x36d   :  { %v1118_v2 = vsel %vm1116_vm3, %v1093_v30, %v1065_v31  ;;  %v2333_v55 = vld [vmem:[#allocation15 + $0xda0] sm:$0xff]  ;;  %v2202_v19 = vld [vmem:[#allocation15 + $0x988] sm:$0xff] }
 0x36e   :  { %1189 = vmatprep.mubr.f32.mxu0 %v1118_v2  ;;  %v1120_v63 = vsel %vm1116_vm3, %v1107_v8, %v1079_v25  ;;  %v2330_v31 = vld [vmem:[#allocation15 + $0xd88] sm:$0xff]  ;;  %v2201_v30 = vld [vmem:[#allocation15 + $0x980] sm:$0xff] }
 0x36f   :  { %1259 = vmatprep.mubr.f32.mxu1 %v1120_v63  ;;  %1190 = vmatmul.mubr.f32.vlgmr.msra.gmra.mxu0 %v1117_v14  ;;  %v2329_v37 = vld [vmem:[#allocation15 + $0xd80] sm:$0xff]  ;;  %v2198_v0 = vld [vmem:[#allocation15 + $0x968] sm:$0xff] }
 0x370   :  { %1260 = vmatmul.mubr.f32.vlgmr.msra.gmra.mxu1 %v1119_v47  ;;  %4610 = vmatpush3.msra.mxu0 %v1269_v60  ;;  %v2326_v25 = vld [vmem:[#allocation15 + $0xd68] sm:$0xff]  ;;  %v2197_v8 = vld [vmem:[#allocation15 + $0x960] sm:$0xff] }
 0x371   :  { %4611 = vmatprep.subr.mxu0 %v6849_v49  ;;  %4617 = vmatprep.mubr.msk.f32.mxu0 %vm5017_vm4, %v6849_v49  ;;  %v2325_v2 = vld [vmem:[#allocation15 + $0xd60] sm:$0xff]  ;;  %v2194_v63 = vld [vmem:[#allocation15 + $0x948] sm:$0xff] }
 0x372   :  { %4612 = vmatpush3.msra.mxu0 %v1268_v42  ;;  %4622 = vmatprep.mubr.msk.f32.mxu1 %vm5017_vm4, %v6849_v49  ;;  %v2322_v14 = vld [vmem:[#allocation15 + $0xd48] sm:$0xff]  ;;  %v2193_v47 = vld [vmem:[#allocation15 + $0x940] sm:$0xff] }
 0x373   :  { %4613 = vmatprep.subr.mxu0 %v6849_v49  ;;  %v2321_v60 = vld [vmem:[#allocation15 + $0xd40] sm:$0xff]  ;;  %v2190_v42 = vld [vmem:[#allocation15 + $0x928] sm:$0xff] }
 0x374   :  { %4614 = vmatpush3.msra.mxu0 %v1267_v46  ;;  %v2318_v46 = vld [vmem:[#allocation15 + $0xd28] sm:$0xff] }
 0x375   :  { %4615 = vmatprep.subr.mxu0 %v6849_v49 }
 0x376   :  { %4616 = vmatpush3.msra.mxu0 %v1266_v38  ;;  %v2189_v38 = vld [vmem:[#allocation15 + $0x920] sm:$0xff] }
 0x377   :  { %1541 = vmatprep.subr.mxu0 %v5609_v16  ;;  %v1351_v16 = vld [vmem:[#allocation12] sm:$0x3] }
 0x378   :  { %4621 = vmatpush3.msk.msra.mxu1 %vm1363_vm5, %v1351_v16  ;;  %v2309_v16 = vld [vmem:[#allocation15 + $0xce0] sm:$0xff] }
 0x379   :  { %1470 = vmatprep.subr.mxu1 %v5607_v24  ;;  %v2214_v24 = vld [vmem:[#allocation15 + $0x9e8] sm:$0xff] }
 0x42f   :  { %v4494_v48 = vpop.f32.mrf.mxu0 }
 0x430   :  { %v4529_v50 = vpop.f32.mrf.mxu1 }
 0x431   :  { %v4495_v56 = vpop.f32.mrf.mxu0 }
 0x432   :  { %v4496_v36 = vadd.f32 %v4495_v56, %v4494_v48  ;;  %v4530_v27 = vpop.f32.mrf.mxu1  ;;  %v2317_v48 = vld [vmem:[#allocation15 + $0xd20] sm:$0xff]  ;;  %v2314_v56 = vld [vmem:[#allocation15 + $0xd08] sm:$0xff] }
 0x433   :  { %v4531_v52 = vadd.f32 %v4530_v27, %v4529_v50  ;;  %v2186_v50 = vld [vmem:[#allocation15 + $0x908] sm:$0xff]  ;;  %v2313_v27 = vld [vmem:[#allocation15 + $0xd00] sm:$0xff] }
 0x435   :  { %v1262_v53 = vadd.f32 %v4531_v52, %v4496_v36  ;;  %v2185_v36 = vld [vmem:[#allocation15 + $0x900] sm:$0xff]  ;;  %v2182_v52 = vld [vmem:[#allocation15 + $0x8e8] sm:$0xff] }
 0x437   :  { %v1265_v11 = vmul.f32 0.00390625, %v1262_v53  ;;  %v2310_v53 = vld [vmem:[#allocation15 + $0xce8] sm:$0xff] }
 0x439   :  { %4618 = vmatmul.mubr.msk.f32.vlgmr.msra.gmra.mxu0 %vm826_vm2, %v1265_v11  ;;  %v2181_v11 = vld [vmem:[#allocation15 + $0x8e0] sm:$0xff] }
 0x43a   :  { %1542 = vmatpush1.msra.mxu0 %v5615_v6  ;;  %1581 = vmatprep.mubr.f32.mxu0 %v6849_v49  ;;  %v4382_v6 = vld [vmem:[#allocation11] ss:$0 sm:$0xff] }
 0x43b   :  { %1543 = vmatprep.subr.mxu0 %v5621_v26 }
 0x43c   :  { %1544 = vmatpush1.msra.mxu0 %v5627_v21  ;;  %v2342_v21 = vld [vmem:[#allocation15 + $0xde8] sm:$0xff] }
 0x43d   :  { %1545 = vmatprep.subr.mxu0 %v5633_v15  ;;  %v4384_v15 = vld [vmem:[#allocation14] ss:$0 sm:$0xff] }
 0x43e   :  { %1546 = vmatpush1.msra.mxu0 %v5639_v18 }
 0x43f   :  { %1547 = vmatprep.subr.mxu0 %v5643_v17 }
 0x440   :  { %1548 = vmatpush1.msra.mxu0 %v5649_v39 }
 0x441   :  { %2498 = vmatprep.subr.mxu0 %v2342_v21  ;;  %v2173_v21 = vld [vmem:[#allocation15 + $0x8a0] sm:$0xff] }
 0x4f9   :  { %v1346_v32 = vpop.f32.mrf.mxu0 }
 0x4fa   :  { %v1347_v40 = vadd.f32 %v4382_v6, %v1346_v32  ;;  %v2178_v6 = vld [vmem:[#allocation15 + $0x8c8] sm:$0xff] }
 0x4fb   :  { %v4619_v4 = vpop.f32.mrf.mxu0  ;;  %v2306_v32 = vld [vmem:[#allocation15 + $0xcc8] sm:$0xff] }
 0x4fc   :  { %v1350_v26 = vmax.f32 %v1347_v40, 0.0  ;;  %v2177_v40 = vld [vmem:[#allocation15 + $0x8c0] sm:$0xff] }
 0x4fd   :  { %v2305_v4 = vld [vmem:[#allocation15 + $0xcc0] sm:$0xff] }
 0x4fe   :  { %4623 = vmatmul.mubr.msk.f32.vlgmr.msra.gmra.mxu1 %vm1359_vm6, %v1350_v26  ;;  %v2174_v26 = vld [vmem:[#allocation15 + $0x8a8] sm:$0xff] }
 0x4ff   :  { %1471 = vmatpush1.msra.mxu1 %v5613_v5  ;;  %1510 = vmatprep.mubr.f32.mxu1 %v6849_v49 }
 0x500   :  { %1472 = vmatprep.subr.mxu1 %v5619_v7 }
 0x501   :  { %1473 = vmatpush1.msra.mxu1 %v5625_v22 }
 0x502   :  { %1474 = vmatprep.subr.mxu1 %v5631_v28  ;;  %v2213_v28 = vld [vmem:[#allocation15 + $0x9e0] sm:$0xff] }
 0x503   :  { %1475 = vmatpush1.msra.mxu1 %v5635_v35 }
 0x504   :  { %1476 = vmatprep.subr.mxu1 %v5641_v20  ;;  %v2338_v20 = vld [vmem:[#allocation15 + $0xdc8] sm:$0xff] }
 0x505   :  { %1477 = vmatpush1.msra.mxu1 %v5647_v23  ;;  %v2209_v23 = vld [vmem:[#allocation15 + $0x9c0] sm:$0xff] }
 0x506   :  { %2409 = vmatprep.subr.mxu1 %v2214_v24  ;;  %v2302_v24 = vld [vmem:[#allocation15 + $0xca8] sm:$0xff] }
 0x5be   :  { %v1433_v5 = vpop.f32.mrf.mxu1 }
 0x5bf   :  { %v1434_v18 = vadd.f32 %v4384_v15, %v1433_v5  ;;  %v2301_v15 = vld [vmem:[#allocation15 + $0xca0] sm:$0xff]  ;;  %v2170_v5 = vld [vmem:[#allocation15 + $0x888] sm:$0xff] }
 0x5c0   :  { %v4624_v17 = vpop.f32.mrf.mxu1 }
 0x5c1   :  { %v4387_v39 = vmul.f32 -1.442695, %v1434_v18  ;;  %v2298_v18 = vld [vmem:[#allocation15 + $0xc88] sm:$0xff]  ;;  %v2169_v17 = vld [vmem:[#allocation15 + $0x880] sm:$0xff] }
 0x5c3   :  { %4646 = vpow2.f32 %v4387_v39  ;;  %v2297_v39 = vld [vmem:[#allocation15 + $0xc80] sm:$0xff] }
 0x5d0   :  { %v4647_v7 = vpop.eup %4646 }
 0x5d1   :  { %v1440_v22 = vadd.f32 1.0, %v4647_v7  ;;  %v2166_v7 = vld [vmem:[#allocation15 + $0x868] sm:$0xff] }
 0x5d3   :  { %4648 = vrcp.f32 %v1440_v22  ;;  %v2294_v22 = vld [vmem:[#allocation15 + $0xc68] sm:$0xff] }
 0x5e0   :  { %v4649_v35 = vpop.eup %4648 }
 0x5e1   :  { %4388 = vmatmul.mubr.msk.f32.vlgmr.msra.gmra.mxu1 %vm826_vm2, %v4649_v35  ;;  %4389 = vmatmul.mubr.msk.f32.vlgmr.msra.gmra.mxu0 %vm826_vm2, %v4649_v35  ;;  %v2162_v35 = vld [vmem:[#allocation15 + $0x848] sm:$0xff] }
 0x5e2   :  { %2410 = vmatpush1.msra.mxu1 %v2213_v28  ;;  %2499 = vmatpush1.msra.mxu0 %v2341_v10  ;;  %v2165_v28 = vld [vmem:[#allocation15 + $0x860] sm:$0xff] }
 0x5e3   :  { %2411 = vmatprep.subr.mxu1 %v2210_v9  ;;  %2500 = vmatprep.subr.mxu0 %v2338_v20  ;;  %v2293_v10 = vld [vmem:[#allocation15 + $0xc60] sm:$0xff]  ;;  %v2290_v9 = vld [vmem:[#allocation15 + $0xc48] sm:$0xff] }
 0x5e4   :  { %2412 = vmatpush1.msra.mxu1 %v2209_v23  ;;  %2501 = vmatpush1.msra.mxu0 %v2337_v3  ;;  %v2161_v20 = vld [vmem:[#allocation15 + $0x840] sm:$0xff]  ;;  %v2158_v3 = vld [vmem:[#allocation15 + $0x828] sm:$0xff] }
 0x5e5   :  { %2413 = vmatprep.subr.mxu1 %v2206_v44  ;;  %2502 = vmatprep.subr.mxu0 %v2334_v51  ;;  %v2289_v23 = vld [vmem:[#allocation15 + $0xc40] sm:$0xff]  ;;  %v2286_v44 = vld [vmem:[#allocation15 + $0xc28] sm:$0xff] }
 0x5e6   :  { %2414 = vmatpush1.msra.mxu1 %v2205_v54  ;;  %2503 = vmatpush1.msra.mxu0 %v2333_v55  ;;  %v2157_v51 = vld [vmem:[#allocation15 + $0x820] sm:$0xff]  ;;  %v2154_v55 = vld [vmem:[#allocation15 + $0x808] sm:$0xff] }
 0x5e7   :  { %2415 = vmatprep.subr.mxu1 %v2202_v19  ;;  %2504 = vmatprep.subr.mxu0 %v2330_v31  ;;  %v2285_v54 = vld [vmem:[#allocation15 + $0xc20] sm:$0xff]  ;;  %v2282_v19 = vld [vmem:[#allocation15 + $0xc08] sm:$0xff] }
 0x5e8   :  { %2416 = vmatpush1.msra.mxu1 %v2201_v30  ;;  %2505 = vmatpush1.msra.mxu0 %v2329_v37  ;;  %v2153_v31 = vld [vmem:[#allocation15 + $0x800] sm:$0xff]  ;;  %v2278_v37 = vld [vmem:[#allocation15 + $0xbe8] sm:$0xff] }
 0x5e9   :  { %2417 = vmatprep.subr.mxu1 %v2198_v0  ;;  %2506 = vmatprep.subr.mxu0 %v2326_v25  ;;  %v2281_v30 = vld [vmem:[#allocation15 + $0xc00] sm:$0xff]  ;;  %v2406_v0 = vld [vmem:[#allocation15 + $0xfe8] sm:$0xff] }
 0x5ea   :  { %2418 = vmatpush1.msra.mxu1 %v2197_v8  ;;  %2507 = vmatpush1.msra.mxu0 %v2325_v2  ;;  %v2277_v25 = vld [vmem:[#allocation15 + $0xbe0] sm:$0xff]  ;;  %v2274_v2 = vld [vmem:[#allocation15 + $0xbc8] sm:$0xff] }
 0x5eb   :  { %2419 = vmatprep.subr.mxu1 %v2194_v63  ;;  %2508 = vmatprep.subr.mxu0 %v2322_v14  ;;  %v2405_v8 = vld [vmem:[#allocation15 + $0xfe0] sm:$0xff]  ;;  %v2402_v63 = vld [vmem:[#allocation15 + $0xfc8] sm:$0xff] }
 0x5ec   :  { %2420 = vmatpush1.msra.mxu1 %v2193_v47  ;;  %2509 = vmatpush1.msra.mxu0 %v2321_v60  ;;  %v2273_v14 = vld [vmem:[#allocation15 + $0xbc0] sm:$0xff]  ;;  %v2270_v60 = vld [vmem:[#allocation15 + $0xba8] sm:$0xff] }
 0x5ed   :  { %2421 = vmatprep.subr.mxu1 %v2190_v42  ;;  %2510 = vmatprep.subr.mxu0 %v2318_v46  ;;  %v2401_v47 = vld [vmem:[#allocation15 + $0xfc0] sm:$0xff]  ;;  %v2398_v42 = vld [vmem:[#allocation15 + $0xfa8] sm:$0xff] }
 0x5ee   :  { %2422 = vmatpush1.msra.mxu1 %v2189_v38  ;;  %2511 = vmatpush1.msra.mxu0 %v2317_v48  ;;  %v2269_v46 = vld [vmem:[#allocation15 + $0xba0] sm:$0xff]  ;;  %v2266_v48 = vld [vmem:[#allocation15 + $0xb88] sm:$0xff] }
 0x5ef   :  { %2423 = vmatprep.subr.mxu1 %v2186_v50  ;;  %2512 = vmatprep.subr.mxu0 %v2314_v56  ;;  %v2397_v38 = vld [vmem:[#allocation15 + $0xfa0] sm:$0xff]  ;;  %v2394_v50 = vld [vmem:[#allocation15 + $0xf88] sm:$0xff] }
 0x5f0   :  { %2424 = vmatpush1.msra.mxu1 %v2185_v36  ;;  %2513 = vmatpush1.msra.mxu0 %v2313_v27  ;;  %v2265_v56 = vld [vmem:[#allocation15 + $0xb80] sm:$0xff]  ;;  %v2262_v27 = vld [vmem:[#allocation15 + $0xb68] sm:$0xff] }
 0x5f1   :  { %2425 = vmatprep.subr.mxu1 %v2182_v52  ;;  %2514 = vmatprep.subr.mxu0 %v2310_v53  ;;  %v2393_v36 = vld [vmem:[#allocation15 + $0xf80] sm:$0xff]  ;;  %v2390_v52 = vld [vmem:[#allocation15 + $0xf68] sm:$0xff] }
 0x5f2   :  { %2426 = vmatpush1.msra.mxu1 %v2181_v11  ;;  %2515 = vmatpush1.msra.mxu0 %v2309_v16  ;;  %v2261_v53 = vld [vmem:[#allocation15 + $0xb60] sm:$0xff]  ;;  %v2258_v16 = vld [vmem:[#allocation15 + $0xb48] sm:$0xff] }
 0x5f3   :  { %2427 = vmatprep.subr.mxu1 %v2178_v6  ;;  %2516 = vmatprep.subr.mxu0 %v2306_v32  ;;  %v2389_v11 = vld [vmem:[#allocation15 + $0xf60] sm:$0xff]  ;;  %v2386_v6 = vld [vmem:[#allocation15 + $0xf48] sm:$0xff] }
 0x5f4   :  { %2428 = vmatpush1.msra.mxu1 %v2177_v40  ;;  %2517 = vmatpush1.msra.mxu0 %v2305_v4  ;;  %v2257_v32 = vld [vmem:[#allocation15 + $0xb40] sm:$0xff]  ;;  %v2254_v4 = vld [vmem:[#allocation15 + $0xb28] sm:$0xff] }
 0x5f5   :  { %2429 = vmatprep.subr.mxu1 %v2174_v26  ;;  %2518 = vmatprep.subr.mxu0 %v2302_v24  ;;  %v2385_v40 = vld [vmem:[#allocation15 + $0xf40] sm:$0xff]  ;;  %v2382_v26 = vld [vmem:[#allocation15 + $0xf28] sm:$0xff] }
 0x5f6   :  { %2430 = vmatpush1.msra.mxu1 %v2173_v21  ;;  %2519 = vmatpush1.msra.mxu0 %v2301_v15  ;;  %v2253_v24 = vld [vmem:[#allocation15 + $0xb20] sm:$0xff]  ;;  %v2250_v15 = vld [vmem:[#allocation15 + $0xb08] sm:$0xff] }
 0x5f7   :  { %2431 = vmatprep.subr.mxu1 %v2170_v5  ;;  %2520 = vmatprep.subr.mxu0 %v2298_v18  ;;  %v2381_v21 = vld [vmem:[#allocation15 + $0xf20] sm:$0xff]  ;;  %v2378_v5 = vld [vmem:[#allocation15 + $0xf08] sm:$0xff] }
 0x5f8   :  { %2432 = vmatpush1.msra.mxu1 %v2169_v17  ;;  %2521 = vmatpush1.msra.mxu0 %v2297_v39  ;;  %v2249_v18 = vld [vmem:[#allocation15 + $0xb00] sm:$0xff]  ;;  %v2246_v39 = vld [vmem:[#allocation15 + $0xae8] sm:$0xff] }
 0x5f9   :  { %2433 = vmatprep.subr.mxu1 %v2166_v7  ;;  %2522 = vmatprep.subr.mxu0 %v2294_v22  ;;  %v2377_v17 = vld [vmem:[#allocation15 + $0xf00] sm:$0xff]  ;;  %v2374_v7 = vld [vmem:[#allocation15 + $0xee8] sm:$0xff] }
 0x5fa   :  { %2434 = vmatpush1.msra.mxu1 %v2165_v28  ;;  %2523 = vmatpush1.msra.mxu0 %v2293_v10  ;;  %v2245_v22 = vld [vmem:[#allocation15 + $0xae0] sm:$0xff]  ;;  %v2242_v10 = vld [vmem:[#allocation15 + $0xac8] sm:$0xff] }
 0x5fb   :  { %2435 = vmatprep.subr.mxu1 %v2162_v35  ;;  %2524 = vmatprep.subr.mxu0 %v2290_v9  ;;  %v2373_v28 = vld [vmem:[#allocation15 + $0xee0] sm:$0xff]  ;;  %v2370_v35 = vld [vmem:[#allocation15 + $0xec8] sm:$0xff] }
 0x5fc   :  { %2436 = vmatpush1.msra.mxu1 %v2161_v20  ;;  %2525 = vmatpush1.msra.mxu0 %v2289_v23  ;;  %v2241_v9 = vld [vmem:[#allocation15 + $0xac0] sm:$0xff]  ;;  %v2238_v23 = vld [vmem:[#allocation15 + $0xaa8] sm:$0xff] }
 0x5fd   :  { %2437 = vmatprep.subr.mxu1 %v2158_v3  ;;  %2526 = vmatprep.subr.mxu0 %v2286_v44  ;;  %v2369_v20 = vld [vmem:[#allocation15 + $0xec0] sm:$0xff]  ;;  %v2366_v3 = vld [vmem:[#allocation15 + $0xea8] sm:$0xff] }
 0x5fe   :  { %2438 = vmatpush1.msra.mxu1 %v2157_v51  ;;  %2527 = vmatpush1.msra.mxu0 %v2285_v54  ;;  %v2237_v44 = vld [vmem:[#allocation15 + $0xaa0] sm:$0xff]  ;;  %v2234_v54 = vld [vmem:[#allocation15 + $0xa88] sm:$0xff] }
 0x5ff   :  { %2439 = vmatprep.subr.mxu1 %v2154_v55  ;;  %2528 = vmatprep.subr.mxu0 %v2282_v19  ;;  %v2365_v51 = vld [vmem:[#allocation15 + $0xea0] sm:$0xff]  ;;  %v2362_v55 = vld [vmem:[#allocation15 + $0xe88] sm:$0xff] }
 0x600   :  { %2440 = vmatpush1.msra.mxu1 %v2153_v31  ;;  %2529 = vmatpush1.msra.mxu0 %v2281_v30  ;;  %v2233_v19 = vld [vmem:[#allocation15 + $0xa80] sm:$0xff]  ;;  %v2230_v30 = vld [vmem:[#allocation15 + $0xa68] sm:$0xff] }
 0x601   :  { %2441 = vmatprep.subr.mxu1 %v2278_v37  ;;  %2530 = vmatprep.subr.mxu0 %v2406_v0  ;;  %v2361_v31 = vld [vmem:[#allocation15 + $0xe80] sm:$0xff]  ;;  %v2358_v37 = vld [vmem:[#allocation15 + $0xe68] sm:$0xff] }
 0x602   :  { %2442 = vmatpush2.msra.mxu1 %v2277_v25  ;;  %2531 = vmatpush2.msra.mxu0 %v2405_v8  ;;  %v2229_v0 = vld [vmem:[#allocation15 + $0xa60] sm:$0xff]  ;;  %v2226_v8 = vld [vmem:[#allocation15 + $0xa48] sm:$0xff] }
 0x603   :  { %2443 = vmatprep.subr.mxu1 %v2274_v2  ;;  %2532 = vmatprep.subr.mxu0 %v2402_v63  ;;  %v2357_v25 = vld [vmem:[#allocation15 + $0xe60] sm:$0xff]  ;;  %v2354_v2 = vld [vmem:[#allocation15 + $0xe48] sm:$0xff] }
 0x604   :  { %2444 = vmatpush2.msra.mxu1 %v2273_v14  ;;  %2533 = vmatpush2.msra.mxu0 %v2401_v47  ;;  %v2225_v63 = vld [vmem:[#allocation15 + $0xa40] sm:$0xff]  ;;  %v2222_v47 = vld [vmem:[#allocation15 + $0xa28] sm:$0xff] }
 0x605   :  { %2445 = vmatprep.subr.mxu1 %v2270_v60  ;;  %2534 = vmatprep.subr.mxu0 %v2398_v42  ;;  %v2353_v14 = vld [vmem:[#allocation15 + $0xe40] sm:$0xff]  ;;  %v2350_v60 = vld [vmem:[#allocation15 + $0xe28] sm:$0xff] }
 0x606   :  { %2446 = vmatpush2.msra.mxu1 %v2269_v46  ;;  %2535 = vmatpush2.msra.mxu0 %v2397_v38  ;;  %v2221_v42 = vld [vmem:[#allocation15 + $0xa20] sm:$0xff]  ;;  %v2218_v38 = vld [vmem:[#allocation15 + $0xa08] sm:$0xff] }
 0x607   :  { %2447 = vmatprep.subr.mxu1 %v2266_v48  ;;  %2536 = vmatprep.subr.mxu0 %v2394_v50  ;;  %v2349_v46 = vld [vmem:[#allocation15 + $0xe20] sm:$0xff]  ;;  %v2346_v48 = vld [vmem:[#allocation15 + $0xe08] sm:$0xff] }
 0x608   :  { %2448 = vmatpush2.msra.mxu1 %v2265_v56  ;;  %2537 = vmatpush2.msra.mxu0 %v2393_v36  ;;  %v2217_v50 = vld [vmem:[#allocation15 + $0xa00] sm:$0xff]  ;;  %v2216_v36 = vld [vmem:[#allocation15 + $0x9f8] sm:$0xff] }
 0x609   :  { %2449 = vmatprep.subr.mxu1 %v2262_v27  ;;  %2538 = vmatprep.subr.mxu0 %v2390_v52  ;;  %v2345_v56 = vld [vmem:[#allocation15 + $0xe00] sm:$0xff]  ;;  %v2344_v27 = vld [vmem:[#allocation15 + $0xdf8] sm:$0xff]  ;;  %v6850_v52 = vlaneseq }
 0x60a   :  { %2450 = vmatpush2.msra.mxu1 %v2261_v53  ;;  %2539 = vmatpush2.msra.mxu0 %v2389_v11 }
 0x60b   :  { %2451 = vmatprep.subr.mxu1 %v2258_v16  ;;  %2540 = vmatprep.subr.mxu0 %v2386_v6  ;;  %vm1682_vm7 = vcmp.lt.s32.totalorder %v6850_v52, 512 }
 0x60c   :  { %2452 = vmatpush2.msra.mxu1 %v2257_v32  ;;  %2541 = vmatpush2.msra.mxu0 %v2385_v40  ;;  %1684 = vst.msk [vmem:[#allocation2] ss:$8 sm:$0xf] %vm1682_vm7, %v6849_v49  ;;  %1687 = vst.msk [vmem:[#allocation2 + $0x60] ss:$8 sm:$0xf] %vm1682_vm7, %v6849_v49 }
 0x60d   :  { %2453 = vmatprep.subr.mxu1 %v2254_v4  ;;  %2542 = vmatprep.subr.mxu0 %v2382_v26  ;;  %1690 = vst.msk [vmem:[#allocation2 + $0x41] ss:$8 sm:$0xf] %vm1682_vm7, %v6849_v49  ;;  %1693 = vst.msk [vmem:[#allocation2 + $0xa1] ss:$8 sm:$0xf] %vm1682_vm7, %v6849_v49 }
 0x60e   :  { %2454 = vmatpush2.msra.mxu1 %v2253_v24  ;;  %2543 = vmatpush2.msra.mxu0 %v2381_v21 }
 0x60f   :  { %2455 = vmatprep.subr.mxu1 %v2250_v15  ;;  %2544 = vmatprep.subr.mxu0 %v2378_v5  ;;  %v1634_v15 = vsub.s32 2, %v5660_v41  ;;  %v1638_v5 = vsub.s32 3, %v5660_v41  ;;  %v6852_v41 = vmax.f32 %v5805_v1, 0.0  ;;  %v6859_v1 = vmax.f32 %v5757_v59, 0.0  ;;  %v6871_v59 = vld [vmem:[#allocation34_spill] sm:$0xff] }
 0x610   :  { %2456 = vmatpush2.msra.mxu1 %v2249_v18  ;;  %2545 = vmatpush2.msra.mxu0 %v2377_v17  ;;  %v6872_v52 = vmax.f32 %v6871_v59, 0.0 }
 0x611   :  { %2457 = vmatprep.subr.mxu1 %v2246_v39  ;;  %2546 = vmatprep.subr.mxu0 %v2374_v7 }
 0x612   :  { %2458 = vmatpush2.msra.mxu1 %v2245_v22  ;;  %2547 = vmatpush2.msra.mxu0 %v2373_v28 }
 0x613   :  { %2459 = vmatprep.subr.mxu1 %v2242_v10  ;;  %2548 = vmatprep.subr.mxu0 %v2370_v35 }
 0x614   :  { %2460 = vmatpush2.msra.mxu1 %v2241_v9  ;;  %2549 = vmatpush2.msra.mxu0 %v2369_v20 }
 0x615   :  { %2461 = vmatprep.subr.mxu1 %v2238_v23  ;;  %2550 = vmatprep.subr.mxu0 %v2366_v3  ;;  %v6851_v23 = vmax.f32 %v5753_v57, 0.0  ;;  %v6858_v57 = vmax.f32 %v5815_v45, 0.0  ;;  %v6869_v45 = vld [vmem:[#allocation31_spill] sm:$0xff] }
 0x616   :  { %2462 = vmatpush2.msra.mxu1 %v2237_v44  ;;  %2551 = vmatpush2.msra.mxu0 %v2365_v51  ;;  %v6853_v51 = vmax.f32 %v5761_v61, 0.0  ;;  %v6860_v61 = vmax.f32 %v5809_v29, 0.0 }
 0x617   :  { %2463 = vmatprep.subr.mxu1 %v2234_v54  ;;  %2552 = vmatprep.subr.mxu0 %v2362_v55  ;;  %v6854_v55 = vmax.f32 %v5813_v43, 0.0  ;;  %v6861_v43 = vld [vmem:[#allocation30_spill] sm:$0xff] }
 0x618   :  { %2464 = vmatpush2.msra.mxu1 %v2233_v19  ;;  %2553 = vmatpush2.msra.mxu0 %v2361_v31  ;;  %v6855_v31 = vmax.f32 %v5755_v58, 0.0  ;;  %v6863_v58 = vld [vmem:[#allocation33_spill] sm:$0xff] }
 0x619   :  { %2465 = vmatprep.subr.mxu1 %v2230_v30  ;;  %2554 = vmatprep.subr.mxu0 %v2358_v37  ;;  %v6856_v37 = vmax.f32 %v5807_v34, 0.0  ;;  %v6865_v34 = vld [vmem:[#allocation29_spill] sm:$0xff] }
 0x61a   :  { %2466 = vmatpush2.msra.mxu1 %v2229_v0  ;;  %2555 = vmatpush2.msra.mxu0 %v2357_v25  ;;  %v6857_v25 = vmax.f32 %v5763_v62, 0.0  ;;  %v6867_v62 = vld [vmem:[#allocation32_spill] sm:$0xff] }
 0x61b   :  { %2467 = vmatprep.subr.mxu1 %v2226_v8  ;;  %2556 = vmatprep.subr.mxu0 %v2354_v2 }
 0x61c   :  { %2468 = vmatpush2.msra.mxu1 %v2225_v63  ;;  %2557 = vmatpush2.msra.mxu0 %v2353_v14 }
 0x61d   :  { %2469 = vmatprep.subr.mxu1 %v2222_v47  ;;  %2558 = vmatprep.subr.mxu0 %v2350_v60  ;;  %v6862_v47 = vmax.f32 %v6861_v43, 0.0  ;;  %v2343_v43 = vld [vmem:[#allocation15 + $0xdf0] sm:$0xff] }
 0x61e   :  { %2470 = vmatpush2.msra.mxu1 %v2221_v42  ;;  %2559 = vmatpush2.msra.mxu0 %v2349_v46  ;;  %v6864_v42 = vmax.f32 %v6863_v58, 0.0 }
 0x61f   :  { %2471 = vmatprep.subr.mxu1 %v2218_v38  ;;  %2560 = vmatprep.subr.mxu0 %v2346_v48  ;;  %v6866_v38 = vmax.f32 %v6865_v34, 0.0  ;;  %v2212_v34 = vld [vmem:[#allocation15 + $0x9d8] sm:$0xff] }
 0x620   :  { %2472 = vmatpush2.msra.mxu1 %v2217_v50  ;;  %2561 = vmatpush2.msra.mxu0 %v2345_v56  ;;  %v6868_v50 = vmax.f32 %v6867_v62, 0.0 }
 0x621   :  { %2587 = vmatprep.subr.mxu1 %v2216_v36  ;;  %2676 = vmatprep.subr.mxu0 %v2344_v27  ;;  %v6870_v36 = vmax.f32 %v6869_v45, 0.0  ;;  %v2211_v45 = vld [vmem:[#allocation15 + $0x9d0] sm:$0xff] }
 0x6a1   :  { %v1512_v53 = vpop.f32.mrf.mxu1  ;;  %v1583_v11 = vpop.f32.mrf.mxu0 }
 0x6a3   :  { %v1514_v16 = vpop.f32.mrf.mxu1  ;;  %v1585_v6 = vpop.f32.mrf.mxu0 }
 0x6a4   :  { %v1592_v32 = vcombine.low %v1512_v53, %v1514_v16  ;;  %v1593_v40 = vcombine.low %v1583_v11, %v1585_v6 }
 0x6a6   :  { %v1600_v4 = vrot.slane %v1592_v32, %v5663_v13  ;;  %v1607_v26 = vrot.slane %v1593_v40, %v5663_v13 }
 0x6a8   :  { %v1608_v24 = vcombine.low %v1600_v4, %v1607_v26  ;;  %v1609_v21 = vcombine.high %v1600_v4, %v1607_v26 }
 0x6aa   :  { %v1616_v18 = vrot.slane %v1608_v24, %v5663_v13  ;;  %v1623_v17 = vrot.slane %v1609_v21, %v5663_v13 }
 0x6ac   :  { %v1627_v39 = vrot.slane %v1616_v18, %v5668_v12  ;;  %v1631_v7 = vrot.slane %v1616_v18, %v5739_v33  ;;  %v1635_v22 = vrot.slane %v1616_v18, %v1634_v15  ;;  %v1639_v28 = vrot.slane %v1616_v18, %v1638_v5 }
 0x6ad   :  { %v1643_v10 = vrot.slane %v1623_v17, %v5668_v12  ;;  %v1647_v35 = vrot.slane %v1623_v17, %v5739_v33  ;;  %v1651_v9 = vrot.slane %v1623_v17, %v1634_v15  ;;  %v1655_v20 = vrot.slane %v1623_v17, %v1638_v5 }
 0x6ae   :  { %v1664_v3 = vmul.f32 %v1627_v39, %v6851_v23  ;;  %v1665_v44 = vmul.f32 %v1631_v7, %v6852_v41  ;;  %v1666_v54 = vmul.f32 %v1635_v22, %v6853_v51  ;;  %v1667_v19 = vmul.f32 %v1639_v28, %v6854_v55 }
 0x6af   :  { %v1668_v30 = vmul.f32 %v1627_v39, %v6855_v31  ;;  %v1669_v0 = vmul.f32 %v1631_v7, %v6856_v37  ;;  %v1670_v8 = vmul.f32 %v1635_v22, %v6857_v25  ;;  %v1671_v2 = vmul.f32 %v1639_v28, %v6858_v57  ;;  %v2215_v25 = vld [vmem:[#allocation15 + $0x9f0] sm:$0xff] }
 0x6b0   :  { %v1672_v63 = vmul.f32 %v1643_v10, %v6859_v1  ;;  %v1673_v14 = vmul.f32 %v1647_v35, %v6860_v61  ;;  %v1674_v60 = vmul.f32 %v1651_v9, %v6862_v47  ;;  %v1675_v46 = vmul.f32 %v1655_v20, %v6864_v42 }
 0x6b1   :  { %v1676_v48 = vmul.f32 %v1643_v10, %v6866_v38  ;;  %v1677_v56 = vmul.f32 %v1647_v35, %v6868_v50  ;;  %v1678_v27 = vmul.f32 %v1651_v9, %v6870_v36  ;;  %v1679_v53 = vmul.f32 %v1655_v20, %v6872_v52  ;;  %v2340_v38 = vld [vmem:[#allocation15 + $0xdd8] sm:$0xff]  ;;  %v2339_v36 = vld [vmem:[#allocation15 + $0xdd0] sm:$0xff] }
 0x6b2   :  { %v1711_v29 = vrot.slane %v1664_v3, 7  ;;  %v1712_v11 = vrot.slane %v1665_v44, 7  ;;  %v1713_v16 = vrot.slane %v1666_v54, 7  ;;  %v1714_v6 = vrot.slane %v1667_v19, 7  ;;  %v2208_v52 = vld [vmem:[#allocation15 + $0x9b8] sm:$0xff] }
 0x6b3   :  { %v1715_v32 = vrot.slane %v1668_v30, 7  ;;  %v1717_v40 = vrot.slane %v1669_v0, 7  ;;  %v1719_v4 = vrot.slane %v1670_v8, 7  ;;  %v1721_v26 = vrot.slane %v1671_v2, 7 }
 0x6b4   :  { %v1723_v24 = vrot.slane %v1672_v63, 7  ;;  %v1724_v21 = vrot.slane %v1673_v14, 7  ;;  %v1725_v15 = vrot.slane %v1674_v60, 7  ;;  %v1726_v5 = vrot.slane %v1675_v46, 7  ;;  %1759 = vst [vmem:[#allocation2] sm:$0xfe] %v1711_v29 }
 0x6b5   :  { %1760 = vst [vmem:[#allocation2 + $0x8] sm:$0xfe] %v1712_v11  ;;  %1761 = vst [vmem:[#allocation2 + $0x10] sm:$0xfe] %v1713_v16  ;;  %v5935_v18 = vsel %vm643_vm1, %v1711_v29, %v1715_v32  ;;  %v5938_v17 = vsel %vm643_vm1, %v1712_v11, %v1717_v40  ;;  %v5941_v39 = vsel %vm643_vm1, %v1713_v16, %v1719_v4  ;;  %v1727_v22 = vrot.slane %v1676_v48, 7  ;;  %v2207_v29 = vld [vmem:[#allocation15 + $0x9b0] sm:$0xff] }
 0x6b6   :  { %1762 = vst [vmem:[#allocation2 + $0x18] sm:$0xfe] %v1714_v6  ;;  %v5944_v7 = vsel %vm643_vm1, %v1714_v6, %v1721_v26  ;;  %1767 = vst [vmem:[#allocation2 + $0x40] sm:$0x1] %v1715_v32  ;;  %v1729_v28 = vrot.slane %v1677_v56, 7  ;;  %v1731_v10 = vrot.slane %v1678_v27, 7 }
 0x6b7   :  { %1768 = vst [vmem:[#allocation2 + $0x48] sm:$0x1] %v1717_v40  ;;  %1769 = vst [vmem:[#allocation2 + $0x50] sm:$0x1] %v1719_v4  ;;  %v1733_v35 = vrot.slane %v1679_v53, 7  ;;  %v5951_v9 = vsel %vm643_vm1, %v1723_v24, %v1727_v22  ;;  %v2100_v41 = vrot.slane %v5938_v17, 1 }
 0x6b8   :  { %1770 = vst [vmem:[#allocation2 + $0x58] sm:$0x1] %v1721_v26  ;;  %1763 = vst [vmem:[#allocation2 + $0x20] sm:$0xff] %v5935_v18  ;;  %v5954_v20 = vsel %vm643_vm1, %v1724_v21, %v1729_v28  ;;  %v5957_v23 = vsel %vm643_vm1, %v1725_v15, %v1731_v10  ;;  %v2106_v44 = vrot.slane %v5944_v7, 1  ;;  %v2097_v37 = vrot.slane %v5935_v18, 1  ;;  %v2336_v53 = vld [vmem:[#allocation15 + $0xdb8] sm:$0xff] }
 0x6b9   :  { %1764 = vst [vmem:[#allocation2 + $0x28] sm:$0xff] %v5938_v17  ;;  %1765 = vst [vmem:[#allocation2 + $0x30] sm:$0xff] %v5941_v39  ;;  %v5960_v3 = vsel %vm643_vm1, %v1726_v5, %v1733_v35  ;;  %v2103_v57 = vrot.slane %v5941_v39, 1  ;;  %v2335_v6 = vld [vmem:[#allocation15 + $0xdb0] sm:$0xff] }
 0x6ba   :  { %1766 = vst [vmem:[#allocation2 + $0x38] sm:$0xff] %v5944_v7  ;;  %1771 = vst [vmem:[#allocation2 + $0x60] sm:$0xfe] %v1723_v24  ;;  %v2120_v24 = vrot.slane %v5954_v20, 1 }
 0x6bb   :  { %1772 = vst [vmem:[#allocation2 + $0x68] sm:$0xfe] %v1724_v21  ;;  %1773 = vst [vmem:[#allocation2 + $0x70] sm:$0xfe] %v1725_v15  ;;  %v2055_v55 = vld [vmem:[#allocation2] sm:$0xfe] }
 0x6bc   :  { %1774 = vst [vmem:[#allocation2 + $0x78] sm:$0xfe] %v1726_v5  ;;  %1779 = vst [vmem:[#allocation2 + $0xa0] sm:$0x1] %v1727_v22  ;;  %v2056_v51 = vld [vmem:[#allocation2 + $0x8] sm:$0xfe] }
 0x6bd   :  { %1780 = vst [vmem:[#allocation2 + $0xa8] sm:$0x1] %v1729_v28  ;;  %1781 = vst [vmem:[#allocation2 + $0xb0] sm:$0x1] %v1731_v10  ;;  %v2058_v54 = vld [vmem:[#allocation2 + $0x18] sm:$0xfe] }
 0x6be   :  { %1782 = vst [vmem:[#allocation2 + $0xb8] sm:$0x1] %v1733_v35  ;;  %1775 = vst [vmem:[#allocation2 + $0x80] sm:$0xff] %v5951_v9  ;;  %v2099_v19 = vrot.slane %v2056_v51, 1  ;;  %v2105_v31 = vrot.slane %v2058_v54, 1  ;;  %v2096_v30 = vrot.slane %v2055_v55, 1 }
 0x6bf   :  { %1776 = vst [vmem:[#allocation2 + $0x88] sm:$0xff] %v5954_v20  ;;  %1777 = vst [vmem:[#allocation2 + $0x90] sm:$0xff] %v5957_v23  ;;  %v2057_v0 = vld [vmem:[#allocation2 + $0x10] sm:$0xfe]  ;;  %v2060_v2 = vld [vmem:[#allocation2 + $0x48] sm:$0x1] }
 0x6c0   :  { %1778 = vst [vmem:[#allocation2 + $0x98] sm:$0xff] %v5960_v3  ;;  %v2102_v8 = vrot.slane %v2057_v0, 1  ;;  %v2062_v1 = vld [vmem:[#allocation2 + $0x58] sm:$0x1]  ;;  %v5971_v63 = vsel %vm2095_vm8, %v2099_v19, %v2100_v41  ;;  %v5974_v61 = vsel %vm2095_vm8, %v2105_v31, %v2106_v44  ;;  %v5977_v14 = vsel %vm2095_vm8, %v2096_v30, %v2097_v37  ;;  %v2059_v60 = vld [vmem:[#allocation2 + $0x40] sm:$0x1] }
 0x6c1   :  { %v2110_v47 = vrot.slane %v2060_v2, 1  ;;  %v2061_v58 = vld [vmem:[#allocation2 + $0x50] sm:$0x1]  ;;  %2473 = vmatprep.mubr.f32.mxu1 %v5971_v63  ;;  %2562 = vmatprep.mubr.f32.mxu0 %v5974_v61  ;;  %v2114_v46 = vrot.slane %v2062_v1, 1  ;;  %v2108_v27 = vrot.slane %v2059_v60, 1  ;;  %v2126_v21 = vrot.slane %v5960_v3, 1 }
 0x6c2   :  { %v5982_v42 = vsel %vm2095_vm8, %v2102_v8, %v2103_v57  ;;  %2474 = vmatmul.mubr.f32.vlgmr.msra.gmra.mxu1 %v5977_v14  ;;  %v2064_v48 = vld [vmem:[#allocation2 + $0x68] sm:$0xfe]  ;;  %v2112_v59 = vrot.slane %v2061_v58, 1  ;;  %v2063_v32 = vld [vmem:[#allocation2 + $0x60] sm:$0xfe] }
 0x6c3   :  { %2563 = vmatmul.mubr.f32.vlgmr.msra.gmra.mxu0 %v5982_v42  ;;  %v2066_v62 = vld [vmem:[#allocation2 + $0x78] sm:$0xfe]  ;;  %2588 = vmatpush1.msra.mxu1 %v2215_v25  ;;  %v5987_v50 = vsel %vm2095_vm8, %v2100_v41, %v2110_v47  ;;  %v5990_v56 = vsel %vm2095_vm8, %v2106_v44, %v2114_v46  ;;  %v2119_v11 = vrot.slane %v2064_v48, 1  ;;  %v2065_v40 = vld [vmem:[#allocation2 + $0x70] sm:$0xfe]  ;;  %v5995_v4 = vsel %vm2095_vm8, %v2097_v37, %v2108_v27  ;;  %v2204_v15 = vld [vmem:[#allocation15 + $0x998] sm:$0xff] }
 0x6c4   :  { %2677 = vmatpush1.msra.mxu0 %v2343_v43  ;;  %2479 = vmatprep.mubr.f32.mxu1 %v5987_v50  ;;  %v2125_v16 = vrot.slane %v2066_v62, 1  ;;  %v5998_v26 = vsel %vm2095_vm8, %v2103_v57, %v2112_v59  ;;  %v2332_v5 = vld [vmem:[#allocation15 + $0xd98] sm:$0xff]  ;;  %v2203_v22 = vld [vmem:[#allocation15 + $0x990] sm:$0xff]  ;;  %v2116_v10 = vrot.slane %v2063_v32, 1  ;;  %v2122_v35 = vrot.slane %v2065_v40, 1 }
 0x6c5   :  { %2568 = vmatprep.mubr.f32.mxu0 %v5990_v56  ;;  %2589 = vmatprep.subr.mxu1 %v2212_v34  ;;  %v2068_v18 = vld [vmem:[#allocation2 + $0xa8] sm:$0x1]  ;;  %v2070_v17 = vld [vmem:[#allocation2 + $0xb8] sm:$0x1]  ;;  %v6005_v39 = vsel %vm2095_vm8, %v2119_v11, %v2120_v24  ;;  %v2331_v28 = vld [vmem:[#allocation15 + $0xd90] sm:$0xff]  ;;  %v2117_v41 = vrot.slane %v5951_v9, 1 }
 0x6c6   :  { %2678 = vmatprep.subr.mxu0 %v2340_v38  ;;  %2590 = vmatpush1.msra.mxu1 %v2211_v45  ;;  %v6008_v7 = vsel %vm2095_vm8, %v2125_v16, %v2126_v21  ;;  %v2200_v20 = vld [vmem:[#allocation15 + $0x978] sm:$0xff]  ;;  %v2123_v44 = vrot.slane %v5957_v23, 1  ;;  %v2199_v51 = vld [vmem:[#allocation15 + $0x970] sm:$0xff]  ;;  %v2130_v54 = vrot.slane %v2068_v18, 1  ;;  %v2134_v55 = vrot.slane %v2070_v17, 1 }
 0x6c7   :  { %2679 = vmatpush1.msra.mxu0 %v2339_v36  ;;  %2591 = vmatprep.subr.mxu1 %v2208_v52  ;;  %v2328_v3 = vld [vmem:[#allocation15 + $0xd78] sm:$0xff]  ;;  %v2327_v19 = vld [vmem:[#allocation15 + $0xd70] sm:$0xff]  ;;  %v2069_v30 = vld [vmem:[#allocation2 + $0xb0] sm:$0x1]  ;;  %v6015_v37 = vsel %vm2095_vm8, %v2116_v10, %v2117_v41 }
 0x6c8   :  { %2680 = vmatprep.subr.mxu0 %v2336_v53  ;;  %2480 = vmatmul.mubr.f32.gmra.mxu1 %v5995_v4  ;;  %v2067_v31 = vld [vmem:[#allocation2 + $0xa0] sm:$0x1]  ;;  %v6018_v0 = vsel %vm2095_vm8, %v2122_v35, %v2123_v44  ;;  %v2196_v9 = vld [vmem:[#allocation15 + $0x958] sm:$0xff]  ;;  %v6023_v25 = vsel %vm2095_vm8, %v2120_v24, %v2130_v54  ;;  %v6026_v8 = vsel %vm2095_vm8, %v2126_v21, %v2134_v55  ;;  %v2132_v43 = vrot.slane %v2069_v30, 1 }
 0x6c9   :  { %2569 = vmatmul.mubr.f32.gmra.mxu0 %v5998_v26  ;;  %2592 = vmatpush1.msra.mxu1 %v2207_v29  ;;  %v2324_v23 = vld [vmem:[#allocation15 + $0xd58] sm:$0xff]  ;;  %v2195_v57 = vld [vmem:[#allocation15 + $0x950] sm:$0xff]  ;;  %v2128_v1 = vrot.slane %v2067_v31, 1 }
 0x6ca   :  { %2681 = vmatpush1.msra.mxu0 %v2335_v6  ;;  %2485 = vmatprep.mubr.f32.mxu1 %v6005_v39  ;;  %v2323_v2 = vld [vmem:[#allocation15 + $0xd50] sm:$0xff]  ;;  %v2192_v47 = vld [vmem:[#allocation15 + $0x938] sm:$0xff]  ;;  %v6034_v38 = vsel %vm2095_vm8, %v2123_v44, %v2132_v43 }
 0x6cb   :  { %2574 = vmatprep.mubr.f32.mxu0 %v6008_v7  ;;  %2593 = vmatprep.subr.mxu1 %v2204_v15  ;;  %v2320_v60 = vld [vmem:[#allocation15 + $0xd38] sm:$0xff]  ;;  %v2191_v58 = vld [vmem:[#allocation15 + $0x930] sm:$0xff]  ;;  %v6031_v34 = vsel %vm2095_vm8, %v2117_v41, %v2128_v1 }
 0x6cc   :  { %2682 = vmatprep.subr.mxu0 %v2332_v5  ;;  %2594 = vmatpush1.msra.mxu1 %v2203_v22  ;;  %v2319_v46 = vld [vmem:[#allocation15 + $0xd30] sm:$0xff]  ;;  %v2188_v48 = vld [vmem:[#allocation15 + $0x918] sm:$0xff] }
 0x6cd   :  { %2683 = vmatpush1.msra.mxu0 %v2331_v28  ;;  %2595 = vmatprep.subr.mxu1 %v2200_v20  ;;  %v2316_v62 = vld [vmem:[#allocation15 + $0xd18] sm:$0xff]  ;;  %v2187_v45 = vld [vmem:[#allocation15 + $0x910] sm:$0xff] }
 0x6ce   :  { %2684 = vmatprep.subr.mxu0 %v2328_v3  ;;  %2486 = vmatmul.mubr.f32.gmra.mxu1 %v6015_v37  ;;  %v2315_v36 = vld [vmem:[#allocation15 + $0xd10] sm:$0xff]  ;;  %v2184_v27 = vld [vmem:[#allocation15 + $0x8f8] sm:$0xff] }
 0x6cf   :  { %2575 = vmatmul.mubr.f32.gmra.mxu0 %v6018_v0  ;;  %2596 = vmatpush1.msra.mxu1 %v2199_v51  ;;  %v2312_v59 = vld [vmem:[#allocation15 + $0xcf8] sm:$0xff]  ;;  %v2183_v52 = vld [vmem:[#allocation15 + $0x8f0] sm:$0xff] }
 0x6d0   :  { %2685 = vmatpush1.msra.mxu0 %v2327_v19  ;;  %2491 = vmatprep.mubr.f32.mxu1 %v6023_v25  ;;  %v2311_v53 = vld [vmem:[#allocation15 + $0xcf0] sm:$0xff]  ;;  %v2180_v29 = vld [vmem:[#allocation15 + $0x8d8] sm:$0xff] }
 0x6d1   :  { %2580 = vmatprep.mubr.f32.mxu0 %v6026_v8  ;;  %2597 = vmatprep.subr.mxu1 %v2196_v9  ;;  %v2308_v11 = vld [vmem:[#allocation15 + $0xcd8] sm:$0xff]  ;;  %v2179_v16 = vld [vmem:[#allocation15 + $0x8d0] sm:$0xff] }
 0x6d2   :  { %2686 = vmatprep.subr.mxu0 %v2324_v23  ;;  %2598 = vmatpush1.msra.mxu1 %v2195_v57  ;;  %v2307_v6 = vld [vmem:[#allocation15 + $0xcd0] sm:$0xff]  ;;  %v2176_v32 = vld [vmem:[#allocation15 + $0x8b8] sm:$0xff] }
 0x6d3   :  { %2687 = vmatpush1.msra.mxu0 %v2323_v2  ;;  %2599 = vmatprep.subr.mxu1 %v2192_v47  ;;  %v2304_v40 = vld [vmem:[#allocation15 + $0xcb8] sm:$0xff]  ;;  %v2303_v24 = vld [vmem:[#allocation15 + $0xcb0] sm:$0xff] }
 0x6d4   :  { %2688 = vmatprep.subr.mxu0 %v2320_v60  ;;  %2492 = vmatmul.mubr.f32.gmra.mxu1 %v6031_v34  ;;  %v2300_v21 = vld [vmem:[#allocation15 + $0xc98] sm:$0xff]  ;;  %v2171_v15 = vld [vmem:[#allocation15 + $0x890] sm:$0xff] }
 0x6d5   :  { %2581 = vmatmul.mubr.f32.gmra.mxu0 %v6034_v38  ;;  %2600 = vmatpush1.msra.mxu1 %v2191_v58  ;;  %v2299_v5 = vld [vmem:[#allocation15 + $0xc90] sm:$0xff]  ;;  %v2168_v18 = vld [vmem:[#allocation15 + $0x878] sm:$0xff] }
 0x6d6   :  { %2689 = vmatpush1.msra.mxu0 %v2319_v46  ;;  %2601 = vmatprep.subr.mxu1 %v2188_v48  ;;  %v2296_v17 = vld [vmem:[#allocation15 + $0xc78] sm:$0xff]  ;;  %v2167_v22 = vld [vmem:[#allocation15 + $0x870] sm:$0xff] }
 0x6d7   :  { %2651 = vmatprep.mubr.f32.mxu1 %v5971_v63  ;;  %2690 = vmatprep.subr.mxu0 %v2316_v62  ;;  %v2175_v63 = vld [vmem:[#allocation15 + $0x8b0] sm:$0xff]  ;;  %v2164_v10 = vld [vmem:[#allocation15 + $0x858] sm:$0xff] }
 0x6d8   :  { %2740 = vmatprep.mubr.f32.mxu0 %v5974_v61  ;;  %2602 = vmatpush1.msra.mxu1 %v2187_v45  ;;  %v2172_v61 = vld [vmem:[#allocation15 + $0x898] sm:$0xff]  ;;  %v2295_v28 = vld [vmem:[#allocation15 + $0xc70] sm:$0xff] }
 0x6d9   :  { %2691 = vmatpush1.msra.mxu0 %v2315_v36  ;;  %2603 = vmatprep.subr.mxu1 %v2184_v27  ;;  %v2292_v35 = vld [vmem:[#allocation15 + $0xc58] sm:$0xff]  ;;  %v2163_v20 = vld [vmem:[#allocation15 + $0x850] sm:$0xff] }
 0x6da   :  { %2692 = vmatprep.subr.mxu0 %v2312_v59  ;;  %2604 = vmatpush1.msra.mxu1 %v2183_v52  ;;  %v2291_v3 = vld [vmem:[#allocation15 + $0xc50] sm:$0xff]  ;;  %v2160_v41 = vld [vmem:[#allocation15 + $0x838] sm:$0xff] }
 0x6db   :  { %2693 = vmatpush1.msra.mxu0 %v2311_v53  ;;  %2605 = vmatprep.subr.mxu1 %v2180_v29  ;;  %v2288_v44 = vld [vmem:[#allocation15 + $0xc38] sm:$0xff]  ;;  %v2159_v51 = vld [vmem:[#allocation15 + $0x830] sm:$0xff] }
 0x6dc   :  { %2694 = vmatprep.subr.mxu0 %v2308_v11  ;;  %2606 = vmatpush1.msra.mxu1 %v2179_v16  ;;  %v2287_v54 = vld [vmem:[#allocation15 + $0xc30] sm:$0xff]  ;;  %v2156_v55 = vld [vmem:[#allocation15 + $0x818] sm:$0xff] }
 0x6dd   :  { %2695 = vmatpush1.msra.mxu0 %v2307_v6  ;;  %2607 = vmatprep.subr.mxu1 %v2176_v32  ;;  %v2284_v19 = vld [vmem:[#allocation15 + $0xc18] sm:$0xff]  ;;  %v2155_v31 = vld [vmem:[#allocation15 + $0x810] sm:$0xff] }
 0x6de   :  { %2696 = vmatprep.subr.mxu0 %v2304_v40  ;;  %2608 = vmatpush1.msra.mxu1 %v2175_v63  ;;  %v2283_v30 = vld [vmem:[#allocation15 + $0xc10] sm:$0xff]  ;;  %v2280_v9 = vld [vmem:[#allocation15 + $0xbf8] sm:$0xff] }
 0x6df   :  { %2697 = vmatpush1.msra.mxu0 %v2303_v24  ;;  %2609 = vmatprep.subr.mxu1 %v2172_v61  ;;  %v2408_v23 = vld [vmem:[#allocation15 + $0xff8] sm:$0xff]  ;;  %v2279_v57 = vld [vmem:[#allocation15 + $0xbf0] sm:$0xff] }
 0x6e0   :  { %2698 = vmatprep.subr.mxu0 %v2300_v21  ;;  %2610 = vmatpush1.msra.mxu1 %v2171_v15  ;;  %v2407_v2 = vld [vmem:[#allocation15 + $0xff0] sm:$0xff]  ;;  %v2276_v1 = vld [vmem:[#allocation15 + $0xbd8] sm:$0xff] }
 0x6e1   :  { %2699 = vmatpush1.msra.mxu0 %v2299_v5  ;;  %2611 = vmatprep.subr.mxu1 %v2168_v18  ;;  %v2404_v43 = vld [vmem:[#allocation15 + $0xfd8] sm:$0xff]  ;;  %v2275_v47 = vld [vmem:[#allocation15 + $0xbd0] sm:$0xff] }
 0x6e2   :  { %2700 = vmatprep.subr.mxu0 %v2296_v17  ;;  %2612 = vmatpush1.msra.mxu1 %v2167_v22  ;;  %v2403_v60 = vld [vmem:[#allocation15 + $0xfd0] sm:$0xff]  ;;  %v2272_v58 = vld [vmem:[#allocation15 + $0xbb8] sm:$0xff] }
 0x6e3   :  { %2701 = vmatpush1.msra.mxu0 %v2295_v28  ;;  %2613 = vmatprep.subr.mxu1 %v2164_v10  ;;  %v2400_v46 = vld [vmem:[#allocation15 + $0xfb8] sm:$0xff]  ;;  %v2271_v48 = vld [vmem:[#allocation15 + $0xbb0] sm:$0xff] }
 0x6e4   :  { %2702 = vmatprep.subr.mxu0 %v2292_v35  ;;  %2614 = vmatpush1.msra.mxu1 %v2163_v20  ;;  %v2399_v62 = vld [vmem:[#allocation15 + $0xfb0] sm:$0xff]  ;;  %v2268_v45 = vld [vmem:[#allocation15 + $0xb98] sm:$0xff] }
 0x6e5   :  { %2703 = vmatpush1.msra.mxu0 %v2291_v3  ;;  %2615 = vmatprep.subr.mxu1 %v2160_v41  ;;  %v2396_v36 = vld [vmem:[#allocation15 + $0xf98] sm:$0xff]  ;;  %v2267_v27 = vld [vmem:[#allocation15 + $0xb90] sm:$0xff] }
 0x6e6   :  { %2704 = vmatprep.subr.mxu0 %v2288_v44  ;;  %2616 = vmatpush1.msra.mxu1 %v2159_v51  ;;  %v2395_v59 = vld [vmem:[#allocation15 + $0xf90] sm:$0xff]  ;;  %v2264_v52 = vld [vmem:[#allocation15 + $0xb78] sm:$0xff] }
 0x6e7   :  { %2705 = vmatpush1.msra.mxu0 %v2287_v54  ;;  %2617 = vmatprep.subr.mxu1 %v2156_v55  ;;  %v2392_v53 = vld [vmem:[#allocation15 + $0xf78] sm:$0xff]  ;;  %v2263_v29 = vld [vmem:[#allocation15 + $0xb70] sm:$0xff] }
 0x6e8   :  { %2706 = vmatprep.subr.mxu0 %v2284_v19  ;;  %2618 = vmatpush1.msra.mxu1 %v2155_v31  ;;  %v2391_v11 = vld [vmem:[#allocation15 + $0xf70] sm:$0xff]  ;;  %v2260_v16 = vld [vmem:[#allocation15 + $0xb58] sm:$0xff] }
 0x6e9   :  { %2707 = vmatpush1.msra.mxu0 %v2283_v30  ;;  %2619 = vmatprep.subr.mxu1 %v2280_v9  ;;  %v2388_v6 = vld [vmem:[#allocation15 + $0xf58] sm:$0xff]  ;;  %v2259_v32 = vld [vmem:[#allocation15 + $0xb50] sm:$0xff] }
 0x6ea   :  { %2708 = vmatprep.subr.mxu0 %v2408_v23  ;;  %2620 = vmatpush2.msra.mxu1 %v2279_v57  ;;  %v2387_v40 = vld [vmem:[#allocation15 + $0xf50] sm:$0xff]  ;;  %v2256_v63 = vld [vmem:[#allocation15 + $0xb38] sm:$0xff] }
 0x6eb   :  { %2709 = vmatpush2.msra.mxu0 %v2407_v2  ;;  %2621 = vmatprep.subr.mxu1 %v2276_v1  ;;  %v2384_v24 = vld [vmem:[#allocation15 + $0xf38] sm:$0xff]  ;;  %v2255_v61 = vld [vmem:[#allocation15 + $0xb30] sm:$0xff] }
 0x6ec   :  { %2710 = vmatprep.subr.mxu0 %v2404_v43  ;;  %2622 = vmatpush2.msra.mxu1 %v2275_v47  ;;  %v2383_v21 = vld [vmem:[#allocation15 + $0xf30] sm:$0xff]  ;;  %v2252_v15 = vld [vmem:[#allocation15 + $0xb18] sm:$0xff] }
 0x6ed   :  { %2711 = vmatpush2.msra.mxu0 %v2403_v60  ;;  %2623 = vmatprep.subr.mxu1 %v2272_v58  ;;  %v2380_v5 = vld [vmem:[#allocation15 + $0xf18] sm:$0xff]  ;;  %v2251_v18 = vld [vmem:[#allocation15 + $0xb10] sm:$0xff] }
 0x6ee   :  { %2712 = vmatprep.subr.mxu0 %v2400_v46  ;;  %2624 = vmatpush2.msra.mxu1 %v2271_v48  ;;  %v2379_v17 = vld [vmem:[#allocation15 + $0xf10] sm:$0xff]  ;;  %v2248_v22 = vld [vmem:[#allocation15 + $0xaf8] sm:$0xff] }
 0x6ef   :  { %2713 = vmatpush2.msra.mxu0 %v2399_v62  ;;  %2625 = vmatprep.subr.mxu1 %v2268_v45  ;;  %v2376_v28 = vld [vmem:[#allocation15 + $0xef8] sm:$0xff]  ;;  %v2247_v10 = vld [vmem:[#allocation15 + $0xaf0] sm:$0xff] }
 0x6f0   :  { %2714 = vmatprep.subr.mxu0 %v2396_v36  ;;  %2626 = vmatpush2.msra.mxu1 %v2267_v27  ;;  %v2375_v35 = vld [vmem:[#allocation15 + $0xef0] sm:$0xff]  ;;  %v2244_v20 = vld [vmem:[#allocation15 + $0xad8] sm:$0xff] }
 0x6f1   :  { %2715 = vmatpush2.msra.mxu0 %v2395_v59  ;;  %2627 = vmatprep.subr.mxu1 %v2264_v52  ;;  %v2372_v3 = vld [vmem:[#allocation15 + $0xed8] sm:$0xff]  ;;  %v2243_v41 = vld [vmem:[#allocation15 + $0xad0] sm:$0xff] }
 0x6f2   :  { %2716 = vmatprep.subr.mxu0 %v2392_v53  ;;  %2628 = vmatpush2.msra.mxu1 %v2263_v29  ;;  %v2371_v44 = vld [vmem:[#allocation15 + $0xed0] sm:$0xff]  ;;  %v2240_v51 = vld [vmem:[#allocation15 + $0xab8] sm:$0xff]  ;;  %v1860_v29 = vld [vmem:[#allocation15 + $0x1e8] sm:$0xff] }
 0x6f3   :  { %2717 = vmatpush2.msra.mxu0 %v2391_v11  ;;  %2629 = vmatprep.subr.mxu1 %v2260_v16  ;;  %v2368_v54 = vld [vmem:[#allocation15 + $0xeb8] sm:$0xff]  ;;  %v2239_v55 = vld [vmem:[#allocation15 + $0xab0] sm:$0xff]  ;;  %v1988_v11 = vld [vmem:[#allocation15 + $0x5e8] sm:$0xff] }
 0x6f4   :  { %2718 = vmatprep.subr.mxu0 %v2388_v6  ;;  %2630 = vmatpush2.msra.mxu1 %v2259_v32  ;;  %v2367_v19 = vld [vmem:[#allocation15 + $0xeb0] sm:$0xff]  ;;  %v2236_v31 = vld [vmem:[#allocation15 + $0xa98] sm:$0xff]  ;;  %v1859_v16 = vld [vmem:[#allocation15 + $0x1e0] sm:$0xff] }
 0x6f5   :  { %2719 = vmatpush2.msra.mxu0 %v2387_v40  ;;  %2631 = vmatprep.subr.mxu1 %v2256_v63  ;;  %v2364_v30 = vld [vmem:[#allocation15 + $0xe98] sm:$0xff]  ;;  %v2235_v9 = vld [vmem:[#allocation15 + $0xa90] sm:$0xff]  ;;  %v1987_v6 = vld [vmem:[#allocation15 + $0x5e0] sm:$0xff] }
 0x6f6   :  { %2720 = vmatprep.subr.mxu0 %v2384_v24  ;;  %2632 = vmatpush2.msra.mxu1 %v2255_v61  ;;  %v2363_v23 = vld [vmem:[#allocation15 + $0xe90] sm:$0xff]  ;;  %v2232_v57 = vld [vmem:[#allocation15 + $0xa78] sm:$0xff]  ;;  %v1856_v32 = vld [vmem:[#allocation15 + $0x1c8] sm:$0xff] }
 0x6f7   :  { %2721 = vmatpush2.msra.mxu0 %v2383_v21  ;;  %2633 = vmatprep.subr.mxu1 %v2252_v15  ;;  %v2360_v2 = vld [vmem:[#allocation15 + $0xe78] sm:$0xff]  ;;  %v2231_v1 = vld [vmem:[#allocation15 + $0xa70] sm:$0xff]  ;;  %v1984_v40 = vld [vmem:[#allocation15 + $0x5c8] sm:$0xff] }
 0x6f8   :  { %2722 = vmatprep.subr.mxu0 %v2380_v5  ;;  %2634 = vmatpush2.msra.mxu1 %v2251_v18  ;;  %v2359_v43 = vld [vmem:[#allocation15 + $0xe70] sm:$0xff]  ;;  %v2228_v47 = vld [vmem:[#allocation15 + $0xa58] sm:$0xff]  ;;  %v1855_v63 = vld [vmem:[#allocation15 + $0x1c0] sm:$0xff] }
 0x6f9   :  { %2723 = vmatpush2.msra.mxu0 %v2379_v17  ;;  %2635 = vmatprep.subr.mxu1 %v2248_v22  ;;  %v2356_v60 = vld [vmem:[#allocation15 + $0xe58] sm:$0xff]  ;;  %v2227_v58 = vld [vmem:[#allocation15 + $0xa50] sm:$0xff]  ;;  %v1983_v24 = vld [vmem:[#allocation15 + $0x5c0] sm:$0xff] }
 0x6fa   :  { %2724 = vmatprep.subr.mxu0 %v2376_v28  ;;  %2636 = vmatpush2.msra.mxu1 %v2247_v10  ;;  %v2355_v46 = vld [vmem:[#allocation15 + $0xe50] sm:$0xff]  ;;  %v2224_v48 = vld [vmem:[#allocation15 + $0xa38] sm:$0xff]  ;;  %v1852_v61 = vld [vmem:[#allocation15 + $0x1a8] sm:$0xff] }
 0x6fb   :  { %2725 = vmatpush2.msra.mxu0 %v2375_v35  ;;  %2637 = vmatprep.subr.mxu1 %v2244_v20  ;;  %v2352_v62 = vld [vmem:[#allocation15 + $0xe38] sm:$0xff]  ;;  %v2223_v45 = vld [vmem:[#allocation15 + $0xa30] sm:$0xff]  ;;  %v1979_v21 = vld [vmem:[#allocation15 + $0x5a0] sm:$0xff] }
 0x6fc   :  { %2726 = vmatprep.subr.mxu0 %v2372_v3  ;;  %2638 = vmatpush2.msra.mxu1 %v2243_v41  ;;  %v2351_v36 = vld [vmem:[#allocation15 + $0xe30] sm:$0xff]  ;;  %v2220_v27 = vld [vmem:[#allocation15 + $0xa18] sm:$0xff]  ;;  %v1847_v15 = vld [vmem:[#allocation15 + $0x180] sm:$0xff] }
 0x6fd   :  { %2727 = vmatpush2.msra.mxu0 %v2371_v44  ;;  %2639 = vmatprep.subr.mxu1 %v2240_v51  ;;  %v2348_v59 = vld [vmem:[#allocation15 + $0xe18] sm:$0xff]  ;;  %v2219_v52 = vld [vmem:[#allocation15 + $0xa10] sm:$0xff]  ;;  %v1975_v5 = vld [vmem:[#allocation15 + $0x580] sm:$0xff] }
 0x6fe   :  { %2728 = vmatprep.subr.mxu0 %v2368_v54  ;;  %2640 = vmatpush2.msra.mxu1 %v2239_v55  ;;  %v2347_v53 = vld [vmem:[#allocation15 + $0xe10] sm:$0xff]  ;;  %v1844_v18 = vld [vmem:[#allocation15 + $0x168] sm:$0xff]  ;;  %v1971_v17 = vld [vmem:[#allocation15 + $0x560] sm:$0xff] }
 0x6ff   :  { %2729 = vmatpush2.msra.mxu0 %v2367_v19  ;;  %2641 = vmatprep.subr.mxu1 %v2236_v31  ;;  %v1839_v22 = vld [vmem:[#allocation15 + $0x140] sm:$0xff]  ;;  %v1836_v10 = vld [vmem:[#allocation15 + $0x128] sm:$0xff] }
 0x700   :  { %2730 = vmatprep.subr.mxu0 %v2364_v30  ;;  %2642 = vmatpush2.msra.mxu1 %v2235_v9  ;;  %v1967_v28 = vld [vmem:[#allocation15 + $0x540] sm:$0xff]  ;;  %v1960_v20 = vld [vmem:[#allocation15 + $0x508] sm:$0xff] }
 0x701   :  { %2731 = vmatpush2.msra.mxu0 %v2363_v23  ;;  %2643 = vmatprep.subr.mxu1 %v2232_v57  ;;  %v1963_v35 = vld [vmem:[#allocation15 + $0x520] sm:$0xff]  ;;  %v6057_v3 = vld [vmem:[#allocation2 + $0x18] sm:$0xff] }
 0x702   :  { %2732 = vmatprep.subr.mxu0 %v2360_v2  ;;  %2644 = vmatpush2.msra.mxu1 %v2231_v1  ;;  %v1831_v41 = vld [vmem:[#allocation15 + $0x100] sm:$0xff]  ;;  %v1956_v51 = vld [vmem:[#allocation15 + $0x4e8] sm:$0xff] }
 0x703   :  { %2733 = vmatpush2.msra.mxu0 %v2359_v43  ;;  %2645 = vmatprep.subr.mxu1 %v2228_v47  ;;  %v1959_v44 = vld [vmem:[#allocation15 + $0x500] sm:$0xff]  ;;  %v1824_v55 = vld [vmem:[#allocation15 + $0xc8] sm:$0xff] }
 0x704   :  { %2734 = vmatprep.subr.mxu0 %v2356_v60  ;;  %2646 = vmatpush2.msra.mxu1 %v2227_v58  ;;  %v1955_v54 = vld [vmem:[#allocation15 + $0x4e0] sm:$0xff]  ;;  %v1952_v19 = vld [vmem:[#allocation15 + $0x4c8] sm:$0xff] }
 0x705   :  { %2735 = vmatpush2.msra.mxu0 %v2355_v46  ;;  %2647 = vmatprep.subr.mxu1 %v2224_v48  ;;  %v1823_v31 = vld [vmem:[#allocation15 + $0xc0] sm:$0xff]  ;;  %v1820_v9 = vld [vmem:[#allocation15 + $0xa8] sm:$0xff] }
 0x706   :  { %2736 = vmatprep.subr.mxu0 %v2352_v62  ;;  %2648 = vmatpush2.msra.mxu1 %v2223_v45  ;;  %v1951_v30 = vld [vmem:[#allocation15 + $0x4c0] sm:$0xff]  ;;  %v1948_v23 = vld [vmem:[#allocation15 + $0x4a8] sm:$0xff] }
 0x707   :  { %2737 = vmatpush2.msra.mxu0 %v2351_v36  ;;  %2649 = vmatprep.subr.mxu1 %v2220_v27  ;;  %v1819_v57 = vld [vmem:[#allocation15 + $0xa0] sm:$0xff]  ;;  %v1816_v1 = vld [vmem:[#allocation15 + $0x88] sm:$0xff] }
 0x708   :  { %2738 = vmatprep.subr.mxu0 %v2348_v59  ;;  %2650 = vmatpush2.msra.mxu1 %v2219_v52  ;;  %v1947_v2 = vld [vmem:[#allocation15 + $0x4a0] sm:$0xff]  ;;  %v1944_v43 = vld [vmem:[#allocation15 + $0x488] sm:$0xff] }
 0x709   :  { %2739 = vmatpush2.msra.mxu0 %v2347_v53  ;;  %2652 = vmatmul.mubr.f32.vlgmr.msra.gmra.mxu1 %v5977_v14  ;;  %v1980_v14 = vld [vmem:[#allocation15 + $0x5a8] sm:$0xff]  ;;  %v1815_v47 = vld [vmem:[#allocation15 + $0x80] sm:$0xff] }
 0x70a   :  { %2741 = vmatmul.mubr.f32.vlgmr.msra.gmra.mxu0 %v5982_v42  ;;  %2765 = vmatprep.subr.mxu1 %v1860_v29  ;;  %v1851_v42 = vld [vmem:[#allocation15 + $0x1a0] sm:$0xff]  ;;  %v1812_v58 = vld [vmem:[#allocation15 + $0x68] sm:$0xff] }
 0x70b   :  { %2854 = vmatprep.subr.mxu0 %v1988_v11  ;;  %2657 = vmatprep.mubr.f32.mxu1 %v5987_v50  ;;  %v1848_v50 = vld [vmem:[#allocation15 + $0x188] sm:$0xff]  ;;  %v1943_v60 = vld [vmem:[#allocation15 + $0x480] sm:$0xff] }
 0x70c   :  { %2746 = vmatprep.mubr.f32.mxu0 %v5990_v56  ;;  %2766 = vmatpush1.msra.mxu1 %v1859_v16  ;;  %v1976_v56 = vld [vmem:[#allocation15 + $0x588] sm:$0xff]  ;;  %v1811_v48 = vld [vmem:[#allocation15 + $0x60] sm:$0xff] }
 0x70d   :  { %2855 = vmatpush1.msra.mxu0 %v1987_v6  ;;  %2767 = vmatprep.subr.mxu1 %v1856_v32  ;;  %v1940_v46 = vld [vmem:[#allocation15 + $0x468] sm:$0xff]  ;;  %v1939_v62 = vld [vmem:[#allocation15 + $0x460] sm:$0xff] }
 0x70e   :  { %2856 = vmatprep.subr.mxu0 %v1984_v40  ;;  %2768 = vmatpush1.msra.mxu1 %v1855_v63  ;;  %v1808_v45 = vld [vmem:[#allocation15 + $0x48] sm:$0xff]  ;;  %v1807_v27 = vld [vmem:[#allocation15 + $0x40] sm:$0xff] }
 0x70f   :  { %2857 = vmatpush1.msra.mxu0 %v1983_v24  ;;  %2658 = vmatmul.mubr.f32.gmra.mxu1 %v5995_v4  ;;  %v1972_v4 = vld [vmem:[#allocation15 + $0x568] sm:$0xff]  ;;  %v1935_v59 = vld [vmem:[#allocation15 + $0x440] sm:$0xff] }
 0x710   :  { %2747 = vmatmul.mubr.f32.gmra.mxu0 %v5998_v26  ;;  %2769 = vmatprep.subr.mxu1 %v1852_v61  ;;  %v1843_v26 = vld [vmem:[#allocation15 + $0x160] sm:$0xff]  ;;  %v1936_v36 = vld [vmem:[#allocation15 + $0x448] sm:$0xff] }
 0x711   :  { %2858 = vmatprep.subr.mxu0 %v1980_v14  ;;  %2663 = vmatprep.mubr.f32.mxu1 %v6005_v39  ;;  %v1840_v39 = vld [vmem:[#allocation15 + $0x148] sm:$0xff]  ;;  %v1803_v29 = vld [vmem:[#allocation15 + $0x20] sm:$0xff] }
 0x712   :  { %2752 = vmatprep.mubr.f32.mxu0 %v6008_v7  ;;  %2770 = vmatpush1.msra.mxu1 %v1851_v42  ;;  %v1968_v7 = vld [vmem:[#allocation15 + $0x548] sm:$0xff]  ;;  %v1931_v11 = vld [vmem:[#allocation15 + $0x420] sm:$0xff] }
 0x713   :  { %2859 = vmatpush1.msra.mxu0 %v1979_v21  ;;  %2771 = vmatprep.subr.mxu1 %v1848_v50  ;;  %v1804_v52 = vld [vmem:[#allocation15 + $0x28] sm:$0xff]  ;;  %v1799_v32 = vld [vmem:[#allocation15] sm:$0xff] }
 0x714   :  { %2860 = vmatprep.subr.mxu0 %v1976_v56  ;;  %2772 = vmatpush1.msra.mxu1 %v1847_v15  ;;  %v1932_v53 = vld [vmem:[#allocation15 + $0x428] sm:$0xff]  ;;  %v1927_v40 = vld [vmem:[#allocation15 + $0x400] sm:$0xff] }
 0x715   :  { %2861 = vmatpush1.msra.mxu0 %v1975_v5  ;;  %2664 = vmatmul.mubr.f32.gmra.mxu1 %v6015_v37  ;;  %v1964_v37 = vld [vmem:[#allocation15 + $0x528] sm:$0xff]  ;;  %v1923_v61 = vld [vmem:[#allocation15 + $0x3e0] sm:$0xff] }
 0x716   :  { %2753 = vmatmul.mubr.f32.gmra.mxu0 %v6018_v0  ;;  %2773 = vmatprep.subr.mxu1 %v1844_v18  ;;  %v1835_v0 = vld [vmem:[#allocation15 + $0x120] sm:$0xff]  ;;  %v1800_v16 = vld [vmem:[#allocation15 + $0x8] sm:$0xff] }
 0x717   :  { %2862 = vmatprep.subr.mxu0 %v1972_v4  ;;  %2669 = vmatprep.mubr.f32.mxu1 %v6023_v25  ;;  %v6054_v25 = vld [vmem:[#allocation2 + $0x8] sm:$0xff]  ;;  %v1928_v6 = vld [vmem:[#allocation15 + $0x408] sm:$0xff] }
 0x718   :  { %2758 = vmatprep.mubr.f32.mxu0 %v6026_v8  ;;  %2774 = vmatpush1.msra.mxu1 %v1843_v26  ;;  %v1832_v8 = vld [vmem:[#allocation15 + $0x108] sm:$0xff]  ;;  %v2051_v14 = vld [vmem:[#allocation15 + $0x7e0] sm:$0xff] }
 0x719   :  { %2863 = vmatpush1.msra.mxu0 %v1971_v17  ;;  %2775 = vmatprep.subr.mxu1 %v1840_v39  ;;  %v1924_v63 = vld [vmem:[#allocation15 + $0x3e8] sm:$0xff]  ;;  %v1919_v50 = vld [vmem:[#allocation15 + $0x3c0] sm:$0xff] }
 0x71a   :  { %2864 = vmatprep.subr.mxu0 %v1968_v7  ;;  %2776 = vmatpush1.msra.mxu1 %v1839_v22  ;;  %v2052_v24 = vld [vmem:[#allocation15 + $0x7e8] sm:$0xff]  ;;  %v2047_v56 = vld [vmem:[#allocation15 + $0x7c0] sm:$0xff] }
 0x71b   :  { %2865 = vmatpush1.msra.mxu0 %v1967_v28  ;;  %2670 = vmatmul.mubr.f32.gmra.mxu1 %v6031_v34  ;;  %v1828_v34 = vld [vmem:[#allocation15 + $0xe8] sm:$0xff]  ;;  %v1915_v18 = vld [vmem:[#allocation15 + $0x3a0] sm:$0xff] }
 0x71c   :  { %2759 = vmatmul.mubr.f32.gmra.mxu0 %v6034_v38  ;;  %2777 = vmatprep.subr.mxu1 %v1836_v10  ;;  %v1827_v38 = vld [vmem:[#allocation15 + $0xe0] sm:$0xff]  ;;  %v1920_v42 = vld [vmem:[#allocation15 + $0x3c8] sm:$0xff] }
 0x71d   :  { %2866 = vmatprep.subr.mxu0 %v1964_v37  ;;  %2778 = vmatpush1.msra.mxu1 %v1835_v0  ;;  %v2048_v21 = vld [vmem:[#allocation15 + $0x7c8] sm:$0xff]  ;;  %v2043_v4 = vld [vmem:[#allocation15 + $0x7a0] sm:$0xff] }
 0x71e   :  { %2829 = vmatprep.mubr.f32.mxu1 %v6054_v25  ;;  %2867 = vmatpush1.msra.mxu0 %v1963_v35  ;;  %v1916_v15 = vld [vmem:[#allocation15 + $0x3a8] sm:$0xff]  ;;  %v1911_v39 = vld [vmem:[#allocation15 + $0x380] sm:$0xff] }
 0x71f   :  { %2918 = vmatprep.mubr.f32.mxu0 %v6057_v3  ;;  %2779 = vmatprep.subr.mxu1 %v1832_v8  ;;  %v2044_v5 = vld [vmem:[#allocation15 + $0x7a8] sm:$0xff]  ;;  %v2039_v7 = vld [vmem:[#allocation15 + $0x780] sm:$0xff] }
 0x720   :  { %2868 = vmatprep.subr.mxu0 %v1960_v20  ;;  %2780 = vmatpush1.msra.mxu1 %v1831_v41  ;;  %v1912_v26 = vld [vmem:[#allocation15 + $0x388] sm:$0xff]  ;;  %v1907_v10 = vld [vmem:[#allocation15 + $0x360] sm:$0xff] }
 0x721   :  { %2869 = vmatpush1.msra.mxu0 %v1959_v44  ;;  %2781 = vmatprep.subr.mxu1 %v1828_v34  ;;  %v2040_v17 = vld [vmem:[#allocation15 + $0x788] sm:$0xff]  ;;  %v2035_v37 = vld [vmem:[#allocation15 + $0x760] sm:$0xff] }
 0x722   :  { %2870 = vmatprep.subr.mxu0 %v1956_v51  ;;  %2782 = vmatpush1.msra.mxu1 %v1827_v38  ;;  %v1908_v22 = vld [vmem:[#allocation15 + $0x368] sm:$0xff]  ;;  %v1903_v8 = vld [vmem:[#allocation15 + $0x340] sm:$0xff] }
 0x723   :  { %2871 = vmatpush1.msra.mxu0 %v1955_v54  ;;  %2783 = vmatprep.subr.mxu1 %v1824_v55  ;;  %v2036_v28 = vld [vmem:[#allocation15 + $0x768] sm:$0xff]  ;;  %v2031_v20 = vld [vmem:[#allocation15 + $0x740] sm:$0xff] }
 0x724   :  { %2872 = vmatprep.subr.mxu0 %v1952_v19  ;;  %2784 = vmatpush1.msra.mxu1 %v1823_v31  ;;  %v1904_v0 = vld [vmem:[#allocation15 + $0x348] sm:$0xff]  ;;  %v1899_v34 = vld [vmem:[#allocation15 + $0x320] sm:$0xff] }
 0x725   :  { %2873 = vmatpush1.msra.mxu0 %v1951_v30  ;;  %2785 = vmatprep.subr.mxu1 %v1820_v9  ;;  %v2032_v35 = vld [vmem:[#allocation15 + $0x748] sm:$0xff]  ;;  %v2027_v51 = vld [vmem:[#allocation15 + $0x720] sm:$0xff] }
 0x726   :  { %2874 = vmatprep.subr.mxu0 %v1948_v23  ;;  %2786 = vmatpush1.msra.mxu1 %v1819_v57  ;;  %v1900_v41 = vld [vmem:[#allocation15 + $0x328] sm:$0xff]  ;;  %v1895_v55 = vld [vmem:[#allocation15 + $0x300] sm:$0xff] }
 0x727   :  { %2875 = vmatpush1.msra.mxu0 %v1947_v2  ;;  %2787 = vmatprep.subr.mxu1 %v1816_v1  ;;  %v2028_v44 = vld [vmem:[#allocation15 + $0x728] sm:$0xff]  ;;  %v2023_v19 = vld [vmem:[#allocation15 + $0x700] sm:$0xff] }
 0x728   :  { %2876 = vmatprep.subr.mxu0 %v1944_v43  ;;  %2788 = vmatpush1.msra.mxu1 %v1815_v47  ;;  %v1896_v38 = vld [vmem:[#allocation15 + $0x308] sm:$0xff]  ;;  %v1891_v9 = vld [vmem:[#allocation15 + $0x2e0] sm:$0xff] }
 0x729   :  { %2877 = vmatpush1.msra.mxu0 %v1943_v60  ;;  %2789 = vmatprep.subr.mxu1 %v1812_v58  ;;  %v2024_v54 = vld [vmem:[#allocation15 + $0x708] sm:$0xff]  ;;  %v2019_v23 = vld [vmem:[#allocation15 + $0x6e0] sm:$0xff] }
 0x72a   :  { %2878 = vmatprep.subr.mxu0 %v1940_v46  ;;  %2790 = vmatpush1.msra.mxu1 %v1811_v48  ;;  %v1892_v31 = vld [vmem:[#allocation15 + $0x2e8] sm:$0xff]  ;;  %v1887_v1 = vld [vmem:[#allocation15 + $0x2c0] sm:$0xff] }
 0x72b   :  { %2879 = vmatpush1.msra.mxu0 %v1939_v62  ;;  %2791 = vmatprep.subr.mxu1 %v1808_v45  ;;  %v2020_v30 = vld [vmem:[#allocation15 + $0x6e8] sm:$0xff]  ;;  %v2015_v43 = vld [vmem:[#allocation15 + $0x6c0] sm:$0xff] }
 0x72c   :  { %2880 = vmatprep.subr.mxu0 %v1936_v36  ;;  %2792 = vmatpush1.msra.mxu1 %v1807_v27  ;;  %v1888_v57 = vld [vmem:[#allocation15 + $0x2c8] sm:$0xff]  ;;  %v1883_v58 = vld [vmem:[#allocation15 + $0x2a0] sm:$0xff] }
 0x72d   :  { %2881 = vmatpush1.msra.mxu0 %v1935_v59  ;;  %2793 = vmatprep.subr.mxu1 %v1804_v52  ;;  %v2016_v2 = vld [vmem:[#allocation15 + $0x6c8] sm:$0xff]  ;;  %v2011_v46 = vld [vmem:[#allocation15 + $0x6a0] sm:$0xff] }
 0x72e   :  { %2882 = vmatprep.subr.mxu0 %v1932_v53  ;;  %2794 = vmatpush1.msra.mxu1 %v1803_v29  ;;  %v1884_v47 = vld [vmem:[#allocation15 + $0x2a8] sm:$0xff]  ;;  %v1879_v45 = vld [vmem:[#allocation15 + $0x280] sm:$0xff] }
 0x72f   :  { %2883 = vmatpush1.msra.mxu0 %v1931_v11  ;;  %2795 = vmatprep.subr.mxu1 %v1800_v16  ;;  %v2012_v60 = vld [vmem:[#allocation15 + $0x6a8] sm:$0xff]  ;;  %v2007_v36 = vld [vmem:[#allocation15 + $0x680] sm:$0xff] }
 0x730   :  { %2884 = vmatprep.subr.mxu0 %v1928_v6  ;;  %2796 = vmatpush1.msra.mxu1 %v1799_v32  ;;  %v1880_v48 = vld [vmem:[#allocation15 + $0x288] sm:$0xff]  ;;  %v1875_v52 = vld [vmem:[#allocation15 + $0x260] sm:$0xff] }
 0x731   :  { %2885 = vmatpush1.msra.mxu0 %v1927_v40  ;;  %2797 = vmatprep.subr.mxu1 %v1924_v63  ;;  %v2008_v62 = vld [vmem:[#allocation15 + $0x688] sm:$0xff]  ;;  %v2003_v53 = vld [vmem:[#allocation15 + $0x660] sm:$0xff] }
 0x732   :  { %2886 = vmatprep.subr.mxu0 %v2052_v24  ;;  %2798 = vmatpush2.msra.mxu1 %v1923_v61  ;;  %v1876_v27 = vld [vmem:[#allocation15 + $0x268] sm:$0xff]  ;;  %v1871_v16 = vld [vmem:[#allocation15 + $0x240] sm:$0xff] }
 0x733   :  { %2887 = vmatpush2.msra.mxu0 %v2051_v14  ;;  %2799 = vmatprep.subr.mxu1 %v1920_v42  ;;  %v2004_v59 = vld [vmem:[#allocation15 + $0x668] sm:$0xff]  ;;  %v1999_v6 = vld [vmem:[#allocation15 + $0x640] sm:$0xff] }
 0x734   :  { %2888 = vmatprep.subr.mxu0 %v2048_v21  ;;  %2800 = vmatpush2.msra.mxu1 %v1919_v50  ;;  %v1872_v29 = vld [vmem:[#allocation15 + $0x248] sm:$0xff]  ;;  %v1867_v63 = vld [vmem:[#allocation15 + $0x220] sm:$0xff]  ;;  %v1862_v50 = vld [vmem:[#allocation15 + $0x1f8] sm:$0xff] }
 0x735   :  { %2889 = vmatpush2.msra.mxu0 %v2047_v56  ;;  %2801 = vmatprep.subr.mxu1 %v1916_v15  ;;  %v2000_v11 = vld [vmem:[#allocation15 + $0x648] sm:$0xff]  ;;  %v1995_v24 = vld [vmem:[#allocation15 + $0x620] sm:$0xff]  ;;  %v1990_v56 = vld [vmem:[#allocation15 + $0x5f8] sm:$0xff] }
 0x736   :  { %2890 = vmatprep.subr.mxu0 %v2044_v5  ;;  %2802 = vmatpush2.msra.mxu1 %v1915_v18  ;;  %v1868_v32 = vld [vmem:[#allocation15 + $0x228] sm:$0xff]  ;;  %v1863_v42 = vld [vmem:[#allocation15 + $0x200] sm:$0xff]  ;;  %v6060_v15 = vld [vmem:[#allocation2] sm:$0xff] }
 0x737   :  { %2891 = vmatpush2.msra.mxu0 %v2043_v4  ;;  %2803 = vmatprep.subr.mxu1 %v1912_v26  ;;  %v1996_v40 = vld [vmem:[#allocation15 + $0x628] sm:$0xff]  ;;  %v1991_v21 = vld [vmem:[#allocation15 + $0x600] sm:$0xff]  ;;  %v1861_v18 = vld [vmem:[#allocation15 + $0x1f0] sm:$0xff] }
 0x738   :  { %2892 = vmatprep.subr.mxu0 %v2040_v17  ;;  %2804 = vmatpush2.msra.mxu1 %v1911_v39  ;;  %v1864_v61 = vld [vmem:[#allocation15 + $0x208] sm:$0xff]  ;;  %v1989_v4 = vld [vmem:[#allocation15 + $0x5f0] sm:$0xff]  ;;  %v1858_v26 = vld [vmem:[#allocation15 + $0x1d8] sm:$0xff] }
 0x739   :  { %2893 = vmatpush2.msra.mxu0 %v2039_v7  ;;  %2805 = vmatprep.subr.mxu1 %v1908_v22  ;;  %v1992_v14 = vld [vmem:[#allocation15 + $0x608] sm:$0xff]  ;;  %v1986_v17 = vld [vmem:[#allocation15 + $0x5d8] sm:$0xff]  ;;  %v1857_v22 = vld [vmem:[#allocation15 + $0x1d0] sm:$0xff] }
 0x73a   :  { %2894 = vmatprep.subr.mxu0 %v2036_v28  ;;  %2806 = vmatpush2.msra.mxu1 %v1907_v10  ;;  %v6062_v5 = vld [vmem:[#allocation2 + $0x10] sm:$0xff]  ;;  %v6066_v39 = vld [vmem:[#allocation2 + $0x28] sm:$0xff]  ;;  %v6069_v7 = vld [vmem:[#allocation2 + $0x38] sm:$0xff] }
 0x73b   :  { %2895 = vmatpush2.msra.mxu0 %v2035_v37  ;;  %2807 = vmatprep.subr.mxu1 %v1904_v0  ;;  %v1985_v28 = vld [vmem:[#allocation15 + $0x5d0] sm:$0xff]  ;;  %v1854_v10 = vld [vmem:[#allocation15 + $0x1b8] sm:$0xff] }
 0x73c   :  { %2896 = vmatprep.subr.mxu0 %v2032_v35  ;;  %2808 = vmatpush2.msra.mxu1 %v1903_v8  ;;  %v1982_v37 = vld [vmem:[#allocation15 + $0x5b8] sm:$0xff]  ;;  %v6075_v35 = vld [vmem:[#allocation2 + $0x30] sm:$0xff] }
 0x73d   :  { %2897 = vmatpush2.msra.mxu0 %v2031_v20  ;;  %2809 = vmatprep.subr.mxu1 %v1900_v41  ;;  %v6072_v0 = vld [vmem:[#allocation2 + $0x20] sm:$0xff]  ;;  %v6078_v8 = vld [vmem:[#allocation2 + $0x68] sm:$0xff] }
 0x73e   :  { %2898 = vmatprep.subr.mxu0 %v2028_v44  ;;  %2810 = vmatpush2.msra.mxu1 %v1899_v34  ;;  %v1853_v20 = vld [vmem:[#allocation15 + $0x1b0] sm:$0xff]  ;;  %v1850_v34 = vld [vmem:[#allocation15 + $0x198] sm:$0xff] }
 0x73f   :  { %2899 = vmatpush2.msra.mxu0 %v2027_v51  ;;  %2811 = vmatprep.subr.mxu1 %v1896_v38  ;;  %v1981_v41 = vld [vmem:[#allocation15 + $0x5b0] sm:$0xff]  ;;  %v1978_v51 = vld [vmem:[#allocation15 + $0x598] sm:$0xff] }
 0x740   :  { %2900 = vmatprep.subr.mxu0 %v2024_v54  ;;  %2812 = vmatpush2.msra.mxu1 %v1895_v55  ;;  %v6080_v44 = vld [vmem:[#allocation2 + $0x78] sm:$0xff]  ;;  %v1846_v55 = vld [vmem:[#allocation15 + $0x178] sm:$0xff] }
 0x741   :  { %2901 = vmatpush2.msra.mxu0 %v2023_v19  ;;  %2813 = vmatprep.subr.mxu1 %v1892_v31  ;;  %v1849_v38 = vld [vmem:[#allocation15 + $0x190] sm:$0xff]  ;;  %v1974_v19 = vld [vmem:[#allocation15 + $0x578] sm:$0xff] }
 0x742   :  { %2902 = vmatprep.subr.mxu0 %v2020_v30  ;;  %2814 = vmatpush2.msra.mxu1 %v1891_v9  ;;  %v1977_v54 = vld [vmem:[#allocation15 + $0x590] sm:$0xff]  ;;  %v6086_v30 = vld [vmem:[#allocation2 + $0x70] sm:$0xff] }
 0x743   :  { %2903 = vmatpush2.msra.mxu0 %v2019_v23  ;;  %2815 = vmatprep.subr.mxu1 %v1888_v57  ;;  %v6084_v31 = vld [vmem:[#allocation2 + $0x60] sm:$0xff] }
 0x744   :  { %2904 = vmatprep.subr.mxu0 %v2016_v2  ;;  %2816 = vmatpush2.msra.mxu1 %v1887_v1  ;;  %v1845_v9 = vld [vmem:[#allocation15 + $0x170] sm:$0xff]  ;;  %v1842_v57 = vld [vmem:[#allocation15 + $0x158] sm:$0xff] }
 0x745   :  { %2905 = vmatpush2.msra.mxu0 %v2015_v43  ;;  %2817 = vmatprep.subr.mxu1 %v1884_v47  ;;  %v1973_v23 = vld [vmem:[#allocation15 + $0x570] sm:$0xff]  ;;  %v1970_v2 = vld [vmem:[#allocation15 + $0x558] sm:$0xff] }
 0x746   :  { %2906 = vmatprep.subr.mxu0 %v2012_v60  ;;  %2818 = vmatpush2.msra.mxu1 %v1883_v58  ;;  %v6090_v1 = vld [vmem:[#allocation2 + $0x88] sm:$0xff]  ;;  %v6093_v43 = vld [vmem:[#allocation2 + $0x98] sm:$0xff] }
 0x747   :  { %2907 = vmatpush2.msra.mxu0 %v2011_v46  ;;  %2819 = vmatprep.subr.mxu1 %v1880_v48  ;;  %v1841_v47 = vld [vmem:[#allocation15 + $0x150] sm:$0xff]  ;;  %v1838_v58 = vld [vmem:[#allocation15 + $0x138] sm:$0xff] }
 0x748   :  { %2908 = vmatprep.subr.mxu0 %v2008_v62  ;;  %2820 = vmatpush2.msra.mxu1 %v1879_v45  ;;  %v1969_v60 = vld [vmem:[#allocation15 + $0x550] sm:$0xff]  ;;  %v1966_v46 = vld [vmem:[#allocation15 + $0x538] sm:$0xff]  ;;  %v6099_v45 = vld [vmem:[#allocation2 + $0x90] sm:$0xff] }
 0x749   :  { %2909 = vmatpush2.msra.mxu0 %v2007_v36  ;;  %2821 = vmatprep.subr.mxu1 %v1876_v27  ;;  %v1837_v48 = vld [vmem:[#allocation15 + $0x130] sm:$0xff]  ;;  %v1834_v27 = vld [vmem:[#allocation15 + $0x118] sm:$0xff] }
 0x74a   :  { %2910 = vmatprep.subr.mxu0 %v2004_v59  ;;  %2822 = vmatpush2.msra.mxu1 %v1875_v52  ;;  %v6096_v62 = vld [vmem:[#allocation2 + $0x80] sm:$0xff] }
 0x74b   :  { %2911 = vmatpush2.msra.mxu0 %v2003_v53  ;;  %2823 = vmatprep.subr.mxu1 %v1872_v29  ;;  %v1965_v36 = vld [vmem:[#allocation15 + $0x530] sm:$0xff]  ;;  %v1962_v59 = vld [vmem:[#allocation15 + $0x518] sm:$0xff] }
 0x74c   :  { %2912 = vmatprep.subr.mxu0 %v2000_v11  ;;  %2824 = vmatpush2.msra.mxu1 %v1871_v16  ;;  %v1833_v52 = vld [vmem:[#allocation15 + $0x110] sm:$0xff]  ;;  %v1830_v29 = vld [vmem:[#allocation15 + $0xf8] sm:$0xff] }
 0x74d   :  { %2913 = vmatpush2.msra.mxu0 %v1999_v6  ;;  %2825 = vmatprep.subr.mxu1 %v1868_v32  ;;  %v1961_v53 = vld [vmem:[#allocation15 + $0x510] sm:$0xff]  ;;  %v1958_v11 = vld [vmem:[#allocation15 + $0x4f8] sm:$0xff] }
 0x74e   :  { %2914 = vmatprep.subr.mxu0 %v1996_v40  ;;  %2826 = vmatpush2.msra.mxu1 %v1867_v63  ;;  %v1829_v16 = vld [vmem:[#allocation15 + $0xf0] sm:$0xff]  ;;  %v1826_v32 = vld [vmem:[#allocation15 + $0xd8] sm:$0xff] }
 0x74f   :  { %2915 = vmatpush2.msra.mxu0 %v1995_v24  ;;  %2827 = vmatprep.subr.mxu1 %v1864_v61  ;;  %v1957_v6 = vld [vmem:[#allocation15 + $0x4f0] sm:$0xff]  ;;  %v1954_v40 = vld [vmem:[#allocation15 + $0x4d8] sm:$0xff] }
 0x750   :  { %2916 = vmatprep.subr.mxu0 %v1992_v14  ;;  %2828 = vmatpush2.msra.mxu1 %v1863_v42  ;;  %v1825_v63 = vld [vmem:[#allocation15 + $0xd0] sm:$0xff]  ;;  %v1950_v61 = vld [vmem:[#allocation15 + $0x4b8] sm:$0xff] }
 0x751   :  { %2917 = vmatpush2.msra.mxu0 %v1991_v21  ;;  %2830 = vmatmul.mubr.f32.vlgmr.msra.gmra.mxu1 %v6060_v15  ;;  %v1953_v24 = vld [vmem:[#allocation15 + $0x4d0] sm:$0xff]  ;;  %v1818_v42 = vld [vmem:[#allocation15 + $0x98] sm:$0xff] }
 0x752   :  { %2919 = vmatmul.mubr.f32.vlgmr.msra.gmra.mxu0 %v6062_v5  ;;  %2943 = vmatprep.subr.mxu1 %v1862_v50  ;;  %v1949_v14 = vld [vmem:[#allocation15 + $0x4b0] sm:$0xff]  ;;  %v1946_v21 = vld [vmem:[#allocation15 + $0x498] sm:$0xff] }
 0x753   :  { %3032 = vmatprep.subr.mxu0 %v1990_v56  ;;  %2835 = vmatprep.mubr.f32.mxu1 %v6066_v39  ;;  %v1817_v50 = vld [vmem:[#allocation15 + $0x90] sm:$0xff] }
 0x754   :  { %2924 = vmatprep.mubr.f32.mxu0 %v6069_v7  ;;  %2944 = vmatpush1.msra.mxu1 %v1861_v18  ;;  %v1945_v56 = vld [vmem:[#allocation15 + $0x490] sm:$0xff]  ;;  %v1814_v18 = vld [vmem:[#allocation15 + $0x78] sm:$0xff] }
 0x755   :  { %3033 = vmatpush1.msra.mxu0 %v1989_v4  ;;  %2945 = vmatprep.subr.mxu1 %v1858_v26  ;;  %v1942_v4 = vld [vmem:[#allocation15 + $0x478] sm:$0xff]  ;;  %v1813_v26 = vld [vmem:[#allocation15 + $0x70] sm:$0xff] }
 0x756   :  { %3034 = vmatprep.subr.mxu0 %v1986_v17  ;;  %2946 = vmatpush1.msra.mxu1 %v1857_v22  ;;  %v1941_v17 = vld [vmem:[#allocation15 + $0x470] sm:$0xff]  ;;  %v1810_v22 = vld [vmem:[#allocation15 + $0x58] sm:$0xff] }
 0x757   :  { %3035 = vmatpush1.msra.mxu0 %v1985_v28  ;;  %2836 = vmatmul.mubr.f32.gmra.mxu1 %v6072_v0  ;;  %v1938_v28 = vld [vmem:[#allocation15 + $0x458] sm:$0xff] }
 0x758   :  { %2925 = vmatmul.mubr.f32.gmra.mxu0 %v6075_v35  ;;  %2947 = vmatprep.subr.mxu1 %v1854_v10  ;;  %v1809_v10 = vld [vmem:[#allocation15 + $0x50] sm:$0xff] }
 0x759   :  { %3036 = vmatprep.subr.mxu0 %v1982_v37  ;;  %2841 = vmatprep.mubr.f32.mxu1 %v6078_v8  ;;  %v1937_v37 = vld [vmem:[#allocation15 + $0x450] sm:$0xff] }
 0x75a   :  { %2930 = vmatprep.mubr.f32.mxu0 %v6080_v44  ;;  %2948 = vmatpush1.msra.mxu1 %v1853_v20  ;;  %v1806_v20 = vld [vmem:[#allocation15 + $0x38] sm:$0xff] }
 0x75b   :  { %3037 = vmatpush1.msra.mxu0 %v1981_v41  ;;  %2949 = vmatprep.subr.mxu1 %v1850_v34  ;;  %v1934_v41 = vld [vmem:[#allocation15 + $0x438] sm:$0xff]  ;;  %v1805_v34 = vld [vmem:[#allocation15 + $0x30] sm:$0xff] }
 0x75c   :  { %3038 = vmatprep.subr.mxu0 %v1978_v51  ;;  %2950 = vmatpush1.msra.mxu1 %v1849_v38  ;;  %v1933_v51 = vld [vmem:[#allocation15 + $0x430] sm:$0xff]  ;;  %v1802_v38 = vld [vmem:[#allocation15 + $0x18] sm:$0xff] }
 0x75d   :  { %3039 = vmatpush1.msra.mxu0 %v1977_v54  ;;  %2842 = vmatmul.mubr.f32.gmra.mxu1 %v6084_v31  ;;  %v1930_v54 = vld [vmem:[#allocation15 + $0x418] sm:$0xff] }
 0x75e   :  { %2931 = vmatmul.mubr.f32.gmra.mxu0 %v6086_v30  ;;  %2951 = vmatprep.subr.mxu1 %v1846_v55  ;;  %v1801_v55 = vld [vmem:[#allocation15 + $0x10] sm:$0xff] }
 0x75f   :  { %3040 = vmatprep.subr.mxu0 %v1974_v19  ;;  %2847 = vmatprep.mubr.f32.mxu1 %v6090_v1  ;;  %v1929_v19 = vld [vmem:[#allocation15 + $0x410] sm:$0xff] }
 0x760   :  { %2936 = vmatprep.mubr.f32.mxu0 %v6093_v43  ;;  %2952 = vmatpush1.msra.mxu1 %v1845_v9  ;;  %v1926_v9 = vld [vmem:[#allocation15 + $0x3f8] sm:$0xff] }
 0x761   :  { %3041 = vmatpush1.msra.mxu0 %v1973_v23  ;;  %2953 = vmatprep.subr.mxu1 %v1842_v57  ;;  %v2054_v23 = vld [vmem:[#allocation15 + $0x7f8] sm:$0xff]  ;;  %v1925_v57 = vld [vmem:[#allocation15 + $0x3f0] sm:$0xff] }
 0x762   :  { %3042 = vmatprep.subr.mxu0 %v1970_v2  ;;  %2954 = vmatpush1.msra.mxu1 %v1841_v47  ;;  %v2053_v2 = vld [vmem:[#allocation15 + $0x7f0] sm:$0xff]  ;;  %v1922_v47 = vld [vmem:[#allocation15 + $0x3d8] sm:$0xff] }
 0x763   :  { %3043 = vmatpush1.msra.mxu0 %v1969_v60  ;;  %2848 = vmatmul.mubr.f32.gmra.mxu1 %v6096_v62  ;;  %v2050_v60 = vld [vmem:[#allocation15 + $0x7d8] sm:$0xff] }
 0x764   :  { %2937 = vmatmul.mubr.f32.gmra.mxu0 %v6099_v45  ;;  %2955 = vmatprep.subr.mxu1 %v1838_v58  ;;  %v1921_v58 = vld [vmem:[#allocation15 + $0x3d0] sm:$0xff] }
 0x765   :  { %3044 = vmatprep.subr.mxu0 %v1966_v46  ;;  %2956 = vmatpush1.msra.mxu1 %v1837_v48  ;;  %v2049_v46 = vld [vmem:[#allocation15 + $0x7d0] sm:$0xff]  ;;  %v1918_v48 = vld [vmem:[#allocation15 + $0x3b8] sm:$0xff] }
 0x766   :  { %3007 = vmatprep.mubr.f32.mxu1 %v6054_v25  ;;  %3045 = vmatpush1.msra.mxu0 %v1965_v36  ;;  %v1822_v25 = vld [vmem:[#allocation15 + $0xb8] sm:$0xff] }
 0x767   :  { %3096 = vmatprep.mubr.f32.mxu0 %v6057_v3  ;;  %2957 = vmatprep.subr.mxu1 %v1834_v27  ;;  %v1821_v3 = vld [vmem:[#allocation15 + $0xb0] sm:$0xff]  ;;  %v2046_v36 = vld [vmem:[#allocation15 + $0x7b8] sm:$0xff] }
 0x768   :  { %3046 = vmatprep.subr.mxu0 %v1962_v59  ;;  %2958 = vmatpush1.msra.mxu1 %v1833_v52  ;;  %v1917_v27 = vld [vmem:[#allocation15 + $0x3b0] sm:$0xff]  ;;  %v1914_v52 = vld [vmem:[#allocation15 + $0x398] sm:$0xff] }
 0x769   :  { %3047 = vmatpush1.msra.mxu0 %v1961_v53  ;;  %2959 = vmatprep.subr.mxu1 %v1830_v29  ;;  %v2045_v59 = vld [vmem:[#allocation15 + $0x7b0] sm:$0xff]  ;;  %v2042_v53 = vld [vmem:[#allocation15 + $0x798] sm:$0xff] }
 0x76a   :  { %3048 = vmatprep.subr.mxu0 %v1958_v11  ;;  %2960 = vmatpush1.msra.mxu1 %v1829_v16  ;;  %v1913_v29 = vld [vmem:[#allocation15 + $0x390] sm:$0xff]  ;;  %v1910_v16 = vld [vmem:[#allocation15 + $0x378] sm:$0xff] }
 0x76b   :  { %3049 = vmatpush1.msra.mxu0 %v1957_v6  ;;  %2961 = vmatprep.subr.mxu1 %v1826_v32  ;;  %v2041_v11 = vld [vmem:[#allocation15 + $0x790] sm:$0xff]  ;;  %v2038_v6 = vld [vmem:[#allocation15 + $0x778] sm:$0xff] }
 0x76c   :  { %3050 = vmatprep.subr.mxu0 %v1954_v40  ;;  %2962 = vmatpush1.msra.mxu1 %v1825_v63  ;;  %v1909_v32 = vld [vmem:[#allocation15 + $0x370] sm:$0xff]  ;;  %v1906_v63 = vld [vmem:[#allocation15 + $0x358] sm:$0xff] }
 0x76d   :  { %3051 = vmatpush1.msra.mxu0 %v1953_v24  ;;  %2963 = vmatprep.subr.mxu1 %v1822_v25  ;;  %v2037_v40 = vld [vmem:[#allocation15 + $0x770] sm:$0xff]  ;;  %v2034_v24 = vld [vmem:[#allocation15 + $0x758] sm:$0xff] }
 0x76e   :  { %3052 = vmatprep.subr.mxu0 %v1950_v61  ;;  %2964 = vmatpush1.msra.mxu1 %v1821_v3  ;;  %v1905_v25 = vld [vmem:[#allocation15 + $0x350] sm:$0xff]  ;;  %v1902_v3 = vld [vmem:[#allocation15 + $0x338] sm:$0xff] }
 0x76f   :  { %3053 = vmatpush1.msra.mxu0 %v1949_v14  ;;  %2965 = vmatprep.subr.mxu1 %v1818_v42  ;;  %v2033_v61 = vld [vmem:[#allocation15 + $0x750] sm:$0xff]  ;;  %v2030_v14 = vld [vmem:[#allocation15 + $0x738] sm:$0xff] }
 0x770   :  { %3054 = vmatprep.subr.mxu0 %v1946_v21  ;;  %2966 = vmatpush1.msra.mxu1 %v1817_v50  ;;  %v1901_v50 = vld [vmem:[#allocation15 + $0x330] sm:$0xff] }
 0x771   :  { %3055 = vmatpush1.msra.mxu0 %v1945_v56  ;;  %2967 = vmatprep.subr.mxu1 %v1814_v18  ;;  %v2029_v56 = vld [vmem:[#allocation15 + $0x730] sm:$0xff] }
 0x772   :  { %3056 = vmatprep.subr.mxu0 %v1942_v4  ;;  %2968 = vmatpush1.msra.mxu1 %v1813_v26  ;;  %v1898_v4 = vld [vmem:[#allocation15 + $0x318] sm:$0xff] }
 0x773   :  { %3057 = vmatpush1.msra.mxu0 %v1941_v17  ;;  %2969 = vmatprep.subr.mxu1 %v1810_v22  ;;  %v2026_v26 = vld [vmem:[#allocation15 + $0x718] sm:$0xff] }
 0x774   :  { %3058 = vmatprep.subr.mxu0 %v1938_v28  ;;  %2970 = vmatpush1.msra.mxu1 %v1809_v10  ;;  %v1897_v28 = vld [vmem:[#allocation15 + $0x310] sm:$0xff] }
 0x775   :  { %3059 = vmatpush1.msra.mxu0 %v1937_v37  ;;  %2971 = vmatprep.subr.mxu1 %v1806_v20  ;;  %v2025_v10 = vld [vmem:[#allocation15 + $0x710] sm:$0xff]  ;;  %v1894_v20 = vld [vmem:[#allocation15 + $0x2f8] sm:$0xff] }
 0x776   :  { %3060 = vmatprep.subr.mxu0 %v1934_v41  ;;  %2972 = vmatpush1.msra.mxu1 %v1805_v34  ;;  %v2022_v41 = vld [vmem:[#allocation15 + $0x6f8] sm:$0xff]  ;;  %v1893_v34 = vld [vmem:[#allocation15 + $0x2f0] sm:$0xff] }
 0x777   :  { %3061 = vmatpush1.msra.mxu0 %v1933_v51  ;;  %2973 = vmatprep.subr.mxu1 %v1802_v38  ;;  %v2021_v51 = vld [vmem:[#allocation15 + $0x6f0] sm:$0xff]  ;;  %v1890_v38 = vld [vmem:[#allocation15 + $0x2d8] sm:$0xff] }
 0x778   :  { %3062 = vmatprep.subr.mxu0 %v1930_v54  ;;  %2974 = vmatpush1.msra.mxu1 %v1801_v55  ;;  %v2018_v54 = vld [vmem:[#allocation15 + $0x6d8] sm:$0xff] }
 0x779   :  { %3063 = vmatpush1.msra.mxu0 %v1929_v19  ;;  %2975 = vmatprep.subr.mxu1 %v1926_v9  ;;  %v1889_v9 = vld [vmem:[#allocation15 + $0x2d0] sm:$0xff] }
 0x77a   :  { %3064 = vmatprep.subr.mxu0 %v2054_v23  ;;  %2976 = vmatpush2.msra.mxu1 %v1925_v57  ;;  %v2017_v23 = vld [vmem:[#allocation15 + $0x6d0] sm:$0xff] }
 0x77b   :  { %3065 = vmatpush2.msra.mxu0 %v2053_v2  ;;  %2977 = vmatprep.subr.mxu1 %v1922_v47  ;;  %v1886_v2 = vld [vmem:[#allocation15 + $0x2b8] sm:$0xff] }
 0x77c   :  { %3066 = vmatprep.subr.mxu0 %v2050_v60  ;;  %2978 = vmatpush2.msra.mxu1 %v1921_v58  ;;  %v2014_v47 = vld [vmem:[#allocation15 + $0x6b8] sm:$0xff] }
 0x77d   :  { %3067 = vmatpush2.msra.mxu0 %v2049_v46  ;;  %2979 = vmatprep.subr.mxu1 %v1918_v48  ;;  %v1885_v46 = vld [vmem:[#allocation15 + $0x2b0] sm:$0xff] }
 0x77e   :  { %3068 = vmatprep.subr.mxu0 %v2046_v36  ;;  %2980 = vmatpush2.msra.mxu1 %v1917_v27  ;;  %v2013_v48 = vld [vmem:[#allocation15 + $0x6b0] sm:$0xff]  ;;  %v1882_v27 = vld [vmem:[#allocation15 + $0x298] sm:$0xff] }
 0x77f   :  { %3069 = vmatpush2.msra.mxu0 %v2045_v59  ;;  %2981 = vmatprep.subr.mxu1 %v1914_v52  ;;  %v2010_v59 = vld [vmem:[#allocation15 + $0x698] sm:$0xff]  ;;  %v1881_v52 = vld [vmem:[#allocation15 + $0x290] sm:$0xff] }
 0x780   :  { %3070 = vmatprep.subr.mxu0 %v2042_v53  ;;  %2982 = vmatpush2.msra.mxu1 %v1913_v29  ;;  %v2009_v53 = vld [vmem:[#allocation15 + $0x690] sm:$0xff]  ;;  %v1878_v29 = vld [vmem:[#allocation15 + $0x278] sm:$0xff] }
 0x781   :  { %3071 = vmatpush2.msra.mxu0 %v2041_v11  ;;  %2983 = vmatprep.subr.mxu1 %v1910_v16  ;;  %v2006_v11 = vld [vmem:[#allocation15 + $0x678] sm:$0xff] }
 0x782   :  { %3072 = vmatprep.subr.mxu0 %v2038_v6  ;;  %2984 = vmatpush2.msra.mxu1 %v1909_v32  ;;  %v2475_v42 = vpop.f32.mrf.mxu1  ;;  %v1877_v32 = vld [vmem:[#allocation15 + $0x270] sm:$0xff] }
 0x783   :  { %3073 = vmatpush2.msra.mxu0 %v2037_v40  ;;  %v2564_v21 = vpop.f32.mrf.mxu0  ;;  %2985 = vmatprep.subr.mxu1 %v1906_v63  ;;  %v2005_v40 = vld [vmem:[#allocation15 + $0x670] sm:$0xff] }
 0x784   :  { %3074 = vmatprep.subr.mxu0 %v2034_v24  ;;  %v6104_v18 = vadd.f32 %v2564_v21, %v2475_v42  ;;  %2986 = vmatpush2.msra.mxu1 %v1905_v25  ;;  %v2477_v17 = vpop.f32.mrf.mxu1  ;;  %v1874_v24 = vld [vmem:[#allocation15 + $0x258] sm:$0xff]  ;;  %v1869_v21 = vld [vmem:[#allocation15 + $0x230] sm:$0xff] }
 0x785   :  { %3075 = vmatpush2.msra.mxu0 %v2033_v61  ;;  %v2566_v22 = vpop.f32.mrf.mxu0  ;;  %2987 = vmatprep.subr.mxu1 %v1902_v3  ;;  %v2002_v25 = vld [vmem:[#allocation15 + $0x658] sm:$0xff]  ;;  %v1873_v61 = vld [vmem:[#allocation15 + $0x250] sm:$0xff] }
 0x786   :  { %3076 = vmatprep.subr.mxu0 %v2030_v14  ;;  %v6106_v37 = vadd.f32 %v2566_v22, %v2477_v17  ;;  %2988 = vmatpush2.msra.mxu1 %v1901_v50  ;;  %v2001_v3 = vld [vmem:[#allocation15 + $0x650] sm:$0xff]  ;;  %v1870_v14 = vld [vmem:[#allocation15 + $0x238] sm:$0xff]  ;;  %v3272_v22 = vld [vmem:[#allocation15 + $0x11e8] sm:$0xff] }
 0x787   :  { %3077 = vmatpush2.msra.mxu0 %v2029_v56  ;;  %2989 = vmatprep.subr.mxu1 %v1898_v4  ;;  %v1998_v42 = vld [vmem:[#allocation15 + $0x638] sm:$0xff]  ;;  %v1997_v50 = vld [vmem:[#allocation15 + $0x630] sm:$0xff] }
 0x788   :  { %3078 = vmatprep.subr.mxu0 %v2026_v26  ;;  %2990 = vmatpush2.msra.mxu1 %v1897_v28  ;;  %v2481_v55 = vpop.f32.mrf.mxu1  ;;  %v1866_v56 = vld [vmem:[#allocation15 + $0x218] sm:$0xff]  ;;  %v1865_v26 = vld [vmem:[#allocation15 + $0x210] sm:$0xff]  ;;  %v3400_v28 = vld [vmem:[#allocation15 + $0x15e8] sm:$0xff] }
 0x789   :  { %3079 = vmatpush2.msra.mxu0 %v2025_v10  ;;  %v2570_v19 = vpop.f32.mrf.mxu0  ;;  %2991 = vmatprep.subr.mxu1 %v1894_v20  ;;  %v1994_v4 = vld [vmem:[#allocation15 + $0x618] sm:$0xff]  ;;  %v1993_v17 = vld [vmem:[#allocation15 + $0x610] sm:$0xff]  ;;  %v3271_v10 = vld [vmem:[#allocation15 + $0x11e0] sm:$0xff] }
 0x78a   :  { %3080 = vmatprep.subr.mxu0 %v2022_v41  ;;  %v6108_v57 = vadd.f32 %v2570_v19, %v2481_v55  ;;  %2992 = vmatpush2.msra.mxu1 %v1893_v34  ;;  %v2483_v60 = vpop.f32.mrf.mxu1  ;;  %v3399_v20 = vld [vmem:[#allocation15 + $0x15e0] sm:$0xff]  ;;  %v3268_v41 = vld [vmem:[#allocation15 + $0x11c8] sm:$0xff] }
 0x78b   :  { %3081 = vmatpush2.msra.mxu0 %v2021_v51  ;;  %v2572_v58 = vpop.f32.mrf.mxu0  ;;  %2993 = vmatprep.subr.mxu1 %v1890_v38  ;;  %v3396_v34 = vld [vmem:[#allocation15 + $0x15c8] sm:$0xff]  ;;  %v3267_v51 = vld [vmem:[#allocation15 + $0x11c0] sm:$0xff] }
 0x78c   :  { %3082 = vmatprep.subr.mxu0 %v2018_v54  ;;  %v6110_v36 = vadd.f32 %v2572_v58, %v2483_v60  ;;  %2994 = vmatpush2.msra.mxu1 %v1889_v9  ;;  %v3395_v38 = vld [vmem:[#allocation15 + $0x15c0] sm:$0xff]  ;;  %v3264_v54 = vld [vmem:[#allocation15 + $0x11a8] sm:$0xff] }
 0x78d   :  { %3083 = vmatpush2.msra.mxu0 %v2017_v23  ;;  %2995 = vmatprep.subr.mxu1 %v1886_v2  ;;  %v3391_v55 = vld [vmem:[#allocation15 + $0x15a0] sm:$0xff]  ;;  %v3260_v19 = vld [vmem:[#allocation15 + $0x1188] sm:$0xff] }
 0x78e   :  { %3084 = vmatprep.subr.mxu0 %v2014_v47  ;;  %2996 = vmatpush2.msra.mxu1 %v1885_v46  ;;  %v2487_v16 = vpop.f32.mrf.mxu1  ;;  %v3388_v9 = vld [vmem:[#allocation15 + $0x1588] sm:$0xff]  ;;  %v3259_v23 = vld [vmem:[#allocation15 + $0x1180] sm:$0xff]  ;;  %v3124_v46 = vld [vmem:[#allocation2 + $0x18] sm:$0xfc] }
 0x78f   :  { %3085 = vmatpush2.msra.mxu0 %v2013_v48  ;;  %v2576_v6 = vpop.f32.mrf.mxu0  ;;  %2997 = vmatprep.subr.mxu1 %v1882_v27  ;;  %v3387_v2 = vld [vmem:[#allocation15 + $0x1580] sm:$0xff]  ;;  %v3256_v47 = vld [vmem:[#allocation15 + $0x1168] sm:$0xff] }
 0x790   :  { %3086 = vmatprep.subr.mxu0 %v2010_v59  ;;  %v6112_v63 = vadd.f32 %v2576_v6, %v2487_v16  ;;  %2998 = vmatpush2.msra.mxu1 %v1881_v52  ;;  %v3383_v60 = vld [vmem:[#allocation15 + $0x1560] sm:$0xff]  ;;  %v3163_v52 = vrot.slane %v3124_v46, 2  ;;  %v3244_v16 = vld [vmem:[#allocation15 + $0x1108] sm:$0xff] }
 0x791   :  { %3087 = vmatpush2.msra.mxu0 %v2009_v53  ;;  %2999 = vmatprep.subr.mxu1 %v1878_v29  ;;  %v3122_v58 = vld [vmem:[#allocation2 + $0x8] sm:$0xfc]  ;;  %v3158_v29 = vrot.slane %v6066_v39, 2  ;;  %v3372_v6 = vld [vmem:[#allocation15 + $0x1508] sm:$0xff] }
 0x792   :  { %3088 = vmatprep.subr.mxu0 %v2006_v11  ;;  %3000 = vmatpush2.msra.mxu1 %v1877_v32  ;;  %v3251_v48 = vld [vmem:[#allocation15 + $0x1140] sm:$0xff]  ;;  %v3157_v59 = vrot.slane %v3122_v58, 2  ;;  %v3464_v58 = vld [vmem:[#allocation15 + $0x17e8] sm:$0xff] }
 0x793   :  { %3089 = vmatpush2.msra.mxu0 %v2005_v40  ;;  %3001 = vmatprep.subr.mxu1 %v1874_v24  ;;  %v3379_v27 = vld [vmem:[#allocation15 + $0x1540] sm:$0xff]  ;;  %v3240_v40 = vld [vmem:[#allocation15 + $0x10e8] sm:$0xff] }
 0x794   :  { %3090 = vmatprep.subr.mxu0 %v2002_v25  ;;  %3002 = vmatpush2.msra.mxu1 %v1873_v61  ;;  %v3247_v53 = vld [vmem:[#allocation15 + $0x1120] sm:$0xff]  ;;  %v6133_v11 = vsel %vm3153_vm9, %v3157_v59, %v3158_v29  ;;  %v3368_v24 = vld [vmem:[#allocation15 + $0x14e8] sm:$0xff] }
 0x795   :  { %3091 = vmatpush2.msra.mxu0 %v2001_v3  ;;  %3003 = vmatprep.subr.mxu1 %v1870_v14  ;;  %v3371_v32 = vld [vmem:[#allocation15 + $0x1500] sm:$0xff]  ;;  %v3236_v3 = vld [vmem:[#allocation15 + $0x10c8] sm:$0xff] }
 0x796   :  { %3092 = vmatprep.subr.mxu0 %v1998_v42  ;;  %3004 = vmatpush2.msra.mxu1 %v1869_v21  ;;  %v3239_v25 = vld [vmem:[#allocation15 + $0x10e0] sm:$0xff]  ;;  %v3364_v14 = vld [vmem:[#allocation15 + $0x14c8] sm:$0xff] }
 0x797   :  { %3093 = vmatpush2.msra.mxu0 %v1997_v50  ;;  %3005 = vmatprep.subr.mxu1 %v1866_v56  ;;  %v3367_v61 = vld [vmem:[#allocation15 + $0x14e0] sm:$0xff]  ;;  %v3232_v50 = vld [vmem:[#allocation15 + $0x10a8] sm:$0xff] }
 0x798   :  { %3094 = vmatprep.subr.mxu0 %v1994_v4  ;;  %3006 = vmatpush2.msra.mxu1 %v1865_v26  ;;  %v3235_v42 = vld [vmem:[#allocation15 + $0x10c0] sm:$0xff]  ;;  %v3360_v56 = vld [vmem:[#allocation15 + $0x14a8] sm:$0xff] }
 0x799   :  { %3095 = vmatpush2.msra.mxu0 %v1993_v17  ;;  %3008 = vmatmul.mubr.f32.vlgmr.msra.gmra.mxu1 %v6060_v15  ;;  %v3392_v15 = vld [vmem:[#allocation15 + $0x15a8] sm:$0xff]  ;;  %v3363_v21 = vld [vmem:[#allocation15 + $0x14c0] sm:$0xff] }
 0x79a   :  { %3097 = vmatmul.mubr.f32.vlgmr.msra.gmra.mxu0 %v6062_v5  ;;  %3467 = vmatprep.subr.mxu1 %v3272_v22  ;;  %v3263_v5 = vld [vmem:[#allocation15 + $0x11a0] sm:$0xff]  ;;  %v3228_v17 = vld [vmem:[#allocation15 + $0x1088] sm:$0xff] }
 0x79b   :  { %3556 = vmatprep.subr.mxu0 %v3400_v28  ;;  %3013 = vmatprep.mubr.f32.mxu1 %v6066_v39  ;;  %v3231_v4 = vld [vmem:[#allocation15 + $0x10a0] sm:$0xff]  ;;  %v3356_v22 = vld [vmem:[#allocation15 + $0x1488] sm:$0xff] }
 0x79c   :  { %3102 = vmatprep.mubr.f32.mxu0 %v6069_v7  ;;  %3468 = vmatpush1.msra.mxu1 %v3271_v10  ;;  %v3359_v26 = vld [vmem:[#allocation15 + $0x14a0] sm:$0xff]  ;;  %v3460_v59 = vld [vmem:[#allocation15 + $0x17c8] sm:$0xff] }
 0x79d   :  { %3557 = vmatpush1.msra.mxu0 %v3399_v20  ;;  %3469 = vmatprep.subr.mxu1 %v3268_v41  ;;  %v3227_v28 = vld [vmem:[#allocation15 + $0x1080] sm:$0xff]  ;;  %v3224_v20 = vld [vmem:[#allocation15 + $0x1068] sm:$0xff] }
 0x79e   :  { %3558 = vmatprep.subr.mxu0 %v3396_v34  ;;  %3470 = vmatpush1.msra.mxu1 %v3267_v51  ;;  %v3355_v10 = vld [vmem:[#allocation15 + $0x1480] sm:$0xff]  ;;  %v3352_v41 = vld [vmem:[#allocation15 + $0x1468] sm:$0xff] }
 0x79f   :  { %3559 = vmatpush1.msra.mxu0 %v3395_v38  ;;  %3014 = vmatmul.mubr.f32.gmra.mxu1 %v6072_v0  ;;  %v3384_v0 = vld [vmem:[#allocation15 + $0x1568] sm:$0xff]  ;;  %v3223_v34 = vld [vmem:[#allocation15 + $0x1060] sm:$0xff] }
 0x7a0   :  { %3103 = vmatmul.mubr.f32.gmra.mxu0 %v6075_v35  ;;  %3471 = vmatprep.subr.mxu1 %v3264_v54  ;;  %v3255_v35 = vld [vmem:[#allocation15 + $0x1160] sm:$0xff]  ;;  %v3220_v38 = vld [vmem:[#allocation15 + $0x1048] sm:$0xff] }
 0x7a1   :  { %3560 = vmatprep.subr.mxu0 %v3392_v15  ;;  %3019 = vmatprep.mubr.f32.mxu1 %v6078_v8  ;;  %v3252_v8 = vld [vmem:[#allocation15 + $0x1148] sm:$0xff]  ;;  %v3351_v51 = vld [vmem:[#allocation15 + $0x1460] sm:$0xff] }
 0x7a2   :  { %3108 = vmatprep.mubr.f32.mxu0 %v6080_v44  ;;  %3472 = vmatpush1.msra.mxu1 %v3263_v5  ;;  %v3380_v44 = vld [vmem:[#allocation15 + $0x1548] sm:$0xff]  ;;  %v3219_v15 = vld [vmem:[#allocation15 + $0x1040] sm:$0xff] }
 0x7a3   :  { %3561 = vmatpush1.msra.mxu0 %v3391_v55  ;;  %3473 = vmatprep.subr.mxu1 %v3260_v19  ;;  %v3348_v54 = vld [vmem:[#allocation15 + $0x1448] sm:$0xff]  ;;  %v3347_v5 = vld [vmem:[#allocation15 + $0x1440] sm:$0xff] }
 0x7a4   :  { %3562 = vmatprep.subr.mxu0 %v3388_v9  ;;  %3474 = vmatpush1.msra.mxu1 %v3259_v23  ;;  %v3216_v55 = vld [vmem:[#allocation15 + $0x1028] sm:$0xff]  ;;  %v3215_v9 = vld [vmem:[#allocation15 + $0x1020] sm:$0xff] }
 0x7a5   :  { %3563 = vmatpush1.msra.mxu0 %v3387_v2  ;;  %3020 = vmatmul.mubr.f32.gmra.mxu1 %v6084_v31  ;;  %v3248_v31 = vld [vmem:[#allocation15 + $0x1128] sm:$0xff]  ;;  %v3343_v23 = vld [vmem:[#allocation15 + $0x1420] sm:$0xff] }
 0x7a6   :  { %3109 = vmatmul.mubr.f32.gmra.mxu0 %v6086_v30  ;;  %3475 = vmatprep.subr.mxu1 %v3256_v47  ;;  %v3376_v30 = vld [vmem:[#allocation15 + $0x1528] sm:$0xff]  ;;  %v3335_v46 = vld [vmem:[#allocation15 + $0x13e0] sm:$0xff] }
 0x7a7   :  { %3564 = vmatprep.subr.mxu0 %v3384_v0  ;;  %3025 = vmatprep.mubr.f32.mxu1 %v6090_v1  ;;  %v3375_v1 = vld [vmem:[#allocation15 + $0x1520] sm:$0xff]  ;;  %v3344_v19 = vld [vmem:[#allocation15 + $0x1428] sm:$0xff] }
 0x7a8   :  { %3114 = vmatprep.mubr.f32.mxu0 %v6093_v43  ;;  %3476 = vmatpush1.msra.mxu1 %v3255_v35  ;;  %v3164_v43 = vrot.slane %v6069_v7, 2  ;;  %v3212_v2 = vld [vmem:[#allocation15 + $0x1008] sm:$0xff]  ;;  %v3211_v0 = vld [vmem:[#allocation15 + $0x1000] sm:$0xff]  ;;  %v3266_v7 = vld [vmem:[#allocation15 + $0x11b8] sm:$0xff] }
 0x7a9   :  { %3565 = vmatpush1.msra.mxu0 %v3383_v60  ;;  %3477 = vmatprep.subr.mxu1 %v3252_v8  ;;  %v3340_v47 = vld [vmem:[#allocation15 + $0x1408] sm:$0xff]  ;;  %v3339_v35 = vld [vmem:[#allocation15 + $0x1400] sm:$0xff]  ;;  %v6142_v8 = vpop.f32.mrf.mxu1 }
 0x7aa   :  { %3566 = vmatprep.subr.mxu0 %v3380_v44  ;;  %3478 = vmatpush1.msra.mxu1 %v3251_v48  ;;  %v3336_v60 = vld [vmem:[#allocation15 + $0x13e8] sm:$0xff]  ;;  %v6144_v44 = vpop.f32.mrf.mxu0  ;;  %v3463_v48 = vld [vmem:[#allocation15 + $0x17e0] sm:$0xff] }
 0x7ab   :  { %3567 = vmatpush1.msra.mxu0 %v3379_v27  ;;  %3026 = vmatmul.mubr.f32.gmra.mxu1 %v6096_v62  ;;  %v6139_v62 = vsel %vm3153_vm9, %v3163_v52, %v3164_v43  ;;  %v3332_v27 = vld [vmem:[#allocation15 + $0x13c8] sm:$0xff] }
 0x7ac   :  { %3115 = vmatmul.mubr.f32.gmra.mxu0 %v6099_v45  ;;  %3479 = vmatprep.subr.mxu1 %v3248_v31  ;;  %v3243_v45 = vld [vmem:[#allocation15 + $0x1100] sm:$0xff]  ;;  %v3328_v52 = vld [vmem:[#allocation15 + $0x13a8] sm:$0xff] }
 0x7ad   :  { %3568 = vmatprep.subr.mxu0 %v3376_v30  ;;  %3480 = vmatpush1.msra.mxu1 %v3247_v53  ;;  %v3331_v31 = vld [vmem:[#allocation15 + $0x13c0] sm:$0xff]  ;;  %v3456_v53 = vld [vmem:[#allocation15 + $0x17a8] sm:$0xff] }
 0x7ae   :  { %3531 = vmatprep.mubr.f32.mxu1 %v6133_v11  ;;  %3569 = vmatpush1.msra.mxu0 %v3375_v1  ;;  %v3459_v30 = vld [vmem:[#allocation15 + $0x17c0] sm:$0xff]  ;;  %v6146_v1 = vpop.f32.mrf.mxu1 }
 0x7af   :  { %3620 = vmatprep.mubr.f32.mxu0 %v6139_v62  ;;  %3481 = vmatprep.subr.mxu1 %v3244_v16  ;;  %v6148_v16 = vpop.f32.mrf.mxu0 }
 0x7b0   :  { %3570 = vmatprep.subr.mxu0 %v3372_v6  ;;  %3482 = vmatpush1.msra.mxu1 %v3243_v45  ;;  %v3327_v6 = vld [vmem:[#allocation15 + $0x13a0] sm:$0xff] }
 0x7b1   :  { %3571 = vmatpush1.msra.mxu0 %v3371_v32  ;;  %3483 = vmatprep.subr.mxu1 %v3240_v40  ;;  %v3455_v45 = vld [vmem:[#allocation15 + $0x17a0] sm:$0xff]  ;;  %v3324_v32 = vld [vmem:[#allocation15 + $0x1388] sm:$0xff] }
 0x7b2   :  { %3572 = vmatprep.subr.mxu0 %v3368_v24  ;;  %3484 = vmatpush1.msra.mxu1 %v3239_v25  ;;  %v3452_v40 = vld [vmem:[#allocation15 + $0x1788] sm:$0xff]  ;;  %v3323_v24 = vld [vmem:[#allocation15 + $0x1380] sm:$0xff] }
 0x7b3   :  { %3573 = vmatpush1.msra.mxu0 %v3367_v61  ;;  %3485 = vmatprep.subr.mxu1 %v3236_v3  ;;  %v3451_v25 = vld [vmem:[#allocation15 + $0x1780] sm:$0xff]  ;;  %v3320_v61 = vld [vmem:[#allocation15 + $0x1368] sm:$0xff] }
 0x7b4   :  { %3574 = vmatprep.subr.mxu0 %v3364_v14  ;;  %3486 = vmatpush1.msra.mxu1 %v3235_v42  ;;  %v3448_v3 = vld [vmem:[#allocation15 + $0x1768] sm:$0xff]  ;;  %v6150_v14 = vpop.f32.mrf.mxu1  ;;  %v6152_v42 = vpop.f32.mrf.mxu0 }
 0x7b5   :  { %3575 = vmatpush1.msra.mxu0 %v3363_v21  ;;  %3487 = vmatprep.subr.mxu1 %v3232_v50  ;;  %v3319_v21 = vld [vmem:[#allocation15 + $0x1360] sm:$0xff] }
 0x7b6   :  { %3576 = vmatprep.subr.mxu0 %v3360_v56  ;;  %3488 = vmatpush1.msra.mxu1 %v3231_v4  ;;  %v3447_v50 = vld [vmem:[#allocation15 + $0x1760] sm:$0xff]  ;;  %v3316_v56 = vld [vmem:[#allocation15 + $0x1348] sm:$0xff] }
 0x7b7   :  { %3577 = vmatpush1.msra.mxu0 %v3359_v26  ;;  %3489 = vmatprep.subr.mxu1 %v3228_v17  ;;  %v3444_v4 = vld [vmem:[#allocation15 + $0x1748] sm:$0xff]  ;;  %v3315_v26 = vld [vmem:[#allocation15 + $0x1340] sm:$0xff] }
 0x7b8   :  { %3578 = vmatprep.subr.mxu0 %v3356_v22  ;;  %3490 = vmatpush1.msra.mxu1 %v3227_v28  ;;  %v3443_v17 = vld [vmem:[#allocation15 + $0x1740] sm:$0xff] }
 0x7b9   :  { %3579 = vmatpush1.msra.mxu0 %v3355_v10  ;;  %3491 = vmatprep.subr.mxu1 %v3224_v20  ;;  %v3312_v10 = vld [vmem:[#allocation15 + $0x1328] sm:$0xff] }
 0x7ba   :  { %3580 = vmatprep.subr.mxu0 %v3352_v41  ;;  %3492 = vmatpush1.msra.mxu1 %v3223_v34  ;;  %v3440_v20 = vld [vmem:[#allocation15 + $0x1728] sm:$0xff]  ;;  %v3311_v34 = vld [vmem:[#allocation15 + $0x1320] sm:$0xff] }
 0x7bb   :  { %3581 = vmatpush1.msra.mxu0 %v3351_v51  ;;  %3493 = vmatprep.subr.mxu1 %v3220_v38  ;;  %v3439_v51 = vld [vmem:[#allocation15 + $0x1720] sm:$0xff] }
 0x7bc   :  { %3582 = vmatprep.subr.mxu0 %v3348_v54  ;;  %3494 = vmatpush1.msra.mxu1 %v3219_v15  ;;  %v3308_v15 = vld [vmem:[#allocation15 + $0x1308] sm:$0xff] }
 0x7bd   :  { %3583 = vmatpush1.msra.mxu0 %v3347_v5  ;;  %3495 = vmatprep.subr.mxu1 %v3216_v55  ;;  %v3436_v5 = vld [vmem:[#allocation15 + $0x1708] sm:$0xff] }
 0x7be   :  { %3584 = vmatprep.subr.mxu0 %v3344_v19  ;;  %3496 = vmatpush1.msra.mxu1 %v3215_v9  ;;  %v3307_v19 = vld [vmem:[#allocation15 + $0x1300] sm:$0xff] }
 0x7bf   :  { %3585 = vmatpush1.msra.mxu0 %v3343_v23  ;;  %3497 = vmatprep.subr.mxu1 %v3212_v2  ;;  %v3435_v9 = vld [vmem:[#allocation15 + $0x1700] sm:$0xff]  ;;  %v3304_v23 = vld [vmem:[#allocation15 + $0x12e8] sm:$0xff] }
 0x7c0   :  { %3586 = vmatprep.subr.mxu0 %v3340_v47  ;;  %3498 = vmatpush1.msra.mxu1 %v3211_v0  ;;  %v3432_v2 = vld [vmem:[#allocation15 + $0x16e8] sm:$0xff]  ;;  %v3303_v47 = vld [vmem:[#allocation15 + $0x12e0] sm:$0xff] }
 0x7c1   :  { %3587 = vmatpush1.msra.mxu0 %v3339_v35  ;;  %3499 = vmatprep.subr.mxu1 %v3336_v60  ;;  %v3431_v0 = vld [vmem:[#allocation15 + $0x16e0] sm:$0xff] }
 0x7c2   :  { %3588 = vmatprep.subr.mxu0 %v3464_v58  ;;  %3500 = vmatpush2.msra.mxu1 %v3335_v46  ;;  %v3300_v58 = vld [vmem:[#allocation15 + $0x12c8] sm:$0xff] }
 0x7c3   :  { %3589 = vmatpush2.msra.mxu0 %v3463_v48  ;;  %3501 = vmatprep.subr.mxu1 %v3332_v27  ;;  %v3428_v46 = vld [vmem:[#allocation15 + $0x16c8] sm:$0xff]  ;;  %v3299_v27 = vld [vmem:[#allocation15 + $0x12c0] sm:$0xff] }
 0x7c4   :  { %3590 = vmatprep.subr.mxu0 %v3460_v59  ;;  %3502 = vmatpush2.msra.mxu1 %v3331_v31  ;;  %v3427_v59 = vld [vmem:[#allocation15 + $0x16c0] sm:$0xff] }
 0x7c5   :  { %3591 = vmatpush2.msra.mxu0 %v3459_v30  ;;  %3503 = vmatprep.subr.mxu1 %v3328_v52  ;;  %v3296_v52 = vld [vmem:[#allocation15 + $0x12a8] sm:$0xff] }
 0x7c6   :  { %3592 = vmatprep.subr.mxu0 %v3456_v53  ;;  %3504 = vmatpush2.msra.mxu1 %v3327_v6  ;;  %v3424_v53 = vld [vmem:[#allocation15 + $0x16a8] sm:$0xff] }
 0x7c7   :  { %3593 = vmatpush2.msra.mxu0 %v3455_v45  ;;  %3505 = vmatprep.subr.mxu1 %v3324_v32  ;;  %v3295_v45 = vld [vmem:[#allocation15 + $0x12a0] sm:$0xff] }
 0x7c8   :  { %3594 = vmatprep.subr.mxu0 %v3452_v40  ;;  %3506 = vmatpush2.msra.mxu1 %v3323_v24  ;;  %v3423_v32 = vld [vmem:[#allocation15 + $0x16a0] sm:$0xff]  ;;  %v3292_v40 = vld [vmem:[#allocation15 + $0x1288] sm:$0xff] }
 0x7c9   :  { %3595 = vmatpush2.msra.mxu0 %v3451_v25  ;;  %3507 = vmatprep.subr.mxu1 %v3320_v61  ;;  %v2653_v22 = vpop.f32.mrf.mxu1  ;;  %v3420_v24 = vld [vmem:[#allocation15 + $0x1688] sm:$0xff]  ;;  %v3291_v25 = vld [vmem:[#allocation15 + $0x1280] sm:$0xff] }
 0x7ca   :  { %3596 = vmatprep.subr.mxu0 %v3448_v3  ;;  %v2742_v28 = vpop.f32.mrf.mxu0  ;;  %3508 = vmatpush2.msra.mxu1 %v3319_v21  ;;  %v3419_v61 = vld [vmem:[#allocation15 + $0x1680] sm:$0xff] }
 0x7cb   :  { %3597 = vmatpush2.msra.mxu0 %v3447_v50  ;;  %v6154_v41 = vadd.f32 %v2742_v28, %v2653_v22  ;;  %3509 = vmatprep.subr.mxu1 %v3316_v56  ;;  %v2655_v38 = vpop.f32.mrf.mxu1  ;;  %v3288_v50 = vld [vmem:[#allocation15 + $0x1268] sm:$0xff] }
 0x7cc   :  { %3598 = vmatprep.subr.mxu0 %v3444_v4  ;;  %v2744_v54 = vpop.f32.mrf.mxu0  ;;  %3510 = vmatpush2.msra.mxu1 %v3315_v26  ;;  %v3416_v56 = vld [vmem:[#allocation15 + $0x1668] sm:$0xff]  ;;  %v3287_v26 = vld [vmem:[#allocation15 + $0x1260] sm:$0xff] }
 0x7cd   :  { %3599 = vmatpush2.msra.mxu0 %v3443_v17  ;;  %v6156_v55 = vadd.f32 %v2744_v54, %v2655_v38  ;;  %3511 = vmatprep.subr.mxu1 %v3312_v10  ;;  %v3415_v17 = vld [vmem:[#allocation15 + $0x1660] sm:$0xff]  ;;  %v3284_v10 = vld [vmem:[#allocation15 + $0x1248] sm:$0xff] }
 0x7ce   :  { %3600 = vmatprep.subr.mxu0 %v3440_v20  ;;  %3512 = vmatpush2.msra.mxu1 %v3311_v34  ;;  %v3412_v20 = vld [vmem:[#allocation15 + $0x1648] sm:$0xff]  ;;  %v3121_v34 = vld [vmem:[#allocation2] sm:$0xfc]  ;;  %v3283_v38 = vld [vmem:[#allocation15 + $0x1240] sm:$0xff] }
 0x7cf   :  { %3601 = vmatpush2.msra.mxu0 %v3439_v51  ;;  %3513 = vmatprep.subr.mxu1 %v3308_v15  ;;  %v2659_v35 = vpop.f32.mrf.mxu1  ;;  %v3411_v54 = vld [vmem:[#allocation15 + $0x1640] sm:$0xff]  ;;  %v3123_v15 = vld [vmem:[#allocation2 + $0x10] sm:$0xfc] }
 0x7d0   :  { %3602 = vmatprep.subr.mxu0 %v3436_v5  ;;  %v2748_v60 = vpop.f32.mrf.mxu0  ;;  %3514 = vmatpush2.msra.mxu1 %v3307_v19  ;;  %v3280_v5 = vld [vmem:[#allocation15 + $0x1228] sm:$0xff] }
 0x7d1   :  { %3603 = vmatpush2.msra.mxu0 %v3435_v9  ;;  %v6158_v48 = vadd.f32 %v2748_v60, %v2659_v35  ;;  %3515 = vmatprep.subr.mxu1 %v3304_v23  ;;  %v2661_v31 = vpop.f32.mrf.mxu1  ;;  %v3408_v19 = vld [vmem:[#allocation15 + $0x1628] sm:$0xff]  ;;  %v3126_v9 = vld [vmem:[#allocation2 + $0x48] sm:$0x3]  ;;  %v3279_v23 = vld [vmem:[#allocation15 + $0x1220] sm:$0xff] }
 0x7d2   :  { %3604 = vmatprep.subr.mxu0 %v3432_v2  ;;  %v2750_v30 = vpop.f32.mrf.mxu0  ;;  %3516 = vmatpush2.msra.mxu1 %v3303_v47  ;;  %v3407_v2 = vld [vmem:[#allocation15 + $0x1620] sm:$0xff]  ;;  %v3128_v47 = vld [vmem:[#allocation2 + $0x58] sm:$0x3] }
 0x7d3   :  { %3605 = vmatpush2.msra.mxu0 %v3431_v0  ;;  %v6160_v6 = vadd.f32 %v2750_v30, %v2661_v31  ;;  %3517 = vmatprep.subr.mxu1 %v3300_v58  ;;  %v3276_v60 = vld [vmem:[#allocation15 + $0x1208] sm:$0xff]  ;;  %v3275_v31 = vld [vmem:[#allocation15 + $0x1200] sm:$0xff] }
 0x7d4   :  { %3606 = vmatprep.subr.mxu0 %v3428_v46  ;;  %3518 = vmatpush2.msra.mxu1 %v3299_v27  ;;  %v3404_v58 = vld [vmem:[#allocation15 + $0x1608] sm:$0xff]  ;;  %v3154_v46 = vrot.slane %v3121_v34, 2  ;;  %v3160_v27 = vrot.slane %v3123_v15, 2  ;;  %v3403_v30 = vld [vmem:[#allocation15 + $0x1600] sm:$0xff]  ;;  %v3132_v34 = vld [vmem:[#allocation2 + $0x78] sm:$0xfc] }
 0x7d5   :  { %3607 = vmatpush2.msra.mxu0 %v3427_v59  ;;  %3519 = vmatprep.subr.mxu1 %v3296_v52  ;;  %v2665_v3 = vpop.f32.mrf.mxu1  ;;  %v4660_v52 = vld [vmem:[#allocation2 + $0x20] sm:$0xff] }
 0x7d6   :  { %3608 = vmatprep.subr.mxu0 %v3424_v53  ;;  %v2754_v21 = vpop.f32.mrf.mxu0  ;;  %3520 = vmatpush2.msra.mxu1 %v3295_v45  ;;  %v3155_v53 = vrot.slane %v4660_v52, 2  ;;  %v3270_v15 = vld [vmem:[#allocation15 + $0x11d8] sm:$0xff]  ;;  %v3265_v52 = vld [vmem:[#allocation15 + $0x11b0] sm:$0xff] }
 0x7d7   :  { %3609 = vmatpush2.msra.mxu0 %v3423_v32  ;;  %v6162_v4 = vadd.f32 %v2754_v21, %v2665_v3  ;;  %3521 = vmatprep.subr.mxu1 %v3292_v40  ;;  %v2667_v22 = vpop.f32.mrf.mxu1  ;;  %v4661_v40 = vld [vmem:[#allocation2 + $0x30] sm:$0xff]  ;;  %v3125_v3 = vld [vmem:[#allocation2 + $0x40] sm:$0x3] }
 0x7d8   :  { %3610 = vmatprep.subr.mxu0 %v3420_v24  ;;  %v2756_v28 = vpop.f32.mrf.mxu0  ;;  %3522 = vmatpush2.msra.mxu1 %v3291_v25  ;;  %v3161_v24 = vrot.slane %v4661_v40, 2  ;;  %v3168_v25 = vrot.slane %v3126_v9, 2 }
 0x7d9   :  { %3611 = vmatpush2.msra.mxu0 %v3419_v61  ;;  %v6164_v51 = vadd.f32 %v2756_v28, %v2667_v22  ;;  %3523 = vmatprep.subr.mxu1 %v3288_v50  ;;  %v3172_v61 = vrot.slane %v3128_v47, 2  ;;  %v3274_v50 = vld [vmem:[#allocation15 + $0x11f8] sm:$0xff]  ;;  %v3130_v28 = vld [vmem:[#allocation2 + $0x68] sm:$0xfc] }
 0x7da   :  { %3612 = vmatprep.subr.mxu0 %v3416_v56  ;;  %3524 = vmatpush2.msra.mxu1 %v3287_v26  ;;  %v3402_v56 = vld [vmem:[#allocation15 + $0x15f8] sm:$0xff]  ;;  %v3127_v26 = vld [vmem:[#allocation2 + $0x50] sm:$0x3]  ;;  %v6174_v22 = vsel %vm3153_vm9, %v3160_v27, %v3161_v24  ;;  %v3177_v39 = vrot.slane %v3130_v28, 2  ;;  %v4663_v27 = vld [vmem:[#allocation2 + $0x98] sm:$0xff] }
 0x7db   :  { %3613 = vmatpush2.msra.mxu0 %v3415_v17  ;;  %3525 = vmatprep.subr.mxu1 %v3284_v10  ;;  %v2671_v0 = vpop.f32.mrf.mxu1  ;;  %v6171_v17 = vsel %vm3153_vm9, %v3154_v46, %v3155_v53  ;;  %v3273_v10 = vld [vmem:[#allocation15 + $0x11f0] sm:$0xff]  ;;  %v3170_v9 = vrot.slane %v3127_v26, 2  ;;  %v3129_v47 = vld [vmem:[#allocation2 + $0x60] sm:$0xfc] }
 0x7dc   :  { %3614 = vmatprep.subr.mxu0 %v3412_v20  ;;  %v2760_v35 = vpop.f32.mrf.mxu0  ;;  %3526 = vmatpush2.msra.mxu1 %v3283_v38  ;;  %v3401_v20 = vld [vmem:[#allocation15 + $0x15f0] sm:$0xff]  ;;  %v6181_v38 = vsel %vm3153_vm9, %v3158_v29, %v3168_v25  ;;  %v3183_v29 = vrot.slane %v3132_v34, 2  ;;  %v3390_v25 = vld [vmem:[#allocation15 + $0x1598] sm:$0xff] }
 0x7dd   :  { %3615 = vmatpush2.msra.mxu0 %v3411_v54  ;;  %v6166_v59 = vadd.f32 %v2760_v35, %v2671_v0  ;;  %3527 = vmatprep.subr.mxu1 %v3280_v5  ;;  %v2673_v45 = vpop.f32.mrf.mxu1  ;;  %v6186_v54 = vsel %vm3153_vm9, %v3164_v43, %v3172_v61  ;;  %v3398_v5 = vld [vmem:[#allocation15 + $0x15d8] sm:$0xff]  ;;  %v3131_v0 = vld [vmem:[#allocation2 + $0x70] sm:$0xfc]  ;;  %v3174_v61 = vrot.slane %v3129_v47, 2  ;;  %v3385_v47 = vld [vmem:[#allocation15 + $0x1570] sm:$0xff] }
 0x7de   :  { %3616 = vmatprep.subr.mxu0 %v3408_v19  ;;  %v2762_v32 = vpop.f32.mrf.mxu0  ;;  %3528 = vmatpush2.msra.mxu1 %v3279_v23  ;;  %v3166_v19 = vrot.slane %v3125_v3, 2  ;;  %v3269_v23 = vld [vmem:[#allocation15 + $0x11d0] sm:$0xff]  ;;  %v3394_v43 = vld [vmem:[#allocation15 + $0x15b8] sm:$0xff]  ;;  %v3180_v3 = vrot.slane %v3131_v0, 2 }
 0x7df   :  { %3617 = vmatpush2.msra.mxu0 %v3407_v2  ;;  %v6168_v21 = vadd.f32 %v2762_v32, %v2673_v45  ;;  %3529 = vmatprep.subr.mxu1 %v3276_v60  ;;  %v3397_v2 = vld [vmem:[#allocation15 + $0x15d0] sm:$0xff]  ;;  %v6194_v60 = vsel %vm3153_vm9, %v3161_v24, %v3170_v9  ;;  %v3136_v32 = vld [vmem:[#allocation2 + $0xb8] sm:$0x3]  ;;  %v3262_v24 = vld [vmem:[#allocation15 + $0x1198] sm:$0xff] }
 0x7e0   :  { %3618 = vmatprep.subr.mxu0 %v3404_v58  ;;  %3530 = vmatpush2.msra.mxu1 %v3275_v31  ;;  %v6191_v35 = vsel %vm3153_vm9, %v3155_v53, %v3166_v19  ;;  %v4662_v58 = vld [vmem:[#allocation2 + $0x88] sm:$0xff]  ;;  %v3184_v31 = vrot.slane %v4663_v27, 2  ;;  %v3393_v45 = vld [vmem:[#allocation15 + $0x15b0] sm:$0xff] }
 0x7e1   :  { %3619 = vmatpush2.msra.mxu0 %v3403_v30  ;;  %3532 = vmatmul.mubr.f32.vlgmr.msra.gmra.mxu1 %v6171_v17  ;;  %v3178_v46 = vrot.slane %v4662_v58, 2  ;;  %v3134_v30 = vld [vmem:[#allocation2 + $0xa8] sm:$0x3]  ;;  %v4664_v26 = vld [vmem:[#allocation2 + $0x80] sm:$0xff] }
 0x7e2   :  { %3621 = vmatmul.mubr.f32.vlgmr.msra.gmra.mxu0 %v6174_v22  ;;  %3645 = vmatprep.subr.mxu1 %v3274_v50  ;;  %v6202_v40 = vsel %vm3153_vm9, %v3183_v29, %v3184_v31  ;;  %v3261_v50 = vld [vmem:[#allocation15 + $0x1190] sm:$0xff]  ;;  %v3175_v28 = vrot.slane %v4664_v26, 2  ;;  %v3188_v34 = vrot.slane %v3134_v30, 2  ;;  %v3258_v19 = vld [vmem:[#allocation15 + $0x1178] sm:$0xff] }
 0x7e3   :  { %3734 = vmatprep.subr.mxu0 %v3402_v56  ;;  %3537 = vmatprep.mubr.f32.mxu1 %v6181_v38  ;;  %v6199_v53 = vsel %vm3153_vm9, %v3177_v39, %v3178_v46  ;;  %v3389_v56 = vld [vmem:[#allocation15 + $0x1590] sm:$0xff]  ;;  %v3386_v9 = vld [vmem:[#allocation15 + $0x1578] sm:$0xff] }
 0x7e4   :  { %3626 = vmatprep.mubr.f32.mxu0 %v6186_v54  ;;  %3646 = vmatpush1.msra.mxu1 %v3273_v10  ;;  %v4665_v10 = vld [vmem:[#allocation2 + $0x90] sm:$0xff]  ;;  %v3257_v29 = vld [vmem:[#allocation15 + $0x1170] sm:$0xff]  ;;  %v3254_v0 = vld [vmem:[#allocation15 + $0x1158] sm:$0xff] }
 0x7e5   :  { %3735 = vmatpush1.msra.mxu0 %v3401_v20  ;;  %3647 = vmatprep.subr.mxu1 %v3270_v15  ;;  %v3181_v20 = vrot.slane %v4665_v10, 2  ;;  %v3192_v15 = vrot.slane %v3136_v32, 2  ;;  %v3382_v58 = vld [vmem:[#allocation15 + $0x1558] sm:$0xff]  ;;  %v3373_v26 = vld [vmem:[#allocation15 + $0x1510] sm:$0xff] }
 0x7e6   :  { %3736 = vmatprep.subr.mxu0 %v3398_v5  ;;  %3648 = vmatpush1.msra.mxu1 %v3269_v23  ;;  %v3133_v5 = vld [vmem:[#allocation2 + $0xa0] sm:$0x3]  ;;  %v3135_v23 = vld [vmem:[#allocation2 + $0xb0] sm:$0x3]  ;;  %v3250_v32 = vld [vmem:[#allocation15 + $0x1138] sm:$0xff] }
 0x7e7   :  { %3737 = vmatpush1.msra.mxu0 %v3397_v2  ;;  %3538 = vmatmul.mubr.f32.gmra.mxu1 %v6191_v35  ;;  %v6207_v2 = vsel %vm3153_vm9, %v3174_v61, %v3175_v28  ;;  %v6210_v39 = vsel %vm3153_vm9, %v3180_v3, %v3181_v20  ;;  %v3186_v27 = vrot.slane %v3133_v5, 2  ;;  %v3190_v30 = vrot.slane %v3135_v23, 2  ;;  %v3377_v61 = vld [vmem:[#allocation15 + $0x1530] sm:$0xff]  ;;  %v3246_v3 = vld [vmem:[#allocation15 + $0x1118] sm:$0xff] }
 0x7e8   :  { %3627 = vmatmul.mubr.f32.gmra.mxu0 %v6194_v60  ;;  %3649 = vmatprep.subr.mxu1 %v3266_v7  ;;  %v6215_v7 = vsel %vm3153_vm9, %v3178_v46, %v3188_v34  ;;  %v3378_v46 = vld [vmem:[#allocation15 + $0x1538] sm:$0xff]  ;;  %v3369_v34 = vld [vmem:[#allocation15 + $0x14f0] sm:$0xff] }
 0x7e9   :  { %3738 = vmatprep.subr.mxu0 %v3394_v43  ;;  %3543 = vmatprep.mubr.f32.mxu1 %v6199_v53  ;;  %v6218_v43 = vsel %vm3153_vm9, %v3184_v31, %v3192_v15  ;;  %v6223_v31 = vsel %vm3153_vm9, %v3175_v28, %v3186_v27  ;;  %v3242_v28 = vld [vmem:[#allocation15 + $0x10f8] sm:$0xff]  ;;  %v3357_v27 = vld [vmem:[#allocation15 + $0x1490] sm:$0xff] }
 0x7ea   :  { %3632 = vmatprep.mubr.f32.mxu0 %v6202_v40  ;;  %3650 = vmatpush1.msra.mxu1 %v3265_v52  ;;  %v3253_v52 = vld [vmem:[#allocation15 + $0x1150] sm:$0xff]  ;;  %v3370_v10 = vld [vmem:[#allocation15 + $0x14f8] sm:$0xff] }
 0x7eb   :  { %3739 = vmatpush1.msra.mxu0 %v3393_v45  ;;  %3651 = vmatprep.subr.mxu1 %v3262_v24  ;;  %v3381_v45 = vld [vmem:[#allocation15 + $0x1550] sm:$0xff]  ;;  %v6226_v24 = vsel %vm3153_vm9, %v3181_v20, %v3190_v30  ;;  %v3238_v15 = vld [vmem:[#allocation15 + $0x10d8] sm:$0xff] }
 0x7ec   :  { %3740 = vmatprep.subr.mxu0 %v3390_v25  ;;  %3652 = vmatpush1.msra.mxu1 %v3261_v50  ;;  %v3249_v25 = vld [vmem:[#allocation15 + $0x1130] sm:$0xff]  ;;  %v3374_v50 = vld [vmem:[#allocation15 + $0x1518] sm:$0xff] }
 0x7ed   :  { %3741 = vmatpush1.msra.mxu0 %v3389_v56  ;;  %3544 = vmatmul.mubr.f32.gmra.mxu1 %v6207_v2  ;;  %v3245_v56 = vld [vmem:[#allocation15 + $0x1110] sm:$0xff]  ;;  %v3366_v5 = vld [vmem:[#allocation15 + $0x14d8] sm:$0xff] }
 0x7ee   :  { %3633 = vmatmul.mubr.f32.gmra.mxu0 %v6210_v39  ;;  %3653 = vmatprep.subr.mxu1 %v3258_v19  ;;  %v3241_v20 = vld [vmem:[#allocation15 + $0x10f0] sm:$0xff]  ;;  %v3362_v23 = vld [vmem:[#allocation15 + $0x14b8] sm:$0xff] }
 0x7ef   :  { %3742 = vmatprep.subr.mxu0 %v3386_v9  ;;  %3549 = vmatprep.mubr.f32.mxu1 %v6215_v7  ;;  %v3237_v19 = vld [vmem:[#allocation15 + $0x10d0] sm:$0xff]  ;;  %v3226_v30 = vld [vmem:[#allocation15 + $0x1078] sm:$0xff] }
 0x7f0   :  { %3638 = vmatprep.mubr.f32.mxu0 %v6218_v43  ;;  %3654 = vmatpush1.msra.mxu1 %v3257_v29  ;;  %v3365_v9 = vld [vmem:[#allocation15 + $0x14d0] sm:$0xff] }
 0x7f1   :  { %3743 = vmatpush1.msra.mxu0 %v3385_v47  ;;  %3655 = vmatprep.subr.mxu1 %v3254_v0  ;;  %v3361_v29 = vld [vmem:[#allocation15 + $0x14b0] sm:$0xff]  ;;  %v3230_v47 = vld [vmem:[#allocation15 + $0x1098] sm:$0xff] }
 0x7f2   :  { %3744 = vmatprep.subr.mxu0 %v3382_v58  ;;  %3656 = vmatpush1.msra.mxu1 %v3253_v52  ;;  %v3358_v0 = vld [vmem:[#allocation15 + $0x1498] sm:$0xff]  ;;  %v3229_v58 = vld [vmem:[#allocation15 + $0x1090] sm:$0xff] }
 0x7f3   :  { %3745 = vmatpush1.msra.mxu0 %v3381_v45  ;;  %3550 = vmatmul.mubr.f32.gmra.mxu1 %v6223_v31  ;;  %v3354_v52 = vld [vmem:[#allocation15 + $0x1478] sm:$0xff]  ;;  %v3225_v45 = vld [vmem:[#allocation15 + $0x1070] sm:$0xff] }
 0x7f4   :  { %3639 = vmatmul.mubr.f32.gmra.mxu0 %v6226_v24  ;;  %3657 = vmatprep.subr.mxu1 %v3250_v32  ;;  %v3353_v32 = vld [vmem:[#allocation15 + $0x1470] sm:$0xff] }
 0x7f5   :  { %3746 = vmatprep.subr.mxu0 %v3378_v46  ;;  %3658 = vmatpush1.msra.mxu1 %v3249_v25  ;;  %v3222_v46 = vld [vmem:[#allocation15 + $0x1058] sm:$0xff] }
 0x7f6   :  { %3709 = vmatprep.mubr.f32.mxu1 %v6133_v11  ;;  %3747 = vmatpush1.msra.mxu0 %v3377_v61  ;;  %v3234_v11 = vld [vmem:[#allocation15 + $0x10b8] sm:$0xff]  ;;  %v3221_v61 = vld [vmem:[#allocation15 + $0x1050] sm:$0xff] }
 0x7f7   :  { %3798 = vmatprep.mubr.f32.mxu0 %v6139_v62  ;;  %3659 = vmatprep.subr.mxu1 %v3246_v3  ;;  %v3233_v62 = vld [vmem:[#allocation15 + $0x10b0] sm:$0xff]  ;;  %v3350_v25 = vld [vmem:[#allocation15 + $0x1458] sm:$0xff] }
 0x7f8   :  { %3748 = vmatprep.subr.mxu0 %v3374_v50  ;;  %3660 = vmatpush1.msra.mxu1 %v3245_v56  ;;  %v3349_v3 = vld [vmem:[#allocation15 + $0x1450] sm:$0xff]  ;;  %v3218_v50 = vld [vmem:[#allocation15 + $0x1038] sm:$0xff] }
 0x7f9   :  { %3749 = vmatpush1.msra.mxu0 %v3373_v26  ;;  %3661 = vmatprep.subr.mxu1 %v3242_v28  ;;  %v3346_v56 = vld [vmem:[#allocation15 + $0x1438] sm:$0xff]  ;;  %v3217_v26 = vld [vmem:[#allocation15 + $0x1030] sm:$0xff] }
 0x7fa   :  { %3750 = vmatprep.subr.mxu0 %v3370_v10  ;;  %3662 = vmatpush1.msra.mxu1 %v3241_v20  ;;  %v3345_v28 = vld [vmem:[#allocation15 + $0x1430] sm:$0xff]  ;;  %v3214_v10 = vld [vmem:[#allocation15 + $0x1018] sm:$0xff] }
 0x7fb   :  { %3751 = vmatpush1.msra.mxu0 %v3369_v34  ;;  %3663 = vmatprep.subr.mxu1 %v3238_v15  ;;  %v3342_v20 = vld [vmem:[#allocation15 + $0x1418] sm:$0xff]  ;;  %v3213_v34 = vld [vmem:[#allocation15 + $0x1010] sm:$0xff] }
 0x7fc   :  { %3752 = vmatprep.subr.mxu0 %v3366_v5  ;;  %3664 = vmatpush1.msra.mxu1 %v3237_v19  ;;  %v3341_v15 = vld [vmem:[#allocation15 + $0x1410] sm:$0xff]  ;;  %v3338_v5 = vld [vmem:[#allocation15 + $0x13f8] sm:$0xff] }
 0x7fd   :  { %3753 = vmatpush1.msra.mxu0 %v3365_v9  ;;  %3665 = vmatprep.subr.mxu1 %v3234_v11  ;;  %v3466_v19 = vld [vmem:[#allocation15 + $0x17f8] sm:$0xff]  ;;  %v3337_v9 = vld [vmem:[#allocation15 + $0x13f0] sm:$0xff] }
 0x7fe   :  { %3754 = vmatprep.subr.mxu0 %v3362_v23  ;;  %3666 = vmatpush1.msra.mxu1 %v3233_v62  ;;  %v3465_v11 = vld [vmem:[#allocation15 + $0x17f0] sm:$0xff]  ;;  %v3334_v23 = vld [vmem:[#allocation15 + $0x13d8] sm:$0xff] }
 0x7ff   :  { %3755 = vmatpush1.msra.mxu0 %v3361_v29  ;;  %3667 = vmatprep.subr.mxu1 %v3230_v47  ;;  %v3462_v62 = vld [vmem:[#allocation15 + $0x17d8] sm:$0xff]  ;;  %v3333_v29 = vld [vmem:[#allocation15 + $0x13d0] sm:$0xff] }
 0x800   :  { %3756 = vmatprep.subr.mxu0 %v3358_v0  ;;  %3668 = vmatpush1.msra.mxu1 %v3229_v58  ;;  %v3461_v47 = vld [vmem:[#allocation15 + $0x17d0] sm:$0xff]  ;;  %v3330_v0 = vld [vmem:[#allocation15 + $0x13b8] sm:$0xff] }
 0x801   :  { %3757 = vmatpush1.msra.mxu0 %v3357_v27  ;;  %3669 = vmatprep.subr.mxu1 %v3226_v30  ;;  %v3458_v58 = vld [vmem:[#allocation15 + $0x17b8] sm:$0xff]  ;;  %v3329_v27 = vld [vmem:[#allocation15 + $0x13b0] sm:$0xff] }
 0x802   :  { %3758 = vmatprep.subr.mxu0 %v3354_v52  ;;  %3670 = vmatpush1.msra.mxu1 %v3225_v45  ;;  %v3457_v30 = vld [vmem:[#allocation15 + $0x17b0] sm:$0xff]  ;;  %v3326_v52 = vld [vmem:[#allocation15 + $0x1398] sm:$0xff] }
 0x803   :  { %3759 = vmatpush1.msra.mxu0 %v3353_v32  ;;  %3671 = vmatprep.subr.mxu1 %v3222_v46  ;;  %v3454_v45 = vld [vmem:[#allocation15 + $0x1798] sm:$0xff]  ;;  %v3325_v32 = vld [vmem:[#allocation15 + $0x1390] sm:$0xff] }
 0x804   :  { %3760 = vmatprep.subr.mxu0 %v3350_v25  ;;  %3672 = vmatpush1.msra.mxu1 %v3221_v61  ;;  %v3453_v46 = vld [vmem:[#allocation15 + $0x1790] sm:$0xff]  ;;  %v3322_v25 = vld [vmem:[#allocation15 + $0x1378] sm:$0xff] }
 0x805   :  { %3761 = vmatpush1.msra.mxu0 %v3349_v3  ;;  %3673 = vmatprep.subr.mxu1 %v3218_v50  ;;  %v3450_v61 = vld [vmem:[#allocation15 + $0x1778] sm:$0xff]  ;;  %v3321_v3 = vld [vmem:[#allocation15 + $0x1370] sm:$0xff] }
 0x806   :  { %3762 = vmatprep.subr.mxu0 %v3346_v56  ;;  %3674 = vmatpush1.msra.mxu1 %v3217_v26  ;;  %v3449_v50 = vld [vmem:[#allocation15 + $0x1770] sm:$0xff]  ;;  %v3318_v56 = vld [vmem:[#allocation15 + $0x1358] sm:$0xff] }
 0x807   :  { %3763 = vmatpush1.msra.mxu0 %v3345_v28  ;;  %3675 = vmatprep.subr.mxu1 %v3214_v10  ;;  %v3446_v26 = vld [vmem:[#allocation15 + $0x1758] sm:$0xff]  ;;  %v3317_v28 = vld [vmem:[#allocation15 + $0x1350] sm:$0xff] }
 0x808   :  { %3764 = vmatprep.subr.mxu0 %v3342_v20  ;;  %3676 = vmatpush1.msra.mxu1 %v3213_v34  ;;  %v3445_v10 = vld [vmem:[#allocation15 + $0x1750] sm:$0xff]  ;;  %v3314_v20 = vld [vmem:[#allocation15 + $0x1338] sm:$0xff] }
 0x809   :  { %3765 = vmatpush1.msra.mxu0 %v3341_v15  ;;  %3677 = vmatprep.subr.mxu1 %v3338_v5  ;;  %v3442_v34 = vld [vmem:[#allocation15 + $0x1738] sm:$0xff]  ;;  %v3313_v15 = vld [vmem:[#allocation15 + $0x1330] sm:$0xff] }
 0x80a   :  { %3766 = vmatprep.subr.mxu0 %v3466_v19  ;;  %3678 = vmatpush2.msra.mxu1 %v3337_v9  ;;  %v3441_v5 = vld [vmem:[#allocation15 + $0x1730] sm:$0xff]  ;;  %v3310_v19 = vld [vmem:[#allocation15 + $0x1318] sm:$0xff] }
 0x80b   :  { %3767 = vmatpush2.msra.mxu0 %v3465_v11  ;;  %3679 = vmatprep.subr.mxu1 %v3334_v23  ;;  %v3438_v9 = vld [vmem:[#allocation15 + $0x1718] sm:$0xff]  ;;  %v3309_v11 = vld [vmem:[#allocation15 + $0x1310] sm:$0xff] }
 0x80c   :  { %3768 = vmatprep.subr.mxu0 %v3462_v62  ;;  %3680 = vmatpush2.msra.mxu1 %v3333_v29  ;;  %v3437_v23 = vld [vmem:[#allocation15 + $0x1710] sm:$0xff]  ;;  %v3306_v62 = vld [vmem:[#allocation15 + $0x12f8] sm:$0xff] }
 0x80d   :  { %3769 = vmatpush2.msra.mxu0 %v3461_v47  ;;  %3681 = vmatprep.subr.mxu1 %v3330_v0  ;;  %v3434_v29 = vld [vmem:[#allocation15 + $0x16f8] sm:$0xff]  ;;  %v3305_v47 = vld [vmem:[#allocation15 + $0x12f0] sm:$0xff] }
 0x80e   :  { %3770 = vmatprep.subr.mxu0 %v3458_v58  ;;  %3682 = vmatpush2.msra.mxu1 %v3329_v27  ;;  %v3433_v0 = vld [vmem:[#allocation15 + $0x16f0] sm:$0xff]  ;;  %v3302_v58 = vld [vmem:[#allocation15 + $0x12d8] sm:$0xff] }
 0x80f   :  { %3771 = vmatpush2.msra.mxu0 %v3457_v30  ;;  %3683 = vmatprep.subr.mxu1 %v3326_v52  ;;  %v3430_v27 = vld [vmem:[#allocation15 + $0x16d8] sm:$0xff]  ;;  %v3301_v30 = vld [vmem:[#allocation15 + $0x12d0] sm:$0xff] }
 0x810   :  { %3772 = vmatprep.subr.mxu0 %v3454_v45  ;;  %3684 = vmatpush2.msra.mxu1 %v3325_v32  ;;  %v3429_v52 = vld [vmem:[#allocation15 + $0x16d0] sm:$0xff]  ;;  %v3298_v45 = vld [vmem:[#allocation15 + $0x12b8] sm:$0xff] }
 0x811   :  { %3773 = vmatpush2.msra.mxu0 %v3453_v46  ;;  %3685 = vmatprep.subr.mxu1 %v3322_v25  ;;  %v3426_v32 = vld [vmem:[#allocation15 + $0x16b8] sm:$0xff]  ;;  %v3297_v46 = vld [vmem:[#allocation15 + $0x12b0] sm:$0xff] }
 0x812   :  { %3774 = vmatprep.subr.mxu0 %v3450_v61  ;;  %3686 = vmatpush2.msra.mxu1 %v3321_v3  ;;  %v3425_v25 = vld [vmem:[#allocation15 + $0x16b0] sm:$0xff]  ;;  %v3294_v61 = vld [vmem:[#allocation15 + $0x1298] sm:$0xff] }
 0x813   :  { %3775 = vmatpush2.msra.mxu0 %v3449_v50  ;;  %3687 = vmatprep.subr.mxu1 %v3318_v56  ;;  %v3422_v3 = vld [vmem:[#allocation15 + $0x1698] sm:$0xff]  ;;  %v3293_v50 = vld [vmem:[#allocation15 + $0x1290] sm:$0xff] }
 0x814   :  { %3776 = vmatprep.subr.mxu0 %v3446_v26  ;;  %3688 = vmatpush2.msra.mxu1 %v3317_v28  ;;  %v3421_v56 = vld [vmem:[#allocation15 + $0x1690] sm:$0xff]  ;;  %v3290_v26 = vld [vmem:[#allocation15 + $0x1278] sm:$0xff] }
 0x815   :  { %3777 = vmatpush2.msra.mxu0 %v3445_v10  ;;  %3689 = vmatprep.subr.mxu1 %v3314_v20  ;;  %v3418_v28 = vld [vmem:[#allocation15 + $0x1678] sm:$0xff]  ;;  %v3289_v10 = vld [vmem:[#allocation15 + $0x1270] sm:$0xff] }
 0x816   :  { %3778 = vmatprep.subr.mxu0 %v3442_v34  ;;  %3690 = vmatpush2.msra.mxu1 %v3313_v15  ;;  %v3417_v20 = vld [vmem:[#allocation15 + $0x1670] sm:$0xff]  ;;  %v3286_v34 = vld [vmem:[#allocation15 + $0x1258] sm:$0xff] }
 0x817   :  { %3779 = vmatpush2.msra.mxu0 %v3441_v5  ;;  %3691 = vmatprep.subr.mxu1 %v3310_v19  ;;  %v3414_v15 = vld [vmem:[#allocation15 + $0x1658] sm:$0xff]  ;;  %v3285_v5 = vld [vmem:[#allocation15 + $0x1250] sm:$0xff] }
 0x818   :  { %3780 = vmatprep.subr.mxu0 %v3438_v9  ;;  %3692 = vmatpush2.msra.mxu1 %v3309_v11  ;;  %v3413_v19 = vld [vmem:[#allocation15 + $0x1650] sm:$0xff]  ;;  %v3282_v9 = vld [vmem:[#allocation15 + $0x1238] sm:$0xff] }
 0x819   :  { %3781 = vmatpush2.msra.mxu0 %v3437_v23  ;;  %3693 = vmatprep.subr.mxu1 %v3306_v62  ;;  %v3410_v11 = vld [vmem:[#allocation15 + $0x1638] sm:$0xff]  ;;  %v3281_v23 = vld [vmem:[#allocation15 + $0x1230] sm:$0xff] }
 0x81a   :  { %3782 = vmatprep.subr.mxu0 %v3434_v29  ;;  %3694 = vmatpush2.msra.mxu1 %v3305_v47  ;;  %v3409_v62 = vld [vmem:[#allocation15 + $0x1630] sm:$0xff]  ;;  %v3278_v29 = vld [vmem:[#allocation15 + $0x1218] sm:$0xff] }
 0x81b   :  { %3783 = vmatpush2.msra.mxu0 %v3433_v0  ;;  %3695 = vmatprep.subr.mxu1 %v3302_v58  ;;  %v3406_v47 = vld [vmem:[#allocation15 + $0x1618] sm:$0xff]  ;;  %v3277_v0 = vld [vmem:[#allocation15 + $0x1210] sm:$0xff] }
 0x81c   :  { %3784 = vmatprep.subr.mxu0 %v3430_v27  ;;  %3696 = vmatpush2.msra.mxu1 %v3301_v30  ;;  %v3405_v58 = vld [vmem:[#allocation15 + $0x1610] sm:$0xff] }
 0x81d   :  { %3785 = vmatpush2.msra.mxu0 %v3429_v52  ;;  %3697 = vmatprep.subr.mxu1 %v3298_v45  ;;  %v4666_v27 = vld [vmem:[%s6662_s11 + $0xf8] sm:$0xff]  ;;  %v4680_v52 = vld [vmem:[%s6662_s11 + $0x60] sm:$0xff] }
 0x81e   :  { %3786 = vmatprep.subr.mxu0 %v3426_v32  ;;  %3698 = vmatpush2.msra.mxu1 %v3297_v46  ;;  %v4667_v30 = vld [vmem:[%s6662_s11 + $0x1f8] sm:$0xff] }
 0x81f   :  { %3787 = vmatpush2.msra.mxu0 %v3425_v25  ;;  %3699 = vmatprep.subr.mxu1 %v3294_v61  ;;  %v4683_v45 = vld [vmem:[%s6662_s11 + $0x1d8] sm:$0xff]  ;;  %v4686_v25 = vld [vmem:[%s6662_s11 + $0xd0] sm:$0xff] }
 0x820   :  { %3788 = vmatprep.subr.mxu0 %v3422_v3  ;;  %3700 = vmatpush2.msra.mxu1 %v3293_v50  ;;  %v4684_v32 = vld [vmem:[%s6662_s11 + $0x58] sm:$0xff]  ;;  %v4687_v61 = vld [vmem:[%s6662_s11 + $0x1d0] sm:$0xff]  ;;  %v6312_v3 = vpop.f32.mrf.mxu1  ;;  %v6314_v50 = vpop.f32.mrf.mxu0 }
 0x821   :  { %3789 = vmatpush2.msra.mxu0 %v3421_v56  ;;  %3701 = vmatprep.subr.mxu1 %v3290_v26  ;;  %v4685_v46 = vld [vmem:[%s6662_s11 + $0x158] sm:$0xff]  ;;  %v4688_v56 = vld [vmem:[%s6662_s11 + $0x50] sm:$0xff] }
 0x822   :  { %3790 = vmatprep.subr.mxu0 %v3418_v28  ;;  %3702 = vmatpush2.msra.mxu1 %v3289_v10  ;;  %v4689_v26 = vld [vmem:[%s6662_s11 + $0x150] sm:$0xff]  ;;  %v4690_v28 = vld [vmem:[%s6662_s11 + $0xc8] sm:$0xff] }
 0x823   :  { %3791 = vmatpush2.msra.mxu0 %v3417_v20  ;;  %3703 = vmatprep.subr.mxu1 %v3286_v34  ;;  %v4691_v10 = vld [vmem:[%s6662_s11 + $0x1c8] sm:$0xff] }
 0x824   :  { %3792 = vmatprep.subr.mxu0 %v3414_v15  ;;  %3704 = vmatpush2.msra.mxu1 %v3285_v5  ;;  %v4692_v20 = vld [vmem:[%s6662_s11 + $0x48] sm:$0xff]  ;;  %v4694_v15 = vld [vmem:[%s6662_s11 + $0xc0] sm:$0xff] }
 0x825   :  { %3793 = vmatpush2.msra.mxu0 %v3413_v19  ;;  %3705 = vmatprep.subr.mxu1 %v3282_v9  ;;  %v4693_v34 = vld [vmem:[%s6662_s11 + $0x148] sm:$0xff]  ;;  %v4695_v5 = vld [vmem:[%s6662_s11 + $0x1c0] sm:$0xff]  ;;  %v6340_v19 = vpop.f32.mrf.mxu1  ;;  %v6342_v9 = vpop.f32.mrf.mxu0 }
 0x826   :  { %3794 = vmatprep.subr.mxu0 %v3410_v11  ;;  %3706 = vmatpush2.msra.mxu1 %v3281_v23  ;;  %v4696_v11 = vld [vmem:[%s6662_s11 + $0x40] sm:$0xff] }
 0x827   :  { %3795 = vmatpush2.msra.mxu0 %v3409_v62  ;;  %3707 = vmatprep.subr.mxu1 %v3278_v29  ;;  %v4697_v23 = vld [vmem:[%s6662_s11 + $0x140] sm:$0xff]  ;;  %v4698_v62 = vld [vmem:[%s6662_s11 + $0xb8] sm:$0xff] }
 0x828   :  { %3796 = vmatprep.subr.mxu0 %v3406_v47  ;;  %3708 = vmatpush2.msra.mxu1 %v3277_v0  ;;  %v4699_v29 = vld [vmem:[%s6662_s11 + $0x1b8] sm:$0xff] }
 0x829   :  { %3797 = vmatpush2.msra.mxu0 %v3405_v58  ;;  %3710 = vmatmul.mubr.f32.vlgmr.msra.gmra.mxu1 %v6171_v17  ;;  %v4668_v17 = vld [vmem:[%s6662_s11 + $0x78] sm:$0xff]  ;;  %v4702_v58 = vld [vmem:[%s6662_s11 + $0xb0] sm:$0xff] }
 0x82a   :  { %3799 = vmatmul.mubr.f32.vlgmr.msra.gmra.mxu0 %v6174_v22  ;;  %3715 = vmatprep.mubr.f32.mxu1 %v6181_v38  ;;  %v4669_v22 = vld [vmem:[%s6662_s11 + $0x178] sm:$0xff]  ;;  %v4670_v38 = vld [vmem:[%s6662_s11 + $0xf0] sm:$0xff] }
 0x82b   :  { %3804 = vmatprep.mubr.f32.mxu0 %v6186_v54  ;;  %4539 = vmatprep.subr.mxu1 %v4666_v27  ;;  %v4671_v54 = vld [vmem:[%s6662_s11 + $0x1f0] sm:$0xff]  ;;  %v4700_v47 = vld [vmem:[%s6662_s11 + $0x38] sm:$0xff] }
 0x82c   :  { %4574 = vmatprep.subr.mxu0 %v4667_v30  ;;  %4540 = vmatpush3.msra.mxu1 %v4668_v17  ;;  %v4701_v0 = vld [vmem:[%s6662_s11 + $0x138] sm:$0xff]  ;;  %v4703_v27 = vld [vmem:[%s6662_s11 + $0x1b0] sm:$0xff]  ;;  %v6368_v30 = vpop.f32.mrf.mxu1  ;;  %v6370_v17 = vpop.f32.mrf.mxu0 }
 0x82d   :  { %4575 = vmatpush3.msra.mxu0 %v4669_v22  ;;  %3716 = vmatmul.mubr.f32.gmra.mxu1 %v6191_v35  ;;  %v4672_v35 = vld [vmem:[%s6662_s11 + $0x70] sm:$0xff] }
 0x82e   :  { %3805 = vmatmul.mubr.f32.gmra.mxu0 %v6194_v60  ;;  %3721 = vmatprep.mubr.f32.mxu1 %v6199_v53  ;;  %v4673_v60 = vld [vmem:[%s6662_s11 + $0x170] sm:$0xff]  ;;  %v4674_v53 = vld [vmem:[%s6662_s11 + $0xe8] sm:$0xff] }
 0x82f   :  { %3810 = vmatprep.mubr.f32.mxu0 %v6202_v40  ;;  %4541 = vmatprep.subr.mxu1 %v4670_v38  ;;  %v4675_v40 = vld [vmem:[%s6662_s11 + $0x1e8] sm:$0xff]  ;;  %v4704_v22 = vld [vmem:[%s6662_s11 + $0x30] sm:$0xff] }
 0x830   :  { %4576 = vmatprep.subr.mxu0 %v4671_v54  ;;  %4542 = vmatpush3.msra.mxu1 %v4672_v35  ;;  %v4705_v38 = vld [vmem:[%s6662_s11 + $0x130] sm:$0xff]  ;;  %v4706_v54 = vld [vmem:[%s6662_s11 + $0xa8] sm:$0xff] }
 0x831   :  { %4577 = vmatpush3.msra.mxu0 %v4673_v60  ;;  %3722 = vmatmul.mubr.f32.gmra.mxu1 %v6207_v2  ;;  %v4676_v2 = vld [vmem:[%s6662_s11 + $0x68] sm:$0xff] }
 0x832   :  { %3811 = vmatmul.mubr.f32.gmra.mxu0 %v6210_v39  ;;  %3727 = vmatprep.mubr.f32.mxu1 %v6215_v7  ;;  %v4677_v39 = vld [vmem:[%s6662_s11 + $0x168] sm:$0xff]  ;;  %v4678_v7 = vld [vmem:[%s6662_s11 + $0xe0] sm:$0xff] }
 0x833   :  { %3816 = vmatprep.mubr.f32.mxu0 %v6218_v43  ;;  %4543 = vmatprep.subr.mxu1 %v4674_v53  ;;  %v4679_v43 = vld [vmem:[%s6662_s11 + $0x1e0] sm:$0xff]  ;;  %v4707_v35 = vld [vmem:[%s6662_s11 + $0x1a8] sm:$0xff] }
 0x834   :  { %4578 = vmatprep.subr.mxu0 %v4675_v40  ;;  %4544 = vmatpush3.msra.mxu1 %v4676_v2  ;;  %v4708_v60 = vld [vmem:[%s6662_s11 + $0x28] sm:$0xff]  ;;  %v4710_v40 = vld [vmem:[%s6662_s11 + $0xa0] sm:$0xff] }
 0x835   :  { %4579 = vmatpush3.msra.mxu0 %v4677_v39  ;;  %3728 = vmatmul.mubr.f32.gmra.mxu1 %v6223_v31  ;;  %v4681_v31 = vld [vmem:[%s6662_s11 + $0x160] sm:$0xff]  ;;  %v4709_v53 = vld [vmem:[%s6662_s11 + $0x128] sm:$0xff]  ;;  %v6396_v39 = vpop.f32.mrf.mxu1 }
 0x836   :  { %3817 = vmatmul.mubr.f32.gmra.mxu0 %v6226_v24  ;;  %4545 = vmatprep.subr.mxu1 %v4678_v7  ;;  %v4682_v24 = vld [vmem:[%s6662_s11 + $0xd8] sm:$0xff]  ;;  %v4711_v2 = vld [vmem:[%s6662_s11 + $0x1a0] sm:$0xff]  ;;  %v6398_v7 = vpop.f32.mrf.mxu0 }
 0x837   :  { %4580 = vmatprep.subr.mxu0 %v4679_v43  ;;  %4546 = vmatpush3.msra.mxu1 %v4680_v52  ;;  %v4712_v43 = vld [vmem:[%s6662_s11 + $0x20] sm:$0xff] }
 0x838   :  { %4581 = vmatpush3.msra.mxu0 %v4681_v31  ;;  %4547 = vmatprep.subr.mxu1 %v4682_v24  ;;  %v4713_v52 = vld [vmem:[%s6662_s11 + $0x120] sm:$0xff]  ;;  %v4714_v31 = vld [vmem:[%s6662_s11 + $0x98] sm:$0xff] }
 0x839   :  { %4582 = vmatprep.subr.mxu0 %v4683_v45  ;;  %4548 = vmatpush3.msra.mxu1 %v4684_v32  ;;  %v4715_v24 = vld [vmem:[%s6662_s11 + $0x198] sm:$0xff] }
 0x83a   :  { %4583 = vmatpush3.msra.mxu0 %v4685_v46  ;;  %4549 = vmatprep.subr.mxu1 %v4686_v25  ;;  %v4716_v45 = vld [vmem:[%s6662_s11 + $0x18] sm:$0xff]  ;;  %v4718_v46 = vld [vmem:[%s6662_s11 + $0x90] sm:$0xff] }
 0x83b   :  { %4584 = vmatprep.subr.mxu0 %v4687_v61  ;;  %4550 = vmatpush3.msra.mxu1 %v4688_v56  ;;  %v4717_v32 = vld [vmem:[%s6662_s11 + $0x118] sm:$0xff]  ;;  %v4719_v25 = vld [vmem:[%s6662_s11 + $0x190] sm:$0xff]  ;;  %v6424_v61 = vpop.f32.mrf.mxu1  ;;  %v6426_v56 = vpop.f32.mrf.mxu0 }
 0x83c   :  { %4585 = vmatpush3.msra.mxu0 %v4689_v26  ;;  %4551 = vmatprep.subr.mxu1 %v4690_v28  ;;  %v4720_v26 = vld [vmem:[%s6662_s11 + $0x10] sm:$0xff] }
 0x83d   :  { %4586 = vmatprep.subr.mxu0 %v4691_v10  ;;  %4552 = vmatpush3.msra.mxu1 %v4692_v20  ;;  %v4721_v28 = vld [vmem:[%s6662_s11 + $0x110] sm:$0xff]  ;;  %v4722_v10 = vld [vmem:[%s6662_s11 + $0x88] sm:$0xff] }
 0x83e   :  { %4587 = vmatpush3.msra.mxu0 %v4693_v34  ;;  %4553 = vmatprep.subr.mxu1 %v4694_v15  ;;  %v4723_v20 = vld [vmem:[%s6662_s11 + $0x188] sm:$0xff] }
 0x83f   :  { %4588 = vmatprep.subr.mxu0 %v4695_v5  ;;  %4554 = vmatpush3.msra.mxu1 %v4696_v11  ;;  %v4724_v34 = vld [vmem:[%s6662_s11 + $0x8] sm:$0xff]  ;;  %v4726_v5 = vld [vmem:[%s6662_s11 + $0x80] sm:$0xff] }
 0x840   :  { %4589 = vmatpush3.msra.mxu0 %v4697_v23  ;;  %4555 = vmatprep.subr.mxu1 %v4698_v62  ;;  %v4725_v15 = vld [vmem:[%s6662_s11 + $0x108] sm:$0xff]  ;;  %v4727_v11 = vld [vmem:[%s6662_s11 + $0x180] sm:$0xff]  ;;  %v6452_v23 = vpop.f32.mrf.mxu1  ;;  %v6454_v62 = vpop.f32.mrf.mxu0 }
 0x841   :  { %4590 = vmatprep.subr.mxu0 %v4699_v29  ;;  %4556 = vmatpush3.msra.mxu1 %v4700_v47  ;;  %v4728_v29 = vld [vmem:[%s6662_s11] sm:$0xff] }
 0x842   :  { %4591 = vmatpush3.msra.mxu0 %v4701_v0  ;;  %4557 = vmatprep.subr.mxu1 %v4702_v58  ;;  %v4729_v47 = vld [vmem:[%s6662_s11 + $0x100] sm:$0xff]  ;;  %v4730_v0 = vld [vmem:[#allocation20 + $0x68] sm:$0xff]  ;;  %s5018_s11 = smov [#allocation21]  }
 0x843   :  { %4592 = vmatprep.subr.mxu0 %v4703_v27  ;;  %4558 = vmatpush3.msra.mxu1 %v4704_v22  ;;  %v4731_v58 = vld [vmem:[#allocation20 + $0x78] sm:$0xff]  ;;  %v6462_v27 = vpop.f32.mrf.mxu1  ;;  %v6464_v22 = vpop.f32.mrf.mxu0  ;;  %s4355_s27 = sshll.u32 %s5018_s11, 4  ;;  %s4356_s27 = int_to_ptr.vmem [resolvable:$true] %s4355_s27 }
 0x844   :  { %4593 = vmatpush3.msra.mxu0 %v4705_v38  ;;  %4559 = vmatprep.subr.mxu1 %v4706_v54  ;;  %s4966_s9 = scalar_lea.vmem %s4356_s27, 2048  ;;  %p4971_p0 = scmp.lt.s32.totalorder %s4356_s27, %s4356_s27 }
 0x845   :  { %4594 = vmatprep.subr.mxu0 %v4707_v35  ;;  %4560 = vmatpush3.msra.mxu1 %v4708_v60  ;;  %v6466_v38 = vpop.f32.mrf.mxu1  ;;  %v6468_v54 = vpop.f32.mrf.mxu0  ;;  %p4967_p13 = scmp.ne.s32.totalorder %s4356_s27, %s4966_s9  ;;  %p4972_p1 = scmp.lt.s32.totalorder %s4966_s9, %s4966_s9 }
 0x846   :  { %4595 = vmatpush3.msra.mxu0 %v4709_v53  ;;  %4561 = vmatprep.subr.mxu1 %v4710_v40 }
 0x847   :  { %4596 = vmatprep.subr.mxu0 %v4711_v2  ;;  %4562 = vmatpush3.msra.mxu1 %v4712_v43  ;;  %p4973_p2 = por %p4972_p1, %p4971_p0 }
 0x848   :  { %4597 = vmatpush3.msra.mxu0 %v4713_v52  ;;  %4563 = vmatprep.subr.mxu1 %v4714_v31 }
 0x849   :  { %4598 = vmatprep.subr.mxu0 %v4715_v24  ;;  %4564 = vmatpush3.msra.mxu1 %v4716_v45  ;;  %p4974_p3 = pnand %p4973_p2, %p4967_p13 }
 0x84a   :  { %4599 = vmatpush3.msra.mxu0 %v4717_v32  ;;  %4565 = vmatprep.subr.mxu1 %v4718_v46 }
 0x84b   :  { %4600 = vmatprep.subr.mxu0 %v4719_v25  ;;  %4566 = vmatpush3.msra.mxu1 %v4720_v26 }
 0x84c   :  { %4601 = vmatpush3.msra.mxu0 %v4721_v28  ;;  %4567 = vmatprep.subr.mxu1 %v4722_v10 }
 0x84d   :  { %4602 = vmatprep.subr.mxu0 %v4723_v20  ;;  %4568 = vmatpush3.msra.mxu1 %v4724_v34 }
 0x84e   :  { %4603 = vmatpush3.msra.mxu0 %v4725_v15  ;;  %4569 = vmatprep.subr.mxu1 %v4726_v5 }
 0x84f   :  { %4604 = vmatprep.subr.mxu0 %v4727_v11  ;;  %4570 = vmatpush3.msra.mxu1 %v4728_v29 }
 0x850   :  { %4605 = vmatpush3.msra.mxu0 %v4729_v47  ;;  %4136 = vmatprep.subr.mxu1 %v4730_v0 }
 0x851   :  { %4207 = vmatprep.subr.mxu0 %v4731_v58 }
 0x859   :  { %v3009_v35 = vpop.f32.mrf.mxu1 }
 0x85a   :  { %v3098_v60 = vpop.f32.mrf.mxu0  ;;  %v3010_v53 = vadd.f32 %v3009_v35, %v6154_v41 }
 0x85b   :  { %v3011_v40 = vpop.f32.mrf.mxu1 }
 0x85c   :  { %v3100_v2 = vpop.f32.mrf.mxu0  ;;  %v6471_v43 = vadd.f32 %v3098_v60, %v3010_v53  ;;  %v3012_v52 = vadd.f32 %v3011_v40, %v6156_v55 }
 0x85e   :  { %v6474_v31 = vadd.f32 %v3100_v2, %v3012_v52 }
 0x85f   :  { %v3015_v24 = vpop.f32.mrf.mxu1 }
 0x860   :  { %v3104_v45 = vpop.f32.mrf.mxu0  ;;  %v3016_v32 = vadd.f32 %v3015_v24, %v6158_v48 }
 0x861   :  { %v3017_v46 = vpop.f32.mrf.mxu1 }
 0x862   :  { %v3106_v25 = vpop.f32.mrf.mxu0  ;;  %v6477_v26 = vadd.f32 %v3104_v45, %v3016_v32  ;;  %v3018_v28 = vadd.f32 %v3017_v46, %v6160_v6  ;;  %v2840_v32 = vadd.f32 %v6396_v39, %v6110_v36 }
 0x864   :  { %v6480_v10 = vadd.f32 %v3106_v25, %v3018_v28  ;;  %v2579_v28 = vadd.f32 %v6144_v44, %v6142_v8 }
 0x865   :  { %v3021_v41 = vpop.f32.mrf.mxu1 }
 0x866   :  { %v3110_v20 = vpop.f32.mrf.mxu0  ;;  %v3022_v34 = vadd.f32 %v3021_v41, %v6162_v4  ;;  %v2844_v41 = vadd.f32 %v6424_v61, %v6112_v63  ;;  %v2583_v63 = vadd.f32 %v6148_v16, %v6146_v1 }
 0x867   :  { %v3023_v15 = vpop.f32.mrf.mxu1 }
 0x868   :  { %v3112_v55 = vpop.f32.mrf.mxu0  ;;  %v6483_v5 = vadd.f32 %v3110_v20, %v3022_v34  ;;  %v3024_v11 = vadd.f32 %v3023_v15, %v6164_v51  ;;  %v2838_v51 = vadd.f32 %v6368_v30, %v6108_v57  ;;  %v2834_v57 = vadd.f32 %v6340_v19, %v6106_v37 }
 0x869   :  { %v2933_v37 = vadd.f32 %v6426_v56, %v2844_v41 }
 0x86a   :  { %v6486_v29 = vadd.f32 %v3112_v55, %v3024_v11  ;;  %v2927_v30 = vadd.f32 %v6370_v17, %v2838_v51  ;;  %v2585_v17 = vadd.f32 %v6152_v42, %v6150_v14  ;;  %v2923_v61 = vadd.f32 %v6342_v9, %v2834_v57 }
 0x86b   :  { %v3027_v48 = vpop.f32.mrf.mxu1 }
 0x86c   :  { %v3116_v47 = vpop.f32.mrf.mxu0  ;;  %v3028_v0 = vadd.f32 %v3027_v48, %v6166_v59  ;;  %v2832_v59 = vadd.f32 %v6312_v3, %v6104_v18  ;;  %v2846_v18 = vadd.f32 %v6452_v23, %v2579_v28  ;;  %v2929_v3 = vadd.f32 %v6398_v7, %v2840_v32 }
 0x86d   :  { %v3029_v58 = vpop.f32.mrf.mxu1  ;;  %v2850_v48 = vadd.f32 %v6462_v27, %v2583_v63  ;;  %v2852_v16 = vadd.f32 %v6466_v38, %v2585_v17 }
 0x86e   :  { %v6489_v6 = vadd.f32 %v3116_v47, %v3028_v0  ;;  %v3030_v35 = vadd.f32 %v3029_v58, %v6168_v21  ;;  %v3118_v60 = vpop.f32.mrf.mxu0  ;;  %v2921_v36 = vadd.f32 %v6314_v50, %v2832_v59  ;;  %v2935_v11 = vadd.f32 %v6454_v62, %v2846_v18 }
 0x86f   :  { %v2939_v38 = vadd.f32 %v6464_v22, %v2850_v48 }
 0x870   :  { %v6492_v53 = vadd.f32 %v3118_v60, %v3030_v35 }
 0x8a1   :  { %v3533_v4 = vpop.f32.mrf.mxu1 }
 0x8a2   :  { %v3622_v40 = vpop.f32.mrf.mxu0 }
 0x8a3   :  { %v3535_v2 = vpop.f32.mrf.mxu1  ;;  %v3623_v20 = vadd.f32 %v3622_v40, %v3533_v4  ;;  %v2941_v4 = vadd.f32 %v6468_v54, %v2852_v16 }
 0x8a4   :  { %v3624_v52 = vpop.f32.mrf.mxu0 }
 0x8a5   :  { %v3625_v39 = vadd.f32 %v3624_v52, %v3535_v2  ;;  %v6518_v23 = vadd.f32 %v3623_v20, %v2921_v36 }
 0x8a7   :  { %v3539_v24 = vpop.f32.mrf.mxu1  ;;  %v6527_v56 = vadd.f32 %v3625_v39, %v2923_v61  ;;  %v3875_v9 = vmul.f32 %v6518_v23, %v6518_v23 }
 0x8a8   :  { %v3628_v45 = vpop.f32.mrf.mxu0 }
 0x8a9   :  { %v3629_v46 = vadd.f32 %v3628_v45, %v3539_v24  ;;  %v3541_v21 = vpop.f32.mrf.mxu1  ;;  %v3876_v40 = vmul.f32 %v6527_v56, %v6527_v56 }
 0x8aa   :  { %v3630_v25 = vpop.f32.mrf.mxu0 }
 0x8ab   :  { %v3631_v34 = vadd.f32 %v3630_v25, %v3541_v21  ;;  %v6510_v15 = vadd.f32 %v3629_v46, %v2927_v30 }
 0x8ad   :  { %v3545_v8 = vpop.f32.mrf.mxu1  ;;  %v6520_v50 = vadd.f32 %v3631_v34, %v2929_v3  ;;  %v3879_v14 = vmul.f32 %v6510_v15, %v6510_v15  ;;  %v3839_v35 = vadd.f32 %v6510_v15, %v6518_v23 }
 0x8ae   :  { %v3634_v44 = vpop.f32.mrf.mxu0 }
 0x8af   :  { %v3635_v19 = vadd.f32 %v3634_v44, %v3545_v8  ;;  %v3547_v7 = vpop.f32.mrf.mxu1  ;;  %v3880_v62 = vmul.f32 %v6520_v50, %v6520_v50  ;;  %v3891_v2 = vadd.f32 %v3879_v14, %v3875_v9  ;;  %v3848_v45 = vadd.f32 %v6520_v50, %v6527_v56 }
 0x8b0   :  { %v3636_v55 = vpop.f32.mrf.mxu0 }
 0x8b1   :  { %v6524_v47 = vadd.f32 %v3635_v19, %v2933_v37  ;;  %v3637_v1 = vadd.f32 %v3636_v55, %v3547_v7  ;;  %v3900_v46 = vadd.f32 %v3880_v62, %v3876_v40  ;;  %v4732_v40 = vld [vmem:[#allocation20 + $0x60] sm:$0xff] }
 0x8b3   :  { %v6531_v42 = vadd.f32 %v3637_v1, %v2935_v11  ;;  %v3883_v27 = vmul.f32 %v6524_v47, %v6524_v47  ;;  %v3551_v0 = vpop.f32.mrf.mxu1  ;;  %v3840_v22 = vadd.f32 %v3839_v35, %v6524_v47 }
 0x8b4   :  { %v3640_v58 = vpop.f32.mrf.mxu0 }
 0x8b5   :  { %v3641_v60 = vadd.f32 %v3640_v58, %v3551_v0  ;;  %v3884_v52 = vmul.f32 %v6531_v42, %v6531_v42  ;;  %v3553_v51 = vpop.f32.mrf.mxu1  ;;  %v3892_v21 = vadd.f32 %v3891_v2, %v3883_v27  ;;  %v3849_v54 = vadd.f32 %v3848_v45, %v6531_v42  ;;  %v4733_v2 = vld [vmem:[#allocation20 + $0x48] sm:$0xff] }
 0x8b6   :  { %v3642_v24 = vpop.f32.mrf.mxu0  ;;  %v4737_v45 = vld [vmem:[#allocation20 + $0x8] sm:$0xff] }
 0x8b7   :  { %v6550_v59 = vadd.f32 %v3641_v60, %v2939_v38  ;;  %v3643_v32 = vadd.f32 %v3642_v24, %v3553_v51  ;;  %v3901_v57 = vadd.f32 %v3900_v46, %v3884_v52  ;;  %v4734_v52 = vld [vmem:[#allocation20 + $0x40] sm:$0xff]  ;;  %v4735_v51 = vld [vmem:[#allocation20 + $0x28] sm:$0xff] }
 0x8b8   :  { %v4736_v24 = vld [vmem:[#allocation20 + $0x20] sm:$0xff] }
 0x8b9   :  { %v3841_v25 = vadd.f32 %v3840_v22, %v6550_v59  ;;  %v3887_v28 = vmul.f32 %v6550_v59, %v6550_v59  ;;  %v6556_v41 = vadd.f32 %v3643_v32, %v2941_v4  ;;  %v4738_v22 = vld [vmem:[#allocation20] sm:$0xff] }
 0x8bb   :  { %v3842_v30 = vrot.slane %v3841_v25, 4  ;;  %v3893_v20 = vadd.f32 %v3892_v21, %v3887_v28  ;;  %v3850_v34 = vadd.f32 %v3849_v54, %v6556_v41  ;;  %v3888_v18 = vmul.f32 %v6556_v41, %v6556_v41 }
 0x8bd   :  { %v3843_v36 = vadd.f32 %v3842_v30, %v3841_v25  ;;  %v3894_v3 = vrot.slane %v3893_v20, 4  ;;  %v3851_v39 = vrot.slane %v3850_v34, 4  ;;  %v3902_v8 = vadd.f32 %v3901_v57, %v3888_v18 }
 0x8bf   :  { %v3844_v44 = vrot.slane %v3843_v36, 2  ;;  %v3895_v63 = vadd.f32 %v3894_v3, %v3893_v20  ;;  %v3852_v37 = vadd.f32 %v3851_v39, %v3850_v34  ;;  %v3903_v19 = vrot.slane %v3902_v8, 4 }
 0x8c1   :  { %v3896_v17 = vrot.slane %v3895_v63, 2  ;;  %v3853_v61 = vrot.slane %v3852_v37, 2  ;;  %v3904_v7 = vadd.f32 %v3903_v19, %v3902_v8  ;;  %v3845_v55 = vadd.f32 %v3844_v44, %v3843_v36 }
 0x8c3   :  { %v3854_v11 = vadd.f32 %v3853_v61, %v3852_v37  ;;  %v3905_v48 = vrot.slane %v3904_v7, 2  ;;  %v3897_v1 = vadd.f32 %v3896_v17, %v3895_v63  ;;  %v3846_v62 = vrot.slane %v3845_v55, 1 }
 0x8c5   :  { %v3855_v16 = vrot.slane %v3854_v11, 1  ;;  %v3906_v14 = vadd.f32 %v3905_v48, %v3904_v7  ;;  %v3898_v9 = vrot.slane %v3897_v1, 1  ;;  %v3847_v35 = vadd.f32 %v3846_v62, %v3845_v55 }
 0x8c7   :  { %v3907_v27 = vrot.slane %v3906_v14, 1  ;;  %v3899_v0 = vadd.f32 %v3898_v9, %v3897_v1  ;;  %v3856_v58 = vadd.f32 %v3855_v16, %v3854_v11 }
 0x8c9   :  { %v3908_v38 = vadd.f32 %v3907_v27, %v3906_v14  ;;  %v3927_v4 = vsel %vm643_vm1, %v3847_v35, %v3899_v0 }
 0x8cb   :  { %v3928_v60 = vsel %vm643_vm1, %v3856_v58, %v3908_v38 }
 0x8cc   :  { %3995 = vmatprep.mubr.f32.mxu1 %v3928_v60 }
 0x8cd   :  { %3996 = vmatmul.mubr.f32.vlgmr.msra.gmra.mxu1 %v3927_v4 }
 0x8ce   :  { %4137 = vmatpush1.msra.mxu1 %v4732_v40  ;;  %4176 = vmatprep.mubr.f32.mxu1 %v6849_v49 }
 0x8cf   :  { %4138 = vmatprep.subr.mxu1 %v4733_v2 }
 0x8d0   :  { %4139 = vmatpush1.msra.mxu1 %v4734_v52 }
 0x8d1   :  { %4140 = vmatprep.subr.mxu1 %v4735_v51 }
 0x8d2   :  { %4141 = vmatpush1.msra.mxu1 %v4736_v24 }
 0x8d3   :  { %4142 = vmatprep.subr.mxu1 %v4737_v45 }
 0x8d4   :  { %4143 = vmatpush1.msra.mxu1 %v4738_v22 }
 0x8e9   :  { %v3711_v32 = vpop.f32.mrf.mxu1 }
 0x8ea   :  { %v3800_v46 = vpop.f32.mrf.mxu0 }
 0x8eb   :  { %v3713_v21 = vpop.f32.mrf.mxu1  ;;  %v3801_v25 = vadd.f32 %v3800_v46, %v3711_v32 }
 0x8ec   :  { %v3802_v54 = vpop.f32.mrf.mxu0 }
 0x8ed   :  { %v3717_v28 = vpop.f32.mrf.mxu1  ;;  %v3803_v20 = vadd.f32 %v3802_v54, %v3713_v21  ;;  %v6568_v39 = vadd.f32 %v3801_v25, %v6471_v43 }
 0x8ee   :  { %v3806_v57 = vpop.f32.mrf.mxu0 }
 0x8ef   :  { %v3807_v30 = vadd.f32 %v3806_v57, %v3717_v28  ;;  %v3719_v34 = vpop.f32.mrf.mxu1  ;;  %v6574_v19 = vadd.f32 %v3803_v20, %v6474_v31  ;;  %v3877_v43 = vmul.f32 %v6568_v39, %v6568_v39 }
 0x8f0   :  { %v3808_v18 = vpop.f32.mrf.mxu0 }
 0x8f1   :  { %v6565_v36 = vadd.f32 %v3807_v30, %v6477_v26  ;;  %v3809_v3 = vadd.f32 %v3808_v18, %v3719_v34  ;;  %v3723_v8 = vpop.f32.mrf.mxu1 }
 0x8f2   :  { %v3812_v44 = vpop.f32.mrf.mxu0 }
 0x8f3   :  { %v6571_v63 = vadd.f32 %v3809_v3, %v6480_v10  ;;  %v3813_v37 = vadd.f32 %v3812_v44, %v3723_v8  ;;  %v3881_v17 = vmul.f32 %v6565_v36, %v6565_v36  ;;  %v3725_v61 = vpop.f32.mrf.mxu1  ;;  %v3857_v31 = vadd.f32 %v6565_v36, %v6568_v39 }
 0x8f4   :  { %v3814_v7 = vpop.f32.mrf.mxu0 }
 0x8f5   :  { %v6579_v26 = vadd.f32 %v3813_v37, %v6483_v5  ;;  %v3882_v55 = vmul.f32 %v6571_v63, %v6571_v63  ;;  %v3815_v10 = vadd.f32 %v3814_v7, %v3725_v61  ;;  %v3729_v11 = vpop.f32.mrf.mxu1  ;;  %v3878_v5 = vmul.f32 %v6574_v19, %v6574_v19 }
 0x8f6   :  { %v3818_v48 = vpop.f32.mrf.mxu0  ;;  %v3909_v14 = vadd.f32 %v3881_v17, %v3877_v43  ;;  %v3866_v0 = vadd.f32 %v6571_v63, %v6574_v19 }
 0x8f7   :  { %v3885_v1 = vmul.f32 %v6579_v26, %v6579_v26  ;;  %v3819_v16 = vadd.f32 %v3818_v48, %v3729_v11  ;;  %v6592_v9 = vadd.f32 %v3815_v10, %v6486_v29  ;;  %v3731_v62 = vpop.f32.mrf.mxu1  ;;  %v3858_v58 = vadd.f32 %v3857_v31, %v6579_v26 }
 0x8f8   :  { %v3820_v27 = vpop.f32.mrf.mxu0  ;;  %v3918_v60 = vadd.f32 %v3882_v55, %v3878_v5  ;;  %v4739_v5 = vld [vmem:[#allocation20 + $0x70] sm:$0xff] }
 0x8f9   :  { %v6598_v38 = vadd.f32 %v3819_v16, %v6489_v6  ;;  %v3821_v35 = vadd.f32 %v3820_v27, %v3731_v62  ;;  %v3910_v4 = vadd.f32 %v3909_v14, %v3885_v1  ;;  %v3886_v40 = vmul.f32 %v6592_v9, %v6592_v9  ;;  %v4740_v14 = vld [vmem:[#allocation20 + $0x58] sm:$0xff]  ;;  %v4741_v62 = vld [vmem:[#allocation20 + $0x50] sm:$0xff] }
 0x8fa   :  { %v3867_v2 = vadd.f32 %v3866_v0, %v6592_v9  ;;  %v4742_v27 = vld [vmem:[#allocation20 + $0x38] sm:$0xff]  ;;  %v4743_v0 = vld [vmem:[#allocation20 + $0x30] sm:$0xff] }
 0x8fb   :  { %v3859_v29 = vadd.f32 %v3858_v58, %v6598_v38  ;;  %v3889_v52 = vmul.f32 %v6598_v38, %v6598_v38  ;;  %v6607_v51 = vadd.f32 %v3821_v35, %v6492_v53  ;;  %v3919_v24 = vadd.f32 %v3918_v60, %v3886_v40  ;;  %v4744_v58 = vld [vmem:[#allocation20 + $0x18] sm:$0xff]  ;;  %v4745_v35 = vld [vmem:[#allocation20 + $0x10] sm:$0xff] }
 0x8fd   :  { %v3860_v45 = vrot.slane %v3859_v29, 4  ;;  %v3911_v6 = vadd.f32 %v3910_v4, %v3889_v52  ;;  %v3868_v22 = vadd.f32 %v3867_v2, %v6607_v51  ;;  %v3890_v32 = vmul.f32 %v6607_v51, %v6607_v51 }
 0x8ff   :  { %v3861_v46 = vadd.f32 %v3860_v45, %v3859_v29  ;;  %v3912_v21 = vrot.slane %v3911_v6, 4  ;;  %v3869_v54 = vrot.slane %v3868_v22, 4  ;;  %v3920_v25 = vadd.f32 %v3919_v24, %v3890_v32 }
 0x901   :  { %v3862_v28 = vrot.slane %v3861_v46, 2  ;;  %v3913_v57 = vadd.f32 %v3912_v21, %v3911_v6  ;;  %v3870_v30 = vadd.f32 %v3869_v54, %v3868_v22  ;;  %v3921_v20 = vrot.slane %v3920_v25, 4 }
 0x903   :  { %v3914_v34 = vrot.slane %v3913_v57, 2  ;;  %v3871_v18 = vrot.slane %v3870_v30, 2  ;;  %v3922_v53 = vadd.f32 %v3921_v20, %v3920_v25  ;;  %v3863_v3 = vadd.f32 %v3862_v28, %v3861_v46  ;;  %v4078_v28 = vld [vmem:[#allocation17] sm:$0x1]  ;;  %v4099_v20 = vld [vmem:[#allocation18] sm:$0x1] }
 0x905   :  { %v3872_v8 = vadd.f32 %v3871_v18, %v3870_v30  ;;  %v3923_v44 = vrot.slane %v3922_v53, 2  ;;  %v3915_v37 = vadd.f32 %v3914_v34, %v3913_v57  ;;  %v3864_v43 = vrot.slane %v3863_v3, 1 }
 0x907   :  { %v3873_v17 = vrot.slane %v3872_v8, 1  ;;  %v3924_v61 = vadd.f32 %v3923_v44, %v3922_v53  ;;  %v3916_v7 = vrot.slane %v3915_v37, 1  ;;  %v3865_v31 = vadd.f32 %v3864_v43, %v3863_v3 }
 0x909   :  { %v3925_v55 = vrot.slane %v3924_v61, 1  ;;  %v3917_v10 = vadd.f32 %v3916_v7, %v3915_v37  ;;  %v3874_v11 = vadd.f32 %v3873_v17, %v3872_v8 }
 0x90b   :  { %v3926_v48 = vadd.f32 %v3925_v55, %v3924_v61  ;;  %v3929_v16 = vsel %vm643_vm1, %v3865_v31, %v3917_v10 }
 0x90d   :  { %v3930_v1 = vsel %vm643_vm1, %v3874_v11, %v3926_v48 }
 0x90e   :  { %4065 = vmatprep.mubr.f32.mxu0 %v3930_v1 }
 0x90f   :  { %4066 = vmatmul.mubr.f32.vlgmr.msra.gmra.mxu0 %v3929_v16 }
 0x910   :  { %4208 = vmatpush1.msra.mxu0 %v4739_v5  ;;  %4247 = vmatprep.mubr.f32.mxu0 %v6849_v49 }
 0x911   :  { %4209 = vmatprep.subr.mxu0 %v4740_v14 }
 0x912   :  { %4210 = vmatpush1.msra.mxu0 %v4741_v62 }
 0x913   :  { %4211 = vmatprep.subr.mxu0 %v4742_v27 }
 0x914   :  { %4212 = vmatpush1.msra.mxu0 %v4743_v0 }
 0x915   :  { %4213 = vmatprep.subr.mxu0 %v4744_v58 }
 0x916   :  { %4214 = vmatpush1.msra.mxu0 %v4745_v35 }
 0x98d   :  { %v4571_v60 = vpop.f32.mrf.mxu1 }
 0x98f   :  { %v4572_v4 = vpop.f32.mrf.mxu1 }
 0x990   :  { %v4573_v29 = vadd.f32 %v4572_v4, %v4571_v60 }
 0x9cf   :  { %v4606_v40 = vpop.f32.mrf.mxu0 }
 0x9d1   :  { %v4607_v2 = vpop.f32.mrf.mxu0 }
 0x9d2   :  { %v4608_v52 = vadd.f32 %v4607_v2, %v4606_v40 }
 0x9d4   :  { %v4068_v24 = vadd.f32 %v4608_v52, %v4573_v29 }
 0x9d6   :  { %v4071_v49 = vmul.f32 0.001953125, %v4068_v24 }
 0x9d8   :  { %v4072_v45 = vmul.f32 %v4071_v49, %v4071_v49 }
 0x9da   :  { %v4074_v6 = vrot.slane %v4072_v45, 7 }
 0x9dc   :  { %v4076_v22 = vsub.f32 %v4071_v49, %v4074_v6 }
 0x9de   :  { %v4077_v32 = vmax.f32 %v4076_v22, 0.0 }
 0x9e0   :  { %v4079_v46 = vadd.f32 1e-05, %v4077_v32 }
 0x9e2   :  { %4650 = vrsqrt.f32 %v4079_v46 }
 0x9ef   :  { %v4651_v21 = vpop.eup %4650 }
 0x9f0   :  { %v4088_v54 = vrot.slane %v4651_v21, %v5663_v13 }
 0x9f2   :  { %v4089_v25 = vcombine.high %v4088_v54, %v4088_v54 }
 0x9f4   :  { %v4096_v57 = vrot.slane %v4089_v25, %v5663_v13 }
 0x9f6   :  { %v4098_v30 = vmul.f32 %v4096_v57, %v4078_v28 }
 0x9f8   :  { %v4100_v34 = vmul.f32 %v4098_v30, %v4071_v49 }
 0x9fa   :  { %v4101_v18 = vsub.f32 %v4099_v20, %v4100_v34 }
 0x9fc   :  { %v4106_v53 = vrot.slane %v4101_v18, %v5668_v12 }
 0x9fe   :  { %v4108_v3 = vsel %vm643_vm1, %v4098_v30, %v4106_v53 }
 0x9ff   :  { %4390 = vmatmul.mubr.msk.f32.vlgmr.msra.gmra.mxu1 %vm826_vm2, %v4108_v3  ;;  %4391 = vmatmul.mubr.msk.f32.vlgmr.msra.gmra.mxu0 %vm826_vm2, %v4108_v3 }
 0xabf   :  { %v4178_v8 = vpop.f32.mrf.mxu1  ;;  %v4249_v44 = vpop.f32.mrf.mxu0 }
 0xac0   :  { %v4257_v37 = vrot.slane %v4178_v8, %v5668_v12  ;;  %v4265_v17 = vrot.slane %v4249_v44, %v5668_v12  ;;  %v4289_v13 = vrot.slane %v4178_v8, %v5739_v33  ;;  %v4297_v61 = vrot.slane %v4249_v44, %v5739_v33 }
 0xac1   :  { %v4180_v58 = vpop.f32.mrf.mxu1 }
 0xac2   :  { %v4270_v7 = vmul.f32 %v4257_v37, %v6518_v23  ;;  %v4274_v43 = vmul.f32 %v4257_v37, %v6510_v15  ;;  %v4278_v55 = vmul.f32 %v4257_v37, %v6524_v47  ;;  %v4282_v10 = vmul.f32 %v4257_v37, %v6550_v59  ;;  %v4251_v47 = vpop.f32.mrf.mxu0 }
 0xac3   :  { %v4272_v11 = vmul.f32 %v4265_v17, %v6568_v39  ;;  %v4276_v48 = vmul.f32 %v4265_v17, %v6565_v36  ;;  %v4280_v31 = vmul.f32 %v4265_v17, %v6579_v26  ;;  %v4284_v1 = vmul.f32 %v4265_v17, %v6598_v38 }
 0xac4   :  { %v4302_v16 = vadd.f32 %v4289_v13, %v4270_v7  ;;  %v4306_v5 = vadd.f32 %v4289_v13, %v4274_v43  ;;  %v4310_v14 = vadd.f32 %v4289_v13, %v4278_v55  ;;  %v4314_v62 = vadd.f32 %v4289_v13, %v4282_v10 }
 0xac5   :  { %v4304_v27 = vadd.f32 %v4297_v61, %v4272_v11  ;;  %v4308_v23 = vadd.f32 %v4297_v61, %v4276_v48  ;;  %v4312_v0 = vadd.f32 %v4297_v61, %v4280_v31  ;;  %v4316_v15 = vadd.f32 %v4297_v61, %v4284_v1 }
 0xac6   :  { %v4318_v35 = vmax.f32 %v4302_v16, 0.0  ;;  %v4322_v59 = vmax.f32 %v4306_v5, 0.0  ;;  %v4326_v60 = vmax.f32 %v4310_v14, 0.0  ;;  %v4330_v39 = vmax.f32 %v4314_v62, 0.0 }
 0xac7   :  { %v4320_v4 = vmax.f32 %v4304_v27, 0.0  ;;  %v4324_v36 = vmax.f32 %v4308_v23, 0.0  ;;  %v4328_v40 = vmax.f32 %v4312_v0, 0.0  ;;  %v4332_v26 = vmax.f32 %v4316_v15, 0.0 }
 0xac8   :  { %4334 = vst [vmem:[#allocation21] sm:$0xff] %v4318_v35  ;;  %4338 = vst [vmem:[#allocation21 + $0x20] sm:$0xff] %v4322_v59  ;;  %v4261_v38 = vrot.slane %v4180_v58, %v5668_v12  ;;  %v4269_v2 = vrot.slane %v4251_v47, %v5668_v12  ;;  %v4293_v29 = vrot.slane %v4180_v58, %v5739_v33 }
 0xac9   :  { %4342 = vst [vmem:[#allocation21 + $0x40] sm:$0xff] %v4326_v60  ;;  %4346 = vst [vmem:[#allocation21 + $0x60] sm:$0xff] %v4330_v39  ;;  %v4301_v52 = vrot.slane %v4251_v47, %v5739_v33 }
 0xaca   :  { %4336 = vst [vmem:[#allocation21 + $0x10] sm:$0xff] %v4320_v4  ;;  %4340 = vst [vmem:[#allocation21 + $0x30] sm:$0xff] %v4324_v36  ;;  %v4271_v24 = vmul.f32 %v4261_v38, %v6527_v56  ;;  %v4275_v49 = vmul.f32 %v4261_v38, %v6520_v50  ;;  %v4279_v45 = vmul.f32 %v4261_v38, %v6531_v42 }
 0xacb   :  { %4344 = vst [vmem:[#allocation21 + $0x50] sm:$0xff] %v4328_v40  ;;  %4348 = vst [vmem:[#allocation21 + $0x70] sm:$0xff] %v4332_v26  ;;  %v4283_v6 = vmul.f32 %v4261_v38, %v6556_v41  ;;  %v4273_v22 = vmul.f32 %v4269_v2, %v6574_v19  ;;  %v4277_v12 = vmul.f32 %v4269_v2, %v6571_v63 }
 0xacc   :  { %v4281_v32 = vmul.f32 %v4269_v2, %v6592_v9  ;;  %v4285_v46 = vmul.f32 %v4269_v2, %v6607_v51  ;;  %v4303_v21 = vadd.f32 %v4293_v29, %v4271_v24  ;;  %v4307_v54 = vadd.f32 %v4293_v29, %v4275_v49 }
 0xacd   :  { %v4311_v25 = vadd.f32 %v4293_v29, %v4279_v45  ;;  %v4315_v33 = vadd.f32 %v4293_v29, %v4283_v6  ;;  %v4305_v56 = vadd.f32 %v4301_v52, %v4273_v22  ;;  %v4309_v50 = vadd.f32 %v4301_v52, %v4277_v12 }
 0xace   :  { %v4313_v28 = vadd.f32 %v4301_v52, %v4281_v32  ;;  %v4317_v42 = vadd.f32 %v4301_v52, %v4285_v46  ;;  %v4319_v57 = vmax.f32 %v4303_v21, 0.0  ;;  %v4323_v41 = vmax.f32 %v4307_v54, 0.0 }
 0xacf   :  { %v4327_v30 = vmax.f32 %v4311_v25, 0.0  ;;  %v4331_v19 = vmax.f32 %v4315_v33, 0.0  ;;  %v4321_v20 = vmax.f32 %v4305_v56, 0.0  ;;  %v4325_v63 = vmax.f32 %v4309_v50, 0.0 }
 0xad0   :  { %v4329_v34 = vmax.f32 %v4313_v28, 0.0  ;;  %v4333_v9 = vmax.f32 %v4317_v42, 0.0  ;;  %4335 = vst [vmem:[#allocation21 + $0x8] sm:$0xff] %v4319_v57  ;;  %4339 = vst [vmem:[#allocation21 + $0x28] sm:$0xff] %v4323_v41 }
 0xad1   :  { %4343 = vst [vmem:[#allocation21 + $0x48] sm:$0xff] %v4327_v30  ;;  %4347 = vst [vmem:[#allocation21 + $0x68] sm:$0xff] %v4331_v19 }
 0xad2   :  { %4337 = vst [vmem:[#allocation21 + $0x18] sm:$0xff] %v4321_v20  ;;  %4341 = vst [vmem:[#allocation21 + $0x38] sm:$0xff] %v4325_v63 }
 0xad3   :  { %4345 = vst [vmem:[#allocation21 + $0x58] sm:$0xff] %v4329_v34  ;;  %4349 = vst [vmem:[#allocation21 + $0x78] sm:$0xff] %v4333_v9 }
 0xad4   :  { %4977 = shalt.err (!%p4974_p3)
}
 0xad5   :  { %4361 = dma.vmem_to_hbm [thread:$0]  %s4356_s27, 2048, %s6664_s13, [#allocation5], %s5001_s28, %s5001_s28, %s5002_s29  }
 0xad6   :  { %4998 = dma.done.wait [#allocation5], 2048  }
 0xad7   :  { %4999 = vsyncadd [#allocation5], 4294965248 }
 0xad8   :  { %4365 = vsyncpa [#allocation4], 1 }
 0xad9   :  { %4366 = vsyncpa [#allocation7], 1 }
 0xada   :  { %4367 = vsyncpa [#allocation10], 1 }
 0xadb   :  { %4368 = vsyncpa [#allocation13], 1 }
 0xadc   :  { %4369 = vsyncpa [#allocation16], 1 }
 0xadd   :  { %4370 = vsyncpa [#allocation19], 1 }
 0xade   :  { %4371 = vsyncpa [#allocation5], 1 }

</bundles_post_ra>
